<compile_context>
chip_gen: v5e
topology: v5e:2x2
jax: 0.10.0
libtpu: 0.0.40
codegen_flags: <defaults>
</compile_context>

<pallas_src>
import math

import jax
import jax.numpy as jnp
from jax import lax
from jax.experimental import pallas as pl
from jax.experimental.pallas import tpu as pltpu


def _round_up(n: int, m: int) -> int:
    return ((n + m - 1) // m) * m


def _gelu_exact(x):
    # PyTorch nn.GELU() default = exact erf form (kept exact to match the
    # module; the tanh approximation would route to the EUP but changes
    # numerics by ~1e-3).
    return 0.5 * x * (1.0 + lax.erf(x * (1.0 / math.sqrt(2.0))))


def simplenet_kernel(x_ref, w_in_ref, b_in_ref,
                     w1_ref, b1_ref, w2_ref, b2_ref,
                     w_out_ref, b_out_ref,
                     o_ref, h_ref):
    """One (batch-tile i, block-depth d) grid step.

    x_ref     : (TB, in_pad) f32   input rows; column `in_dim` carries t
    w_in_ref  : (in_pad, dim) bf16 rows = [W_in ; w_t ; zeros]
    b_in_ref  : (1, dim) f32       = b_in + b_t (fused)
    w1/b1/w2/b2: weights of the CURRENT residual block (streamed over depth)
    w_out_ref : (dim, out_pad) bf16, b_out_ref: (1, out_pad) f32
    o_ref     : (TB, out_pad)      lane-dense output tile
    h_ref     : (TB, dim) f32      scratch carrying h across the depth axis
    """
    d = pl.program_id(1)
    last = pl.num_programs(1) - 1

    # ---- prologue: input projection + time embedding (folded), once per tile
    @pl.when(d == 0)
    def _():
        x = x_ref[...].astype(jnp.bfloat16)
        h0 = jnp.dot(x, w_in_ref[...], preferred_element_type=jnp.float32)
        h_ref[...] = h0 + b_in_ref[...]

    # ---- residual MLP block d (only this block's weights are resident) -----
    h = h_ref[...]                                            # (TB, dim) f32
    hid = jnp.dot(h.astype(jnp.bfloat16), w1_ref[...],
                  preferred_element_type=jnp.float32) + b1_ref[...]
    hid = _gelu_exact(hid)                                    # f32 epilogue
    out = jnp.dot(hid.astype(jnp.bfloat16), w2_ref[...],
                  preferred_element_type=jnp.float32) + b2_ref[...]
    h = h + out                                               # residual in f32
    h_ref[...] = h

    # ---- epilogue: output projection + lane-dense store --------------------
    @pl.when(d == last)
    def _():
        y = jnp.dot(h.astype(jnp.bfloat16), w_out_ref[...],
                    preferred_element_type=jnp.float32) + b_out_ref[...]
        o_ref[...] = y.astype(o_ref.dtype)


def simplenet_forward(x, t, params, *, tile_b=128):
    """x: (B, in_dim) f32, t: (B, 1) f32, params: f32 master weights."""
    B, in_dim = x.shape
    dim = params["w_in"].shape[1]
    depth = len(params["blocks"])
    hidden = params["blocks"][0]["w1"].shape[1]
    assert depth >= 1

    wdt = jnp.bfloat16                      # MXU operand dtype; accum stays f32
    b_pad = _round_up(B, tile_b)
    in_pad = _round_up(in_dim + 1, 128)     # +1 column carries t
    out_pad = _round_up(in_dim, 128)        # lane-dense output

    # --- fold t into the zero-padded input and W_t into the input weights ---
    x_p = jnp.zeros((b_pad, in_pad), jnp.float32)
    x_p = x_p.at[:B, :in_dim].set(x.astype(jnp.float32))
    x_p = x_p.at[:B, in_dim].set(t[:, 0].astype(jnp.float32))

    w_in = jnp.zeros((in_pad, dim), wdt)
    w_in = w_in.at[:in_dim, :].set(params["w_in"].astype(wdt))
    w_in = w_in.at[in_dim, :].set(params["w_t"][0].astype(wdt))
    b_in = (params["b_in"] + params["b_t"]).astype(jnp.float32)          # (1, dim)

    # --- stack block weights so they stream over the depth grid axis --------
    w1s = jnp.stack([b["w1"] for b in params["blocks"]]).astype(wdt)          # (D, dim, hid)
    b1s = jnp.stack([b["b1"] for b in params["blocks"]]).astype(jnp.float32)  # (D, 1, hid)
    w2s = jnp.stack([b["w2"] for b in params["blocks"]]).astype(wdt)          # (D, hid, dim)
    b2s = jnp.stack([b["b2"] for b in params["blocks"]]).astype(jnp.float32)  # (D, 1, dim)

    w_out = jnp.zeros((dim, out_pad), wdt)
    w_out = w_out.at[:, :in_dim].set(params["w_out"].astype(wdt))
    b_out = jnp.zeros((1, out_pad), jnp.float32)
    b_out = b_out.at[:, :in_dim].set(params["b_out"].astype(jnp.float32))

    grid = (b_pad // tile_b, depth)

    batch_map = lambda i, d: (i, 0)          # shared closures: no late binding
    const_map = lambda i, d: (0, 0)
    block_map = lambda i, d: (d, 0, 0)

    in_specs = [
        pl.BlockSpec((tile_b, in_pad), batch_map),       # x (+ t column)
        pl.BlockSpec((in_pad, dim), const_map),          # W_in (+ w_t row)
        pl.BlockSpec((1, dim), const_map),               # fused input bias
        pl.BlockSpec((None, dim, hidden), block_map),    # W1[d]
        pl.BlockSpec((None, 1, hidden), block_map),      # b1[d]
        pl.BlockSpec((None, hidden, dim), block_map),    # W2[d]
        pl.BlockSpec((None, 1, dim), block_map),         # b2[d]
        pl.BlockSpec((dim, out_pad), const_map),         # W_out
        pl.BlockSpec((1, out_pad), const_map),           # b_out
    ]
    out_spec = pl.BlockSpec((tile_b, out_pad), batch_map)
    scratch = [pltpu.VMEM((tile_b, dim), jnp.float32)]   # h carried over depth

    # --- explicit VMEM budget: double-buffered blocks + scratch + headroom --
    def blk_bytes(shape, dtype):
        s = list(shape)
        if len(s) < 2:
            s = [1] * (2 - len(s)) + s
        s[-1] = _round_up(s[-1], 128)
        s[-2] = _round_up(s[-2], 8)
        return math.prod(s) * jnp.dtype(dtype).itemsize

    operands = [
        ((tile_b, in_pad), jnp.float32), ((in_pad, dim), wdt), ((1, dim), jnp.float32),
        ((dim, hidden), wdt), ((1, hidden), jnp.float32),
        ((hidden, dim), wdt), ((1, dim), jnp.float32),
        ((dim, out_pad), wdt), ((1, out_pad), jnp.float32),
        ((tile_b, out_pad), x.dtype),
    ]
    vmem_limit = 2 * sum(blk_bytes(s, dt) for s, dt in operands)
    vmem_limit += blk_bytes((tile_b, dim), jnp.float32)
    vmem_limit += 4 * 1024 * 1024                        # headroom
    vmem_limit = min(int(vmem_limit), 48 * 1024 * 1024)  # safe on v7x (64 MiB)

    out_p = pl.pallas_call(
        simplenet_kernel,
        out_shape=jax.ShapeDtypeStruct((b_pad, out_pad), x.dtype),
        grid_spec=pltpu.PrefetchScalarGridSpec(
            num_scalar_prefetch=0,
            grid=grid,
            in_specs=in_specs,
            out_specs=out_spec,
            scratch_shapes=scratch,
        ),
        compiler_params=pltpu.CompilerParams(
            dimension_semantics=("parallel", "arbitrary"),
            vmem_limit_bytes=vmem_limit,
        ),
    )(x_p, w_in, b_in, w1s, b1s, w2s, b2s, w_out, b_out)

    return out_p[:B, :in_dim]


def init_params(key, in_dim, dim, depth, expansion_ratio=4.0):
    hidden = int(expansion_ratio * dim)

    def linear(k, fan_in, fan_out):
        kw, kb = jax.random.split(k)
        bound = 1.0 / math.sqrt(fan_in)
        w = jax.random.uniform(kw, (fan_in, fan_out), jnp.float32, -bound, bound)
        b = jax.random.uniform(kb, (1, fan_out), jnp.float32, -bound, bound)
        return w, b

    keys = jax.random.split(key, 3 + 2 * depth)
    w_in, b_in = linear(keys[0], in_dim, dim)
    w_t, b_t = linear(keys[1], 1, dim)
    blocks = []
    for d in range(depth):
        w1, b1 = linear(keys[2 + 2 * d], dim, hidden)
        w2, b2 = linear(keys[3 + 2 * d], hidden, dim)
        blocks.append({"w1": w1, "b1": b1, "w2": w2, "b2": b2})
    w_out, b_out = linear(keys[2 + 2 * depth], dim, in_dim)
    return {"w_in": w_in, "b_in": b_in, "w_t": w_t, "b_t": b_t,
            "blocks": blocks, "w_out": w_out, "b_out": b_out}


def simplenet_ref_f32(x, t, params):
    # Pure f32 reference == the PyTorch module's forward.
    h = x @ params["w_in"] + params["b_in"]
    h = h + (t @ params["w_t"] + params["b_t"])
    for blk in params["blocks"]:
        hid = _gelu_exact(h @ blk["w1"] + blk["b1"])
        h = h + (hid @ blk["w2"] + blk["b2"])
    return h @ params["w_out"] + params["b_out"]


def simplenet_ref_mixed(x, t, params):
    # Mirrors the kernel's mixed precision: bf16 MXU operands, f32 accumulation,
    # f32 GELU / bias / residual, fused time embedding.
    bf = jnp.bfloat16
    dot = lambda a, b: jnp.dot(a.astype(bf), b.astype(bf),
                               preferred_element_type=jnp.float32)
    xt = jnp.concatenate([x, t], axis=1)
    w_in = jnp.concatenate([params["w_in"], params["w_t"]], axis=0)
    h = dot(xt, w_in) + (params["b_in"] + params["b_t"])
    for blk in params["blocks"]:
        hid = _gelu_exact(dot(h, blk["w1"]) + blk["b1"])
        h = h + (dot(hid, blk["w2"]) + blk["b2"])
    return dot(h, params["w_out"]) + params["b_out"]


if __name__ == "__main__":
    in_dim, dim, depth = 4, 128, 2
    B = 256

    key = jax.random.PRNGKey(0)
    kx, kt, kp = jax.random.split(key, 3)
    x = jax.random.normal(kx, (B, in_dim), jnp.float32)
    t = jax.random.uniform(kt, (B, 1), jnp.float32)
    params = init_params(kp, in_dim, dim, depth)

    out = simplenet_forward(x, t, params, tile_b=128)
    out = jax.block_until_ready(out)
    assert out.shape == (B, in_dim)

    ref_mixed = simplenet_ref_mixed(x, t, params)   # same mixed-precision path
    ref_f32 = simplenet_ref_f32(x, t, params)       # PyTorch-exact f32 path
    err_mixed = float(jnp.max(jnp.abs(out - ref_mixed)))
    err_f32 = float(jnp.max(jnp.abs(out - ref_f32)))
    assert jnp.allclose(out, ref_mixed, atol=1e-4, rtol=1e-4), err_mixed
    assert jnp.allclose(out, ref_f32, atol=5e-2, rtol=5e-2), err_f32
    print("KERNEL_OK")
</pallas_src>

<mosaic_0001>
module attributes {stable_mosaic.version = 11 : i64} {
  func.func @simplenet_kernel(%arg0: i32, %arg1: i32, %arg2: memref<128x128xf32, #tpu.memory_space<vmem>>, %arg3: memref<128x128xbf16, #tpu.memory_space<vmem>>, %arg4: memref<1x128xf32, #tpu.memory_space<vmem>>, %arg5: memref<1x128x512xbf16, #tpu.memory_space<vmem>>, %arg6: memref<1x1x512xf32, #tpu.memory_space<vmem>>, %arg7: memref<1x512x128xbf16, #tpu.memory_space<vmem>>, %arg8: memref<1x1x128xf32, #tpu.memory_space<vmem>>, %arg9: memref<128x128xbf16, #tpu.memory_space<vmem>>, %arg10: memref<1x128xf32, #tpu.memory_space<vmem>>, %arg11: memref<128x128xf32, #tpu.memory_space<vmem>>, %arg12: memref<128x128xf32, #tpu.memory_space<vmem>>) attributes {dimension_semantics = [#tpu.dimension_semantics<parallel>, #tpu.dimension_semantics<arbitrary>], iteration_bounds = array<i64: 2, 2>, scalar_prefetch = 0 : i64, scratch_operands = 1 : i64, tpu.core_type = #tpu.core_type<tc>, window_params = [{transform_indices = @transform_0, window_bounds = array<i64: 128, 128>}, {pipeline_mode = #tpu.pipeline_mode<synchronous>, transform_indices = @transform_1, window_bounds = array<i64: 128, 128>}, {pipeline_mode = #tpu.pipeline_mode<synchronous>, transform_indices = @transform_2, window_bounds = array<i64: 1, 128>}, {transform_indices = @transform_3, window_bounds = array<i64: 1, 128, 512>}, {transform_indices = @transform_4, window_bounds = array<i64: 1, 1, 512>}, {transform_indices = @transform_5, window_bounds = array<i64: 1, 512, 128>}, {transform_indices = @transform_6, window_bounds = array<i64: 1, 1, 128>}, {pipeline_mode = #tpu.pipeline_mode<synchronous>, transform_indices = @transform_7, window_bounds = array<i64: 128, 128>}, {pipeline_mode = #tpu.pipeline_mode<synchronous>, transform_indices = @transform_8, window_bounds = array<i64: 1, 128>}, {transform_indices = @transform_9, window_bounds = array<i64: 128, 128>}]} {
    %c0_i32 = arith.constant 0 : i32
    %0 = arith.cmpi eq, %arg1, %c0_i32 : i32
    %1 = arith.extui %0 : i1 to i32
    %c0_i32_0 = arith.constant 0 : i32
    %2 = arith.cmpi ne, %1, %c0_i32_0 : i32
    scf.if %2 {
      %c0_21 = arith.constant 0 : index
      %c0_22 = arith.constant 0 : index
      %33 = vector.load %arg2[%c0_21, %c0_22] : memref<128x128xf32, #tpu.memory_space<vmem>>, vector<128x128xf32>
      %34 = arith.truncf %33 : vector<128x128xf32> to vector<128x128xbf16>
      %c0_23 = arith.constant 0 : index
      %c0_24 = arith.constant 0 : index
      %35 = vector.load %arg3[%c0_23, %c0_24] : memref<128x128xbf16, #tpu.memory_space<vmem>>, vector<128x128xbf16>
      %cst_25 = arith.constant dense<0.000000e+00> : vector<128x128xf32>
      %36 = tpu.matmul %34, %35, %cst_25 {dimension_numbers = #tpu.dot_dimension_numbers<[1], [0], [0], [1], [0, 0, 1, 1], [], []>} : vector<128x128xbf16>, vector<128x128xbf16>, vector<128x128xf32> -> vector<128x128xf32>
      %c0_26 = arith.constant 0 : index
      %c0_27 = arith.constant 0 : index
      %37 = vector.load %arg4[%c0_26, %c0_27] : memref<1x128xf32, #tpu.memory_space<vmem>>, vector<1x128xf32>
      %38 = vector.broadcast %37 : vector<1x128xf32> to vector<128x128xf32>
      %39 = arith.addf %36, %38 : vector<128x128xf32>
      %c0_28 = arith.constant 0 : index
      %c0_29 = arith.constant 0 : index
      %40 = vector.load %arg12[%c0_28, %c0_29] : memref<128x128xf32, #tpu.memory_space<vmem>>, vector<128x128xf32>
      tpu.vector_store %arg12[%c0_28, %c0_29], %39 {strides = array<i32>} : memref<128x128xf32, #tpu.memory_space<vmem>>, vector<128x128xf32>,
    } else {
    }
    %c0 = arith.constant 0 : index
    %c0_1 = arith.constant 0 : index
    %3 = vector.load %arg12[%c0, %c0_1] : memref<128x128xf32, #tpu.memory_space<vmem>>, vector<128x128xf32>
    %4 = arith.truncf %3 : vector<128x128xf32> to vector<128x128xbf16>
    %c0_2 = arith.constant 0 : index
    %c0_3 = arith.constant 0 : index
    %c0_4 = arith.constant 0 : index
    %5 = vector.load %arg5[%c0_2, %c0_3, %c0_4] : memref<1x128x512xbf16, #tpu.memory_space<vmem>>, vector<1x128x512xbf16>
    %6 = vector.shape_cast %5 : vector<1x128x512xbf16> to vector<128x512xbf16>
    %cst = arith.constant dense<0.000000e+00> : vector<128x512xf32>
    %7 = tpu.matmul %4, %6, %cst {dimension_numbers = #tpu.dot_dimension_numbers<[1], [0], [0], [1], [0, 0, 1, 1], [], []>} : vector<128x128xbf16>, vector<128x512xbf16>, vector<128x512xf32> -> vector<128x512xf32>
    %c0_5 = arith.constant 0 : index
    %c0_6 = arith.constant 0 : index
    %c0_7 = arith.constant 0 : index
    %8 = vector.load %arg6[%c0_5, %c0_6, %c0_7] : memref<1x1x512xf32, #tpu.memory_space<vmem>>, vector<1x1x512xf32>
    %9 = vector.shape_cast %8 : vector<1x1x512xf32> to vector<1x512xf32>
    %10 = vector.broadcast %9 : vector<1x512xf32> to vector<128x512xf32>
    %11 = arith.addf %7, %10 : vector<128x512xf32>
    %cst_8 = arith.constant 5.000000e-01 : f32
    %12 = vector.broadcast %cst_8 : f32 to vector<128x512xf32>
    %13 = arith.mulf %12, %11 : vector<128x512xf32>
    %cst_9 = arith.constant 0.707106769 : f32
    %14 = vector.broadcast %cst_9 : f32 to vector<128x512xf32>
    %15 = arith.mulf %11, %14 : vector<128x512xf32>
    %16 = math.erf %15 : vector<128x512xf32>
    %cst_10 = arith.constant 1.000000e+00 : f32
    %17 = vector.broadcast %cst_10 : f32 to vector<128x512xf32>
    %18 = arith.addf %17, %16 : vector<128x512xf32>
    %19 = arith.mulf %13, %18 : vector<128x512xf32>
    %20 = arith.truncf %19 : vector<128x512xf32> to vector<128x512xbf16>
    %c0_11 = arith.constant 0 : index
    %c0_12 = arith.constant 0 : index
    %c0_13 = arith.constant 0 : index
    %21 = vector.load %arg7[%c0_11, %c0_12, %c0_13] : memref<1x512x128xbf16, #tpu.memory_space<vmem>>, vector<1x512x128xbf16>
    %22 = vector.shape_cast %21 : vector<1x512x128xbf16> to vector<512x128xbf16>
    %cst_14 = arith.constant dense<0.000000e+00> : vector<128x128xf32>
    %23 = tpu.matmul %20, %22, %cst_14 {dimension_numbers = #tpu.dot_dimension_numbers<[1], [0], [0], [1], [0, 0, 1, 1], [], []>} : vector<128x512xbf16>, vector<512x128xbf16>, vector<128x128xf32> -> vector<128x128xf32>
    %c0_15 = arith.constant 0 : index
    %c0_16 = arith.constant 0 : index
    %c0_17 = arith.constant 0 : index
    %24 = vector.load %arg8[%c0_15, %c0_16, %c0_17] : memref<1x1x128xf32, #tpu.memory_space<vmem>>, vector<1x1x128xf32>
    %25 = vector.shape_cast %24 : vector<1x1x128xf32> to vector<1x128xf32>
    %26 = vector.broadcast %25 : vector<1x128xf32> to vector<128x128xf32>
    %27 = arith.addf %23, %26 : vector<128x128xf32>
    %28 = arith.addf %3, %27 : vector<128x128xf32>
    %c0_18 = arith.constant 0 : index
    %c0_19 = arith.constant 0 : index
    %29 = vector.load %arg12[%c0_18, %c0_19] : memref<128x128xf32, #tpu.memory_space<vmem>>, vector<128x128xf32>
    tpu.vector_store %arg12[%c0_18, %c0_19], %28 {strides = array<i32>} : memref<128x128xf32, #tpu.memory_space<vmem>>, vector<128x128xf32>,
    %c1_i32 = arith.constant 1 : i32
    %30 = arith.cmpi eq, %arg1, %c1_i32 : i32
    %31 = arith.extui %30 : i1 to i32
    %c0_i32_20 = arith.constant 0 : i32
    %32 = arith.cmpi ne, %31, %c0_i32_20 : i32
    scf.if %32 {
      %33 = arith.truncf %28 : vector<128x128xf32> to vector<128x128xbf16>
      %c0_21 = arith.constant 0 : index
      %c0_22 = arith.constant 0 : index
      %34 = vector.load %arg9[%c0_21, %c0_22] : memref<128x128xbf16, #tpu.memory_space<vmem>>, vector<128x128xbf16>
      %cst_23 = arith.constant dense<0.000000e+00> : vector<128x128xf32>
      %35 = tpu.matmul %33, %34, %cst_23 {dimension_numbers = #tpu.dot_dimension_numbers<[1], [0], [0], [1], [0, 0, 1, 1], [], []>} : vector<128x128xbf16>, vector<128x128xbf16>, vector<128x128xf32> -> vector<128x128xf32>
      %c0_24 = arith.constant 0 : index
      %c0_25 = arith.constant 0 : index
      %36 = vector.load %arg10[%c0_24, %c0_25] : memref<1x128xf32, #tpu.memory_space<vmem>>, vector<1x128xf32>
      %37 = vector.broadcast %36 : vector<1x128xf32> to vector<128x128xf32>
      %38 = arith.addf %35, %37 : vector<128x128xf32>
      %c0_26 = arith.constant 0 : index
      %c0_27 = arith.constant 0 : index
      %39 = vector.load %arg11[%c0_26, %c0_27] : memref<128x128xf32, #tpu.memory_space<vmem>>, vector<128x128xf32>
      tpu.vector_store %arg11[%c0_26, %c0_27], %38 {strides = array<i32>} : memref<128x128xf32, #tpu.memory_space<vmem>>, vector<128x128xf32>,
    } else {
    }
    return
  }
  func.func @transform_0(%arg0: i32, %arg1: i32) -> (i32, i32) {
    %c0_i32 = arith.constant 0 : i32
    %c0_i32_0 = arith.constant 0 : i32
    return %arg0, %c0_i32 : i32, i32
  }
  func.func @transform_1(%arg0: i32, %arg1: i32) -> (i32, i32) {
    %c0_i32 = arith.constant 0 : i32
    %c0_i32_0 = arith.constant 0 : i32
    %c0_i32_1 = arith.constant 0 : i32
    return %c0_i32, %c0_i32_0 : i32, i32
  }
  func.func @transform_2(%arg0: i32, %arg1: i32) -> (i32, i32) {
    %c0_i32 = arith.constant 0 : i32
    %c0_i32_0 = arith.constant 0 : i32
    %c0_i32_1 = arith.constant 0 : i32
    return %c0_i32, %c0_i32_0 : i32, i32
  }
  func.func @transform_3(%arg0: i32, %arg1: i32) -> (i32, i32, i32) {
    %c0_i32 = arith.constant 0 : i32
    %c0_i32_0 = arith.constant 0 : i32
    %c0_i32_1 = arith.constant 0 : i32
    return %arg1, %c0_i32, %c0_i32_0 : i32, i32, i32
  }
  func.func @transform_4(%arg0: i32, %arg1: i32) -> (i32, i32, i32) {
    %c0_i32 = arith.constant 0 : i32
    %c0_i32_0 = arith.constant 0 : i32
    %c0_i32_1 = arith.constant 0 : i32
    return %arg1, %c0_i32, %c0_i32_0 : i32, i32, i32
  }
  func.func @transform_5(%arg0: i32, %arg1: i32) -> (i32, i32, i32) {
    %c0_i32 = arith.constant 0 : i32
    %c0_i32_0 = arith.constant 0 : i32
    %c0_i32_1 = arith.constant 0 : i32
    return %arg1, %c0_i32, %c0_i32_0 : i32, i32, i32
  }
  func.func @transform_6(%arg0: i32, %arg1: i32) -> (i32, i32, i32) {
    %c0_i32 = arith.constant 0 : i32
    %c0_i32_0 = arith.constant 0 : i32
    %c0_i32_1 = arith.constant 0 : i32
    return %arg1, %c0_i32, %c0_i32_0 : i32, i32, i32
  }
  func.func @transform_7(%arg0: i32, %arg1: i32) -> (i32, i32) {
    %c0_i32 = arith.constant 0 : i32
    %c0_i32_0 = arith.constant 0 : i32
    %c0_i32_1 = arith.constant 0 : i32
    return %c0_i32, %c0_i32_0 : i32, i32
  }
  func.func @transform_8(%arg0: i32, %arg1: i32) -> (i32, i32) {
    %c0_i32 = arith.constant 0 : i32
    %c0_i32_0 = arith.constant 0 : i32
    %c0_i32_1 = arith.constant 0 : i32
    return %c0_i32, %c0_i32_0 : i32, i32
  }
  func.func @transform_9(%arg0: i32, %arg1: i32) -> (i32, i32) {
    %c0_i32 = arith.constant 0 : i32
    %c0_i32_0 = arith.constant 0 : i32
    return %arg0, %c0_i32 : i32, i32
  }
}

</mosaic_0001>

<bundles_post_ra>
// kernel: tpu_custom_call.1
= control target key start
LH: loop header
LB: loop body
LE: loop exit
PB: predicated region body
PF: predicated region fallthrough
CT: control target
= control target key end

     0   :  { %s9746_s0 = inlined_call_operand.hbm [shape: f32[256,128], index: 0, kind: input, shape index: {}]   ;;  %s9747_s1 = inlined_call_operand.hbm [shape: bf16[128,128], index: 1, kind: input, shape index: {}]   ;;  %s9748_s2 = inlined_call_operand.vmem [shape: f32[1,128], index: 2, kind: input, shape index: {}]   ;;  %s9749_s3 = inlined_call_operand.hbm [shape: bf16[2,128,512], index: 3, kind: input, shape index: {}]   ;;  %s9750_s4 = inlined_call_operand.hbm [shape: f32[2,1,512], index: 4, kind: input, shape index: {}]   ;;  %s9751_s5 = inlined_call_operand.hbm [shape: bf16[2,512,128], index: 5, kind: input, shape index: {}]   ;;  %s9752_s6 = inlined_call_operand.vmem [shape: f32[2,1,128], index: 6, kind: input, shape index: {}]   ;;  %s9753_s7 = inlined_call_operand.hbm [shape: bf16[128,128], index: 7, kind: input, shape index: {}]   ;;  %s9754_s8 = inlined_call_operand.vmem [shape: f32[1,128], index: 8, kind: input, shape index: {}]   ;;  %s9755_s9 = inlined_call_operand.hbm [shape: f32[256,128], index: 9, kind: output, shape index: {}]  }
   0x1   :  { %9829 = sst [smem:[#allocation106_spill]] %s9746_s0 }
   0x2   :  { %9830 = sst [smem:[#allocation107_spill]] %s9747_s1 }
   0x3   :  { %9831 = sst [smem:[#allocation108_spill]] %s9748_s2 }
   0x4   :  { %9832 = sst [smem:[#allocation109_spill]] %s9749_s3 }
   0x5   :  { %9833 = sst [smem:[#allocation110_spill]] %s9750_s4 }
   0x6   :  { %9834 = sst [smem:[#allocation111_spill]] %s9754_s8 }
   0x7   :  { %9835 = sst [smem:[#allocation112_spill]] %s9755_s9 }
   0x8   :  { %14 = vsyncpa [#allocation4], 0 }
   0x9   :  { %16 = vsyncpa [#allocation4 + $0x1], 0 }
   0xa   :  { %17 = vsyncpa [#allocation7], 0 }
   0xb   :  { %18 = vsyncpa [#allocation5], 0 }
   0xc   :  { %20 = vsyncpa [#allocation5 + $0x1], 0  ;;  %s5997_s30 = smov 0   ;;  %s5999_s10 = smov 0  }
   0xd   :  { %s6001_s11 = smov 0   ;;  %s6003_s12 = smov 0  }
   0xe   :  { %s6005_s13 = smov 0   ;;  %s6007_s14 = smov 0  }
   0xf   :  { %s6009_s15 = smov 0   ;;  %s6011_s16 = smov 0  }
  0x10   :  { %s6013_s17 = smov 0   ;;  %s6015_s18 = smov 0  }
  0x11   :  { %s6017_s19 = smov 0  }
  0x12 LB: > { %9836 = sst [smem:[#allocation18_spill]] %s5903_s11  ;;  %s4781_s20 = sadd.s32 4294967294, %s5935_s19   ;;  %s5935_s19 = sphi %s6017_s19, %s26_s19   ;;  %s5931_s18 = sphi %s6015_s18, %s10223_s18   ;;  %s5927_s17 = sphi %s6013_s17, %s10230_s17   ;;  %s5923_s16 = sphi %s6011_s16, %s10221_s16   ;;  %s5919_s15 = sphi %s6009_s15, %s10229_s15   ;;  %s5915_s14 = sphi %s6007_s14, %s10220_s14   ;;  %s5911_s13 = sphi %s6005_s13, %s10228_s13   ;;  %s5907_s12 = sphi %s6003_s12, %s10227_s12   ;;  %s5903_s11 = sphi %s6001_s11, %s10226_s11   ;;  %s5899_s10 = sphi %s5999_s10, %s10225_s10   ;;  %s5895_s30 = sphi %s5997_s30, %s10224_s30  }
  0x13   : > { %9837 = sst [smem:[#allocation19_spill]] %s5907_s12  ;;  %s35_s21 = sadd.s32 1, %s5927_s17 }
  0x14   : > { %9838 = sst [smem:[#allocation20_spill]] %s5915_s14  ;;  %p36_p0 = scmp.ge.s32.totalorder %s35_s21, 2 }
  0x15   : > { %9839 = sst [smem:[#allocation21_spill]] %s5923_s16  ;;  %s38_s22 = sadd.s32 1, %s5931_s18 }
  0x16   : > { %9840 = sst [smem:[#allocation22_spill]] %s5931_s18  ;;  %s45_s23 = sadd.s32 1, %s5915_s14 }
  0x17   : > { %9841 = sst [smem:[#allocation23_spill]] %s5935_s19  ;;  %p52_p1 = scmp.ne.s32.totalorder %s5915_s14, %s5911_s13 }
  0x18   : > { %s10232_s21 = smov (%p36_p0, %s35_s21), 0  ;;  %s10234_s22 = smov (!%p36_p0, %s38_s22), %s5931_s18 }
  0x19   : > { %9842 = sst [smem:[#allocation24_spill]] %s10232_s21  ;;  %p53_p2 = scmp.eq.s32.totalorder %s5935_s19, 0 }
  0x1a   : > { %p58_p3 = scmp.ne.s32.totalorder %s5911_s13, %s5907_s12  ;;  %p40_p4 = scmp.ge.s32.totalorder %s10234_s22, 2 }
  0x1b   : > { %s110_s24 = ssub.s32 %s5927_s17, %s10232_s21  ;;  %p6071_p5 = por %p53_p2, %p52_p1 }
  0x1c   : > { %p6075_p6 = scmp.eq.s32.totalorder %s110_s24, 0  ;;  %s10236_s22 = smov (%p40_p4, %s10234_s22), 0 }
  0x1d   : > { %9845 = sst [smem:[#allocation25_spill]] %s10236_s22  ;;  %p276_p7 = scmp.eq.s32.totalorder %s4781_s20, 3 }
  0x1e   : > { %s42_s27 = ssub.s32 %s5931_s18, %s10236_s22  ;;  %p5372_p8 = scmp.lt.s32.totalorder %s5935_s19, 4 }
  0x1f   : > { %p43_p9 = scmp.eq.s32.totalorder %s42_s27, 0  ;;  %p6087_p10 = por %p276_p7, %p58_p3 }
  0x20   : > { %s330_s29 = sand.u32 1, %s5935_s19   ;;  %s332_s24 = sand.u32 1, %s5915_s14  }
  0x21   : > { %s9846_s28 = scalar_select %p6087_p10, 1, 0 }
  0x22   : > { %s6094_s21 = scalar_select %p43_p9, %s5915_s14, %s45_s23  }
  0x23   : > { %9847 = sst [smem:[#allocation26_spill]] %s9846_s28  ;;  %s4786_s9 = sshll.u32 %s332_s24, 7 }
  0x24   : > { %9848 = sst [smem:[#allocation27_spill]] %s6094_s21  ;;  %s5196_s20 = sshll.u32 %s5931_s18, 7 }
  0x25   : > { %s9849_s0 = sld [smem:[#allocation106_spill]]  ;;  %s334_s8 = scalar_lea.vmem [#allocation3], %s4786_s9 }
  0x26   : > { %s342_s28 = sshll.u32 %s334_s8, 4  ;;  %p5354_p11 = pnand %p5372_p8, %p6071_p5  ;;  %s343_s28 = int_to_ptr.vmem [resolvable:$true] %s342_s28 }
  0x27   : > { %s6104_s23 = scalar_lea.sflag [#allocation4], %s330_s29  ;;  %s5937_s24 = smov 128  }
  0x28   : > { %s5938_s18 = smov 8   ;;  %s9761_s16 = sshll.u32 %s5927_s17, 8 }
  0x29   : > { %s113_s22 = sadd.s32 1, %s5903_s11  ;;  %p120_p12 = scmp.ne.s32.totalorder %s5903_s11, %s5899_s10 }
  0x2a   : > { %s6114_s8 = scalar_select %p6075_p6, %s5903_s11, %s113_s22  }
  0x2b   : > { %s339_s27 = scalar_lea.hbm %s9849_s0, %s5196_s20  ;;  %p122_p13 = por %p120_p12, %p53_p2 }
  0x2c   : > { %s340_s2 = sshll.u32 %s339_s27, 4  ;;  %9850 = sst [smem:[#allocation28_spill]] %s6114_s8  ;;  %s341_s2 = int_to_ptr.hbm [resolvable:$true] %s340_s2 }
  0x2d   : > { %5356 = dma.hbm_to_vmem [thread:$0]  (!%p5354_p11), %s341_s2, 2048, %s343_s28, %s6104_s23, %s5937_s24, %s5937_s24, %s5938_s18  }
  0x2e   : > { %s354_s9 = sand.u32 1, %s5903_s11   ;;  %s9851_s3 = sld [smem:[#allocation109_spill]] }
  0x2f   : > { %s6119_s25 = sshll.u32 %s354_s9, 8  ;;  %p6129_p0 = pnand %p5372_p8, %p122_p13 }
  0x30   : > { %s356_s26 = scalar_lea.vmem [#allocation8], %s6119_s25  ;;  %s5939_s24 = smov 256  }
  0x31   : > { %s364_s28 = sshll.u32 %s356_s26, 4  ;;  %s5940_s22 = smov 16   ;;  %s365_s28 = int_to_ptr.vmem [resolvable:$true] %s364_s28 }
  0x32   : > { %s6137_s29 = sadd.s32 4294967295, %s5935_s19   ;;  %p126_p4 = scmp.ne.s32.totalorder %s5899_s10, %s5895_s30 }
  0x33   : > { %p59_p2 = scmp.eq.s32.totalorder %s6137_s29, 0  ;;  %p270_p5 = scmp.eq.s32.totalorder %s6137_s29, 3 }
  0x34   : > { %s361_s2 = scalar_lea.hbm %s9851_s3, %s9761_s16  ;;  %p4782_p6 = scmp.ge.s32.totalorder %s5935_s19, 1 }
  0x35   : > { %s362_s18 = sshll.u32 %s361_s2, 4  ;;  %p6149_p7 = por %p59_p2, %p58_p3  ;;  %s363_s18 = int_to_ptr.hbm [resolvable:$true] %s362_s18 }
  0x36   : > { %5359 = dma.hbm_to_vmem [thread:$0]  (!%p6129_p0), %s363_s18, 4096, %s365_s28, %s6104_s23, %s5939_s24, %s5939_s24, %s5940_s22  }
  0x37   : > { %p6155_p8 = por %p126_p4, %p59_p2  ;;  %p6162_p9 = por %p270_p5, %p52_p1 }
  0x38   : > { %p283_p11 = scmp.lt.s32.totalorder %s5935_s19, 5  ;;  %s9857_s1 = sld [smem:[#allocation107_spill]] }
  0x39   : > { %s9855_s18 = scalar_select %p6162_p9, 1, 0 }
  0x3a   : > { %p6170_p12 = pnand %p4782_p6, %p283_p11  ;;  %s5941_s22 = smov [#allocation6]  }
  0x3b   : > { %9856 = sst [smem:[#allocation29_spill]] %s9855_s18  ;;  %s296_s16 = sshll.u32 %s5941_s22, 4  ;;  %s297_s16 = int_to_ptr.vmem [resolvable:$true] %s296_s16 }
  0x3c   : > { %p5346_p3 = pneg %p6170_p12  ;;  %s4792_s30 = sshll.u32 %s354_s9, 2 }
  0x3d   : > { %s4793_s26 = sshll.u32 %s5927_s17, 2  ;;  %s9860_s4 = sld [smem:[#allocation110_spill]] }
  0x3e   : > { %s294_s28 = sshll.u32 %s9857_s1, 4  ;;  %p6178_p1 = pnand %p5346_p3, %p59_p2  ;;  %s295_s28 = int_to_ptr.hbm [resolvable:$true] %s294_s28 }
  0x3f   : > { %s5942_s14 = smov 64   ;;  %s5943_s8 = smov 4  }
  0x40   : > { %5349 = dma.hbm_to_vmem [thread:$0]  (!%p6178_p1), %s295_s28, 1024, %s297_s16, [#allocation7], %s5942_s14, %s5942_s14, %s5943_s8  }
  0x41   : > { %s378_s11 = scalar_lea.vmem [#allocation9], %s4792_s30  ;;  %s311_s1 = sshll.u32 %s9753_s7, 4  ;;  %s312_s1 = int_to_ptr.hbm [resolvable:$true] %s311_s1 }
  0x42   : > { %s386_s12 = sshll.u32 %s378_s11, 4  ;;  %s5944_s3 = smov [#allocation11]   ;;  %s387_s12 = int_to_ptr.vmem [resolvable:$true] %s386_s12 }
  0x43   : > { %s382_s21 = scalar_lea.hbm %s9860_s4, %s4793_s26  ;;  %s313_s26 = sshll.u32 %s5944_s3, 4  ;;  %s314_s26 = int_to_ptr.vmem [resolvable:$true] %s313_s26 }
  0x44   : > { %s384_s22 = sshll.u32 %s382_s21, 4  ;;  %s9861_s16 = sshll.u32 %s5927_s17, 8  ;;  %s385_s22 = int_to_ptr.hbm [resolvable:$true] %s384_s22 }
  0x45   : > { %5362 = dma.hbm_to_vmem [thread:$0]  (!%p6129_p0), %s385_s22, 64, %s387_s12, %s6104_s23  }
  0x46   : > { %5352 = dma.hbm_to_vmem [thread:$0]  (!%p6178_p1), %s312_s1, 1024, %s314_s26, [#allocation7], %s5942_s14, %s5942_s14, %s5943_s8  }
  0x47   : > { %s402_s11 = scalar_lea.hbm %s9751_s5, %s9861_s16  ;;  %s397_s30 = scalar_lea.vmem [#allocation10], %s6119_s25 }
  0x48   : > { %s405_s4 = sshll.u32 %s397_s30, 4  ;;  %s403_s18 = sshll.u32 %s402_s11, 4  ;;  %s406_s4 = int_to_ptr.vmem [resolvable:$true] %s405_s4  ;;  %s404_s18 = int_to_ptr.hbm [resolvable:$true] %s403_s18 }
  0x49   : > { %5365 = dma.hbm_to_vmem [thread:$0]  (!%p6129_p0), %s404_s18, 4096, %s406_s4, %s6104_s23, %s5942_s14, %s5942_s14, %s5943_s8  }
  0x4a   : > { %423 = sbr.rel (%p6170_p12) target bundleno = 1535 (0x5ff), region = 56 }
  0x4f   : > { %s425_s0 = sand.u32 1, %s6137_s29   ;;  %s427_s12 = sand.u32 1, %s5911_s13  }
  0x50   : > { %s4798_s19 = sshll.u32 %s427_s12, 7  ;;  %s426_s22 = scalar_lea.sflag [#allocation4], %s425_s0 }
  0x51   : > { %s6211_s9 = scalar_lea.vmem [#allocation3], %s4798_s19 }
  0x52   : > { %5874 = dma.done.wait (%p6149_p7), %s426_s22, 2048  }
  0x53   : > { %5876 = vsyncadd (%p6149_p7), %s426_s22, 4294965248 }
  0x54   : > { %5878 = dma.done.wait (%p59_p2), [#allocation7], 1024  }
  0x55   : > { %5880 = vsyncadd (%p59_p2), [#allocation7], 4294966272  ;;  %s442_s4 = sand.u32 1, %s5899_s10  }
  0x56   : > { %s4800_s14 = sshll.u32 %s442_s4, 8 }
  0x57   : > { %s6222_s23 = scalar_lea.vmem [#allocation8], %s4800_s14 }
  0x58   : > { %5882 = dma.done.wait (%p6155_p8), %s426_s22, 8256  }
  0x59   : > { %5884 = vsyncadd (%p6155_p8), %s426_s22, 4294959040  ;;  %s6228_s8 = sshll.u32 %s442_s4, 2  ;;  %s6231_s27 = scalar_lea.vmem [#allocation10], %s4800_s14 }
  0x5a   : > { %s454_s25 = scalar_lea.vmem [#allocation9], %s6228_s8 }
  0x5b   : > { %5886 = dma.done.wait (%p59_p2), [#allocation7], 1024  }
  0x5c   : > { %5888 = vsyncadd (%p59_p2), [#allocation7], 4294966272  ;;  %p524_p13 = scmp.lt.s32.totalorder %s5919_s15, 1  ;;  %s6245_s1 = scalar_lea.vmem [#allocation12], %s4798_s19 }
  0x5d   : > { %p4805_p0 = scmp.ne.s32.totalorder %s5919_s15, 0 }
  0x5e   : > { %s6239_s20 = scalar_select %p524_p13, %s5919_s15, 1 }
  0x5f   : > { %531 = sbr.rel (%p4805_p0) target bundleno = 293 (0x125), region = 84  ;;  %s9862_s26 = sld [smem:[#allocation108_spill]] (!%p4805_p0) }
  0x60   : > { %s526_s24 = scalar_lea.vmem %s9752_s6, %s6239_s20 }
  0x64   : > { %v5206_v0 = vld [vmem:[#allocation6 + $0x38] sm:$0xff]  ;;  %v5205_v1 = vld [vmem:[#allocation6 + $0x30] sm:$0xff]  ;;  %v5204_v2 = vld [vmem:[#allocation6 + $0x28] sm:$0xff] }
  0x65   : > { %624 = vmatpush.bf16.msra.mxu0 %v5206_v0  ;;  %5280 = vmatpush.bf16.msra.mxu1 %v5206_v0  ;;  %v5203_v3 = vld [vmem:[#allocation6 + $0x20] sm:$0xff]  ;;  %v5202_v4 = vld [vmem:[#allocation6 + $0x18] sm:$0xff]  ;;  %v5201_v5 = vld [vmem:[#allocation6 + $0x10] sm:$0xff] }
  0x66   : > { %5281 = vmatpush.bf16.msra.mxu2 %v5206_v0  ;;  %5282 = vmatpush.bf16.msra.mxu3 %v5206_v0  ;;  %v5200_v6 = vld [vmem:[#allocation6 + $0x8] sm:$0xff]  ;;  %v5199_v7 = vld [vmem:[#allocation6] sm:$0xff]  ;;  %v534_v20 = vld [vmem:[%s6211_s9 + $0x10] sm:$0xff] }
  0x67   : > { %v532_v8 = vld [vmem:[%s6211_s9] sm:$0xff]  ;;  %v533_v9 = vld [vmem:[%s6211_s9 + $0x8] sm:$0xff]  ;;  %v535_v21 = vld [vmem:[%s6211_s9 + $0x18] sm:$0xff] }
  0x68   : > { %v536_v10 = vld [vmem:[%s6211_s9 + $0x20] sm:$0xff]  ;;  %v537_v11 = vld [vmem:[%s6211_s9 + $0x28] sm:$0xff]  ;;  %v548_v16 = vpack.c.bf16 %v533_v9, %v532_v8  ;;  %v538_v22 = vld [vmem:[%s6211_s9 + $0x30] sm:$0xff]  ;;  %v549_v28 = vpack.c.bf16 %v535_v21, %v534_v20 }
  0x69   : > { %625 = vmatpush.bf16.msra.mxu0 %v5205_v1  ;;  %5283 = vmatpush.bf16.msra.mxu1 %v5205_v1  ;;  %v540_v12 = vld [vmem:[%s6211_s9 + $0x40] sm:$0xff]  ;;  %v541_v13 = vld [vmem:[%s6211_s9 + $0x48] sm:$0xff]  ;;  %v550_v17 = vpack.c.bf16 %v537_v11, %v536_v10  ;;  %v539_v23 = vld [vmem:[%s6211_s9 + $0x38] sm:$0xff] }
  0x6a   : > { %5284 = vmatpush.bf16.msra.mxu2 %v5205_v1  ;;  %5285 = vmatpush.bf16.msra.mxu3 %v5205_v1  ;;  %v544_v14 = vld [vmem:[%s6211_s9 + $0x60] sm:$0xff]  ;;  %v545_v15 = vld [vmem:[%s6211_s9 + $0x68] sm:$0xff]  ;;  %v552_v18 = vpack.c.bf16 %v541_v13, %v540_v12  ;;  %v542_v24 = vld [vmem:[%s6211_s9 + $0x50] sm:$0xff]  ;;  %v551_v29 = vpack.c.bf16 %v539_v23, %v538_v22 }
  0x6b   : > { %v554_v19 = vpack.c.bf16 %v545_v15, %v544_v14  ;;  %v543_v25 = vld [vmem:[%s6211_s9 + $0x58] sm:$0xff]  ;;  %v546_v26 = vld [vmem:[%s6211_s9 + $0x70] sm:$0xff]  ;;  %v5474_v32 = vld [vmem:[%s9862_s26] ss:$0 sm:$0xff] }
  0x6c   : > { %v547_v27 = vld [vmem:[%s6211_s9 + $0x78] sm:$0xff]  ;;  %v553_v30 = vpack.c.bf16 %v543_v25, %v542_v24 }
  0x6d   : > { %626 = vmatpush.bf16.msra.mxu0 %v5204_v2  ;;  %5286 = vmatpush.bf16.msra.mxu1 %v5204_v2  ;;  %v555_v31 = vpack.c.bf16 %v547_v27, %v546_v26 }
  0x6e   : > { %5287 = vmatpush.bf16.msra.mxu2 %v5204_v2  ;;  %5288 = vmatpush.bf16.msra.mxu3 %v5204_v2 }
  0x71   : > { %627 = vmatpush.bf16.msra.mxu0 %v5203_v3  ;;  %5289 = vmatpush.bf16.msra.mxu1 %v5203_v3 }
  0x72   : > { %5290 = vmatpush.bf16.msra.mxu2 %v5203_v3  ;;  %5291 = vmatpush.bf16.msra.mxu3 %v5203_v3 }
  0x75   : > { %628 = vmatpush.bf16.msra.mxu0 %v5202_v4  ;;  %5292 = vmatpush.bf16.msra.mxu1 %v5202_v4 }
  0x76   : > { %5293 = vmatpush.bf16.msra.mxu2 %v5202_v4  ;;  %5294 = vmatpush.bf16.msra.mxu3 %v5202_v4 }
  0x79   : > { %629 = vmatpush.bf16.msra.mxu0 %v5201_v5  ;;  %5295 = vmatpush.bf16.msra.mxu1 %v5201_v5 }
  0x7a   : > { %5296 = vmatpush.bf16.msra.mxu2 %v5201_v5  ;;  %5297 = vmatpush.bf16.msra.mxu3 %v5201_v5 }
  0x7d   : > { %630 = vmatpush.bf16.msra.mxu0 %v5200_v6  ;;  %5298 = vmatpush.bf16.msra.mxu1 %v5200_v6 }
  0x7e   : > { %5299 = vmatpush.bf16.msra.mxu2 %v5200_v6  ;;  %5300 = vmatpush.bf16.msra.mxu3 %v5200_v6 }
  0x81   : > { %631 = vmatpush.bf16.msra.mxu0 %v5199_v7  ;;  %5301 = vmatpush.bf16.msra.mxu1 %v5199_v7 }
  0x82   : > { %5302 = vmatpush.bf16.msra.mxu2 %v5199_v7  ;;  %5303 = vmatpush.bf16.msra.mxu3 %v5199_v7 }
  0x84   : > { %632 = vmatmul.bf16.vlgmr.msra.gmra.mxu0 %v548_v16  ;;  %642 = vmatmul.bf16.vlgmr.msra.gmra.mxu1 %v550_v17 }
  0x85   : > { %652 = vmatmul.bf16.vlgmr.msra.gmra.mxu2 %v552_v18  ;;  %662 = vmatmul.bf16.vlgmr.msra.gmra.mxu3 %v554_v19 }
  0x94   : > { %637 = vmatmul.bf16.gmra.mxu0 %v549_v28  ;;  %647 = vmatmul.bf16.gmra.mxu1 %v551_v29 }
  0x95   : > { %657 = vmatmul.bf16.gmra.mxu2 %v553_v30  ;;  %667 = vmatmul.bf16.gmra.mxu3 %v555_v31 }
 0x101   : > { %v633_v33 = vpop.f32.mrf.mxu0  ;;  %v643_v34 = vpop.f32.mrf.mxu1 }
 0x102   : > { %v634_v35 = vadd.f32 %v5474_v32, %v633_v33  ;;  %v644_v36 = vadd.f32 %v5474_v32, %v643_v34 }
 0x104   : > { %673 = vst [vmem:[#allocation2 + $0x30] sm:$0xff] %v634_v35 }
 0x105   : > { %677 = vst [vmem:[#allocation2 + $0x50] sm:$0xff] %v644_v36 }
 0x108   : > { %v653_v37 = vpop.f32.mrf.mxu2  ;;  %v663_v38 = vpop.f32.mrf.mxu3 }
 0x109   : > { %v654_v39 = vadd.f32 %v5474_v32, %v653_v37  ;;  %v664_v40 = vadd.f32 %v5474_v32, %v663_v38  ;;  %v635_v41 = vpop.f32.mrf.mxu0  ;;  %v645_v42 = vpop.f32.mrf.mxu1 }
 0x10a   : > { %v636_v43 = vadd.f32 %v5474_v32, %v635_v41  ;;  %v646_v44 = vadd.f32 %v5474_v32, %v645_v42 }
 0x10b   : > { %681 = vst [vmem:[#allocation2 + $0x40] sm:$0xff] %v654_v39 }
 0x10c   : > { %685 = vst [vmem:[#allocation2 + $0x60] sm:$0xff] %v664_v40 }
 0x10d   : > { %674 = vst [vmem:[#allocation2] sm:$0xff] %v636_v43 }
 0x10e   : > { %678 = vst [vmem:[#allocation2 + $0x68] sm:$0xff] %v646_v44 }
 0x110   : > { %v655_v45 = vpop.f32.mrf.mxu2  ;;  %v665_v46 = vpop.f32.mrf.mxu3 }
 0x111   : > { %v656_v47 = vadd.f32 %v5474_v32, %v655_v45  ;;  %v666_v48 = vadd.f32 %v5474_v32, %v665_v46  ;;  %v638_v49 = vpop.f32.mrf.mxu0  ;;  %v648_v50 = vpop.f32.mrf.mxu1 }
 0x112   : > { %v639_v51 = vadd.f32 %v5474_v32, %v638_v49  ;;  %v649_v52 = vadd.f32 %v5474_v32, %v648_v50 }
 0x113   : > { %682 = vst [vmem:[#allocation2 + $0x20] sm:$0xff] %v656_v47 }
 0x114   : > { %686 = vst [vmem:[#allocation2 + $0x70] sm:$0xff] %v666_v48 }
 0x115   : > { %675 = vst [vmem:[#allocation2 + $0x58] sm:$0xff] %v639_v51 }
 0x116   : > { %679 = vst [vmem:[#allocation2 + $0x8] sm:$0xff] %v649_v52 }
 0x118   : > { %v658_v53 = vpop.f32.mrf.mxu2  ;;  %v668_v54 = vpop.f32.mrf.mxu3 }
 0x119   : > { %v659_v55 = vadd.f32 %v5474_v32, %v658_v53  ;;  %v669_v56 = vadd.f32 %v5474_v32, %v668_v54  ;;  %v640_v57 = vpop.f32.mrf.mxu0  ;;  %v650_v58 = vpop.f32.mrf.mxu1 }
 0x11a   : > { %v641_v59 = vadd.f32 %v5474_v32, %v640_v57  ;;  %v651_v60 = vadd.f32 %v5474_v32, %v650_v58 }
 0x11b   : > { %683 = vst [vmem:[#allocation2 + $0x10] sm:$0xff] %v659_v55 }
 0x11c   : > { %687 = vst [vmem:[#allocation2 + $0x78] sm:$0xff] %v669_v56 }
 0x11d   : > { %676 = vst [vmem:[#allocation2 + $0x18] sm:$0xff] %v641_v59 }
 0x11e   : > { %680 = vst [vmem:[#allocation2 + $0x48] sm:$0xff] %v651_v60 }
 0x120   : > { %v660_v61 = vpop.f32.mrf.mxu2  ;;  %v670_v62 = vpop.f32.mrf.mxu3 }
 0x121   : > { %v661_v63 = vadd.f32 %v5474_v32, %v660_v61  ;;  %v671_v0 = vadd.f32 %v5474_v32, %v670_v62 }
 0x123   : > { %684 = vst [vmem:[#allocation2 + $0x38] sm:$0xff] %v661_v63 }
 0x124   : > { %688 = vst [vmem:[#allocation2 + $0x28] sm:$0xff] %v671_v0 }
 0x125 PF: > { %v4952_v1 = vld [vmem:[%s6222_s23 + $0xe0] sm:$0xf]  ;;  %v5237_v2 = vld [vmem:[%s6222_s23 + $0xec] sm:$0xf0]  ;;  %v5235_v3 = vld [vmem:[%s6222_s23 + $0xe4] sm:$0xf] }
 0x126   : > { %v4953_v4 = vor.u32 %v5237_v2, %v4952_v1  ;;  %v4954_v5 = vld [vmem:[%s6222_s23 + $0xf0] sm:$0xf0]  ;;  %v4960_v6 = vld [vmem:[%s6222_s23 + $0xe8] sm:$0xf]  ;;  %v5238_v7 = vld [vmem:[%s6222_s23 + $0xf4] sm:$0xf0] }
 0x127   : > { %v4957_v8 = vor.u32 %v5235_v3, %v4954_v5  ;;  %v4961_v9 = vor.u32 %v5238_v7, %v4960_v6  ;;  %v5236_v10 = vld [vmem:[%s6222_s23 + $0xec] sm:$0xf]  ;;  %v4962_v11 = vld [vmem:[%s6222_s23 + $0xf8] sm:$0xf0]  ;;  %v4936_v12 = vld [vmem:[%s6222_s23 + $0xc0] sm:$0xf] }
 0x128   : > { %915 = vmatpush.bf16.msra.mxu0 %v4953_v4  ;;  %v4965_v13 = vor.u32 %v5236_v10, %v4962_v11  ;;  %v5233_v14 = vld [vmem:[%s6222_s23 + $0xcc] sm:$0xf0]  ;;  %v5231_v15 = vld [vmem:[%s6222_s23 + $0xc4] sm:$0xf]  ;;  %v4938_v16 = vld [vmem:[%s6222_s23 + $0xd0] sm:$0xf0] }
 0x129   : > { %964 = vmatpush.bf16.msra.mxu1 %v4957_v8  ;;  %1013 = vmatpush.bf16.msra.mxu2 %v4961_v9  ;;  %v4937_v17 = vor.u32 %v5233_v14, %v4936_v12  ;;  %v4941_v18 = vor.u32 %v5231_v15, %v4938_v16  ;;  %v4944_v19 = vld [vmem:[%s6222_s23 + $0xc8] sm:$0xf]  ;;  %v5234_v20 = vld [vmem:[%s6222_s23 + $0xd4] sm:$0xf0]  ;;  %v5232_v21 = vld [vmem:[%s6222_s23 + $0xcc] sm:$0xf] }
 0x12a   : > { %1062 = vmatpush.bf16.msra.mxu3 %v4965_v13  ;;  %v4945_v22 = vor.u32 %v5234_v20, %v4944_v19  ;;  %v4946_v23 = vld [vmem:[%s6222_s23 + $0xd8] sm:$0xf0]  ;;  %v4920_v24 = vld [vmem:[%s6222_s23 + $0xa0] sm:$0xf]  ;;  %v5229_v25 = vld [vmem:[%s6222_s23 + $0xac] sm:$0xf0] }
 0x12b   : > { %v4949_v26 = vor.u32 %v5232_v21, %v4946_v23  ;;  %v5227_v27 = vld [vmem:[%s6222_s23 + $0xa4] sm:$0xf]  ;;  %v4922_v28 = vld [vmem:[%s6222_s23 + $0xb0] sm:$0xf0]  ;;  %v4928_v29 = vld [vmem:[%s6222_s23 + $0xa8] sm:$0xf]  ;;  %v4921_v30 = vor.u32 %v5229_v25, %v4920_v24 }
 0x12c   : > { %916 = vmatpush.bf16.msra.mxu0 %v4937_v17  ;;  %v5230_v31 = vld [vmem:[%s6222_s23 + $0xb4] sm:$0xf0]  ;;  %v5228_v32 = vld [vmem:[%s6222_s23 + $0xac] sm:$0xf]  ;;  %v4930_v33 = vld [vmem:[%s6222_s23 + $0xb8] sm:$0xf0]  ;;  %v4925_v34 = vor.u32 %v5227_v27, %v4922_v28 }
 0x12d   : > { %965 = vmatpush.bf16.msra.mxu1 %v4941_v18  ;;  %1014 = vmatpush.bf16.msra.mxu2 %v4945_v22  ;;  %v4929_v35 = vor.u32 %v5230_v31, %v4928_v29  ;;  %v4904_v36 = vld [vmem:[%s6222_s23 + $0x80] sm:$0xf]  ;;  %v5225_v37 = vld [vmem:[%s6222_s23 + $0x8c] sm:$0xf0]  ;;  %v5223_v38 = vld [vmem:[%s6222_s23 + $0x84] sm:$0xf]  ;;  %v4933_v39 = vor.u32 %v5228_v32, %v4930_v33 }
 0x12e   : > { %1063 = vmatpush.bf16.msra.mxu3 %v4949_v26  ;;  %v4906_v40 = vld [vmem:[%s6222_s23 + $0x90] sm:$0xf0]  ;;  %v4912_v41 = vld [vmem:[%s6222_s23 + $0x88] sm:$0xf]  ;;  %v5226_v42 = vld [vmem:[%s6222_s23 + $0x94] sm:$0xf0]  ;;  %v4905_v45 = vor.u32 %v5225_v37, %v4904_v36 }
 0x12f   : > { %v5224_v43 = vld [vmem:[%s6222_s23 + $0x8c] sm:$0xf]  ;;  %v4914_v44 = vld [vmem:[%s6222_s23 + $0x98] sm:$0xf0]  ;;  %v4909_v46 = vor.u32 %v5223_v38, %v4906_v40  ;;  %v4913_v47 = vor.u32 %v5226_v42, %v4912_v41  ;;  %v4888_v48 = vld [vmem:[%s6222_s23 + $0x60] sm:$0xf] }
 0x130   : > { %917 = vmatpush.bf16.msra.mxu0 %v4921_v30  ;;  %v5221_v49 = vld [vmem:[%s6222_s23 + $0x6c] sm:$0xf0]  ;;  %v5219_v50 = vld [vmem:[%s6222_s23 + $0x64] sm:$0xf]  ;;  %v4917_v51 = vor.u32 %v5224_v43, %v4914_v44  ;;  %v4890_v52 = vld [vmem:[%s6222_s23 + $0x70] sm:$0xf0] }
 0x131   : > { %966 = vmatpush.bf16.msra.mxu1 %v4925_v34  ;;  %1015 = vmatpush.bf16.msra.mxu2 %v4929_v35  ;;  %v4896_v53 = vld [vmem:[%s6222_s23 + $0x68] sm:$0xf]  ;;  %v5222_v54 = vld [vmem:[%s6222_s23 + $0x74] sm:$0xf0]  ;;  %v5220_v55 = vld [vmem:[%s6222_s23 + $0x6c] sm:$0xf]  ;;  %v4889_v57 = vor.u32 %v5221_v49, %v4888_v48  ;;  %v4893_v58 = vor.u32 %v5219_v50, %v4890_v52 }
 0x132   : > { %1064 = vmatpush.bf16.msra.mxu3 %v4933_v39  ;;  %v4898_v56 = vld [vmem:[%s6222_s23 + $0x78] sm:$0xf0]  ;;  %v4897_v59 = vor.u32 %v5222_v54, %v4896_v53  ;;  %v4872_v60 = vld [vmem:[%s6222_s23 + $0x40] sm:$0xf]  ;;  %v5217_v61 = vld [vmem:[%s6222_s23 + $0x4c] sm:$0xf0] }
 0x133   : > { %v5215_v62 = vld [vmem:[%s6222_s23 + $0x44] sm:$0xf]  ;;  %v4901_v63 = vor.u32 %v5220_v55, %v4898_v56  ;;  %v4874_v0 = vld [vmem:[%s6222_s23 + $0x50] sm:$0xf0]  ;;  %v4880_v1 = vld [vmem:[%s6222_s23 + $0x48] sm:$0xf]  ;;  %v4873_v5 = vor.u32 %v5217_v61, %v4872_v60 }
 0x134   : > { %918 = vmatpush.bf16.msra.mxu0 %v4905_v45  ;;  %v5218_v2 = vld [vmem:[%s6222_s23 + $0x54] sm:$0xf0]  ;;  %v5216_v3 = vld [vmem:[%s6222_s23 + $0x4c] sm:$0xf]  ;;  %v4882_v4 = vld [vmem:[%s6222_s23 + $0x58] sm:$0xf0]  ;;  %v4877_v6 = vor.u32 %v5215_v62, %v4874_v0 }
 0x135   : > { %967 = vmatpush.bf16.msra.mxu1 %v4909_v46  ;;  %1016 = vmatpush.bf16.msra.mxu2 %v4913_v47  ;;  %v4881_v7 = vor.u32 %v5218_v2, %v4880_v1  ;;  %v4856_v8 = vld [vmem:[%s6222_s23 + $0x20] sm:$0xf]  ;;  %v5213_v9 = vld [vmem:[%s6222_s23 + $0x2c] sm:$0xf0]  ;;  %v5211_v10 = vld [vmem:[%s6222_s23 + $0x24] sm:$0xf]  ;;  %v4885_v11 = vor.u32 %v5216_v3, %v4882_v4 }
 0x136   : > { %1065 = vmatpush.bf16.msra.mxu3 %v4917_v51  ;;  %v4858_v12 = vld [vmem:[%s6222_s23 + $0x30] sm:$0xf0]  ;;  %v4864_v13 = vld [vmem:[%s6222_s23 + $0x28] sm:$0xf]  ;;  %v5214_v14 = vld [vmem:[%s6222_s23 + $0x34] sm:$0xf0]  ;;  %v4857_v17 = vor.u32 %v5213_v9, %v4856_v8 }
 0x137   : > { %v5212_v15 = vld [vmem:[%s6222_s23 + $0x2c] sm:$0xf]  ;;  %v4866_v16 = vld [vmem:[%s6222_s23 + $0x38] sm:$0xf0]  ;;  %v4861_v18 = vor.u32 %v5211_v10, %v4858_v12  ;;  %v4865_v19 = vor.u32 %v5214_v14, %v4864_v13  ;;  %v4840_v20 = vld [vmem:[%s6222_s23] sm:$0xf] }
 0x138   : > { %919 = vmatpush.bf16.msra.mxu0 %v4889_v57  ;;  %v5209_v21 = vld [vmem:[%s6222_s23 + $0xc] sm:$0xf0]  ;;  %v5207_v22 = vld [vmem:[%s6222_s23 + $0x4] sm:$0xf]  ;;  %v4869_v23 = vor.u32 %v5212_v15, %v4866_v16  ;;  %v4842_v24 = vld [vmem:[%s6222_s23 + $0x10] sm:$0xf0] }
 0x139   : > { %968 = vmatpush.bf16.msra.mxu1 %v4893_v58  ;;  %1017 = vmatpush.bf16.msra.mxu2 %v4897_v59  ;;  %v4848_v25 = vld [vmem:[%s6222_s23 + $0x8] sm:$0xf]  ;;  %v5210_v26 = vld [vmem:[%s6222_s23 + $0x14] sm:$0xf0]  ;;  %v5208_v27 = vld [vmem:[%s6222_s23 + $0xc] sm:$0xf]  ;;  %v4841_v29 = vor.u32 %v5209_v21, %v4840_v20  ;;  %v4845_v32 = vor.u32 %v5207_v22, %v4842_v24 }
 0x13a   : > { %1066 = vmatpush.bf16.msra.mxu3 %v4901_v63  ;;  %v4850_v28 = vld [vmem:[%s6222_s23 + $0x18] sm:$0xf0]  ;;  %v689_v30 = vld [vmem:[#allocation2 + $0x30] sm:$0xff]  ;;  %v690_v31 = vld [vmem:[#allocation2] sm:$0xff]  ;;  %v4849_v33 = vor.u32 %v5210_v26, %v4848_v25  ;;  %p5158_p2 = scmp.ne.s32.totalorder %s5919_s15, 1 }
 0x13b   : > { %v4853_v34 = vor.u32 %v5208_v27, %v4850_v28  ;;  %v705_v35 = vpack.c.bf16 %v690_v31, %v689_v30  ;;  %v691_v36 = vld [vmem:[#allocation2 + $0x58] sm:$0xff]  ;;  %v693_v39 = vld [vmem:[#allocation2 + $0x50] sm:$0xff]  ;;  %v694_v40 = vld [vmem:[#allocation2 + $0x68] sm:$0xff]  ;;  %s10210_s11 = sld [smem:[#allocation111_spill]] (!%p5158_p2) }
 0x13c   : > { %920 = vmatpush.bf16.msra.mxu0 %v4873_v5  ;;  %v692_v37 = vld [vmem:[#allocation2 + $0x18] sm:$0xff]  ;;  %v707_v41 = vpack.c.bf16 %v694_v40, %v693_v39  ;;  %v5262_v42 = vld [vmem:[%s6231_s27 + $0xb8] sm:$0xff]  ;;  %v695_v46 = vld [vmem:[#allocation2 + $0x8] sm:$0xff] }
 0x13d   : > { %969 = vmatpush.bf16.msra.mxu1 %v4877_v6  ;;  %1018 = vmatpush.bf16.msra.mxu2 %v4881_v7  ;;  %v706_v38 = vpack.c.bf16 %v692_v37, %v691_v36  ;;  %v5246_v43 = vld [vmem:[%s6231_s27 + $0x38] sm:$0xff]  ;;  %v696_v47 = vld [vmem:[#allocation2 + $0x48] sm:$0xff]  ;;  %v5261_v49 = vld [vmem:[%s6231_s27 + $0xb0] sm:$0xff] }
 0x13e   : > { %1067 = vmatpush.bf16.msra.mxu3 %v4885_v11  ;;  %v5270_v44 = vld [vmem:[%s6231_s27 + $0xf8] sm:$0xff]  ;;  %v708_v48 = vpack.c.bf16 %v696_v47, %v695_v46  ;;  %v5245_v50 = vld [vmem:[%s6231_s27 + $0x30] sm:$0xff]  ;;  %v5260_v56 = vld [vmem:[%s6231_s27 + $0xa8] sm:$0xff] }
 0x13f   : > { %v5254_v45 = vld [vmem:[%s6231_s27 + $0x78] sm:$0xff]  ;;  %v5269_v51 = vld [vmem:[%s6231_s27 + $0xf0] sm:$0xff]  ;;  %v5244_v57 = vld [vmem:[%s6231_s27 + $0x28] sm:$0xff] }
 0x140   : > { %921 = vmatpush.bf16.msra.mxu0 %v4857_v17  ;;  %v5253_v52 = vld [vmem:[%s6231_s27 + $0x70] sm:$0xff]  ;;  %v697_v53 = vld [vmem:[#allocation2 + $0x40] sm:$0xff]  ;;  %v5268_v58 = vld [vmem:[%s6231_s27 + $0xe8] sm:$0xff] }
 0x141   : > { %970 = vmatpush.bf16.msra.mxu1 %v4861_v18  ;;  %1019 = vmatpush.bf16.msra.mxu2 %v4865_v19  ;;  %v698_v54 = vld [vmem:[#allocation2 + $0x20] sm:$0xff]  ;;  %v5252_v59 = vld [vmem:[%s6231_s27 + $0x68] sm:$0xff]  ;;  %v700_v61 = vld [vmem:[#allocation2 + $0x38] sm:$0xff] }
 0x142   : > { %1068 = vmatpush.bf16.msra.mxu3 %v4869_v23  ;;  %v709_v55 = vpack.c.bf16 %v698_v54, %v697_v53  ;;  %v699_v60 = vld [vmem:[#allocation2 + $0x10] sm:$0xff]  ;;  %v5259_v63 = vld [vmem:[%s6231_s27 + $0xa0] sm:$0xff]  ;;  %v701_v3 = vld [vmem:[#allocation2 + $0x60] sm:$0xff] }
 0x143   : > { %v710_v62 = vpack.c.bf16 %v700_v61, %v699_v60  ;;  %v5243_v0 = vld [vmem:[%s6231_s27 + $0x20] sm:$0xff]  ;;  %v702_v4 = vld [vmem:[#allocation2 + $0x70] sm:$0xff]  ;;  %v703_v6 = vld [vmem:[#allocation2 + $0x78] sm:$0xff] }
 0x144   : > { %922 = vmatpush.bf16.msra.mxu0 %v4841_v29  ;;  %v5267_v1 = vld [vmem:[%s6231_s27 + $0xe0] sm:$0xff]  ;;  %v711_v5 = vpack.c.bf16 %v702_v4, %v701_v3  ;;  %v745_v9 = vld [vmem:[%s454_s25] sm:$0xf] }
 0x145   : > { %971 = vmatpush.bf16.msra.mxu1 %v4845_v32  ;;  %1020 = vmatpush.bf16.msra.mxu2 %v4849_v33  ;;  %v5251_v2 = vld [vmem:[%s6231_s27 + $0x60] sm:$0xff]  ;;  %v6349_v10 = vperm.slane %v745_v9, 0  ;;  %v6351_v12 = vperm.slane %v745_v9, 1  ;;  %v6365_v18 = vperm.slane %v745_v9, 2  ;;  %v6374_v23 = vperm.slane %v745_v9, 3 }
 0x146   : > { %1069 = vmatpush.bf16.msra.mxu3 %v4853_v34  ;;  %v704_v7 = vld [vmem:[#allocation2 + $0x28] sm:$0xff] }
 0x147   : > { %923 = vmatmul.bf16.vlgmr.msra.gmra.mxu0 %v705_v35  ;;  %v712_v8 = vpack.c.bf16 %v704_v7, %v703_v6  ;;  %9863 = vst [vmem:[#allocation30_spill] sm:$0xff] %v6365_v18 }
 0x148   : > { %972 = vmatmul.bf16.vlgmr.msra.gmra.mxu1 %v705_v35  ;;  %1021 = vmatmul.bf16.vlgmr.msra.gmra.mxu2 %v705_v35  ;;  %9864 = vst [vmem:[#allocation31_spill] sm:$0xff] %v6374_v23 }
 0x149   : > { %1070 = vmatmul.bf16.vlgmr.msra.gmra.mxu3 %v705_v35  ;;  %4317 = vmatpush.bf16.msrb.mxu2 %v5262_v42 }
 0x14a   : > { %4219 = vmatpush.bf16.msrb.mxu0 %v5246_v43  ;;  %4366 = vmatpush.bf16.msrb.mxu3 %v5270_v44 }
 0x14b   : > { %4268 = vmatpush.bf16.msrb.mxu1 %v5254_v45 }
 0x14d   : > { %4318 = vmatpush.bf16.msrb.mxu2 %v5261_v49 }
 0x14e   : > { %4220 = vmatpush.bf16.msrb.mxu0 %v5245_v50  ;;  %4367 = vmatpush.bf16.msrb.mxu3 %v5269_v51  ;;  %v5258_v50 = vld [vmem:[%s6231_s27 + $0x98] sm:$0xff] }
 0x14f   : > { %4269 = vmatpush.bf16.msrb.mxu1 %v5253_v52 }
 0x151   : > { %4319 = vmatpush.bf16.msrb.mxu2 %v5260_v56 }
 0x152   : > { %4221 = vmatpush.bf16.msrb.mxu0 %v5244_v57  ;;  %4368 = vmatpush.bf16.msrb.mxu3 %v5268_v58 }
 0x153   : > { %4270 = vmatpush.bf16.msrb.mxu1 %v5252_v59 }
 0x155   : > { %4320 = vmatpush.bf16.msrb.mxu2 %v5259_v63 }
 0x156   : > { %4222 = vmatpush.bf16.msrb.mxu0 %v5243_v0  ;;  %4369 = vmatpush.bf16.msrb.mxu3 %v5267_v1 }
 0x157   : > { %928 = vmatmul.bf16.gmra.mxu0 %v706_v38  ;;  %4271 = vmatpush.bf16.msrb.mxu1 %v5251_v2 }
 0x158   : > { %977 = vmatmul.bf16.gmra.mxu1 %v706_v38  ;;  %1026 = vmatmul.bf16.gmra.mxu2 %v706_v38 }
 0x159   : > { %1075 = vmatmul.bf16.gmra.mxu3 %v706_v38  ;;  %4321 = vmatpush.bf16.msrb.mxu2 %v5258_v50 }
 0x167   : > { %933 = vmatmul.bf16.gmra.mxu0 %v707_v41 }
 0x168   : > { %982 = vmatmul.bf16.gmra.mxu1 %v707_v41  ;;  %1031 = vmatmul.bf16.gmra.mxu2 %v707_v41 }
 0x169   : > { %1080 = vmatmul.bf16.gmra.mxu3 %v707_v41 }
 0x177   : > { %938 = vmatmul.bf16.gmra.mxu0 %v708_v48 }
 0x178   : > { %987 = vmatmul.bf16.gmra.mxu1 %v708_v48  ;;  %1036 = vmatmul.bf16.gmra.mxu2 %v708_v48 }
 0x179   : > { %1085 = vmatmul.bf16.gmra.mxu3 %v708_v48 }
 0x187   : > { %943 = vmatmul.bf16.gmra.mxu0 %v709_v55 }
 0x188   : > { %992 = vmatmul.bf16.gmra.mxu1 %v709_v55  ;;  %1041 = vmatmul.bf16.gmra.mxu2 %v709_v55 }
 0x189   : > { %1090 = vmatmul.bf16.gmra.mxu3 %v709_v55 }
 0x197   : > { %948 = vmatmul.bf16.gmra.mxu0 %v710_v62 }
 0x198   : > { %997 = vmatmul.bf16.gmra.mxu1 %v710_v62  ;;  %1046 = vmatmul.bf16.gmra.mxu2 %v710_v62 }
 0x199   : > { %1095 = vmatmul.bf16.gmra.mxu3 %v710_v62 }
 0x1a7   : > { %953 = vmatmul.bf16.gmra.mxu0 %v711_v5 }
 0x1a8   : > { %1002 = vmatmul.bf16.gmra.mxu1 %v711_v5  ;;  %1051 = vmatmul.bf16.gmra.mxu2 %v711_v5 }
 0x1a9   : > { %1100 = vmatmul.bf16.gmra.mxu3 %v711_v5 }
 0x1b7   : > { %958 = vmatmul.bf16.gmra.mxu0 %v712_v8 }
 0x1b8   : > { %1007 = vmatmul.bf16.gmra.mxu1 %v712_v8  ;;  %1056 = vmatmul.bf16.gmra.mxu2 %v712_v8 }
 0x1b9   : > { %1105 = vmatmul.bf16.gmra.mxu3 %v712_v8 }
 0x1c4   : > { %v924_v11 = vpop.f32.mrf.mxu0 }
 0x1c5   : > { %v973_v13 = vpop.f32.mrf.mxu1  ;;  %v6354_v14 = vadd.f32 %v924_v11, %v6349_v10 }
 0x1c6   : > { %v6357_v15 = vadd.f32 %v973_v13, %v6351_v12 }
 0x1c7   : > { %v6360_v16 = vmul.f32 0.70710677, %v6354_v14 }
 0x1c8   : > { %v6363_v17 = vmul.f32 0.70710677, %v6357_v15 }
 0x1c9   : > { %v1239_v20 = vmul.f32 %v6360_v16, %v6360_v16 }
 0x1ca   : > { %v1279_v21 = vmul.f32 %v6363_v17, %v6363_v17 }
 0x1cb   : > { %v1022_v19 = vpop.f32.mrf.mxu2  ;;  %v6376_v24 = vmin.f32 %v1239_v20, 16.0 }
 0x1cc   : > { %v6372_v22 = vadd.f32 %v1022_v19, %v6365_v18  ;;  %v1071_v25 = vpop.f32.mrf.mxu3  ;;  %v6378_v26 = vmin.f32 %v1279_v21, 16.0  ;;  %v926_v32 = vpop.f32.mrf.mxu0 }
 0x1cd   : > { %v6384_v28 = vadd.f32 %v1071_v25, %v6374_v23  ;;  %v1252_v29 = vmul.f32 3.8918573e-05, %v6376_v24  ;;  %v6394_v36 = vadd.f32 %v926_v32, %v6349_v10  ;;  %v1241_v44 = vmul.f32 2.1237322e-06, %v6376_v24  ;;  %v975_v58 = vpop.f32.mrf.mxu1 }
 0x1ce   : > { %v6381_v27 = vmul.f32 0.70710677, %v6372_v22  ;;  %v1292_v30 = vmul.f32 3.8918573e-05, %v6378_v26  ;;  %v1281_v53 = vmul.f32 2.1237322e-06, %v6378_v26  ;;  %v6422_v1 = vadd.f32 %v975_v58, %v6351_v12 }
 0x1cf   : > { %v6391_v33 = vmul.f32 0.70710677, %v6384_v28  ;;  %v1253_v34 = vadd.f32 0.001143296, %v1252_v29  ;;  %v6403_v41 = vmul.f32 0.70710677, %v6394_v36 }
 0x1d0   : > { %v1319_v31 = vmul.f32 %v6381_v27, %v6381_v27  ;;  %v1293_v35 = vadd.f32 0.001143296, %v1292_v30  ;;  %v1242_v51 = vadd.f32 0.00028619796, %v1241_v44  ;;  %v1282_v61 = vadd.f32 0.00028619796, %v1281_v53 }
 0x1d1   : > { %v1359_v38 = vmul.f32 %v6391_v33, %v6391_v33  ;;  %v1254_v39 = vmul.f32 %v1253_v34, %v6376_v24  ;;  %v1399_v47 = vmul.f32 %v6403_v41, %v6403_v41  ;;  %v6431_v11 = vmul.f32 0.70710677, %v6422_v1 }
 0x1d2   : > { %v6396_v37 = vmin.f32 %v1319_v31, 16.0  ;;  %v1294_v40 = vmul.f32 %v1293_v35, %v6378_v26  ;;  %v1243_v59 = vmul.f32 %v1242_v51, %v6376_v24  ;;  %v1283_v5 = vmul.f32 %v1282_v61, %v6378_v26 }
 0x1d3   : > { %v6406_v43 = vmin.f32 %v1359_v38, 16.0  ;;  %v1255_v45 = vadd.f32 0.014752088, %v1254_v39  ;;  %v6416_v55 = vmin.f32 %v1399_v47, 16.0  ;;  %v1439_v32 = vmul.f32 %v6431_v11, %v6431_v11 }
 0x1d4   : > { %v1332_v42 = vmul.f32 3.8918573e-05, %v6396_v37  ;;  %v1295_v46 = vadd.f32 0.014752088, %v1294_v40  ;;  %v1244_v3 = vadd.f32 0.0036580483, %v1243_v59 }
 0x1d5   : > { %v1372_v49 = vmul.f32 3.8918573e-05, %v6406_v43  ;;  %v1256_v52 = vmul.f32 %v1255_v45, %v6376_v24  ;;  %v1412_v63 = vmul.f32 3.8918573e-05, %v6416_v55  ;;  %v1321_v7 = vmul.f32 2.1237322e-06, %v6396_v37 }
 0x1d6   : > { %v1333_v48 = vadd.f32 0.001143296, %v1332_v42  ;;  %v1296_v54 = vmul.f32 %v1295_v46, %v6378_v26  ;;  %v1245_v19 = vmul.f32 %v1244_v3, %v6376_v24  ;;  %v1284_v21 = vadd.f32 0.0036580483, %v1283_v5  ;;  %v5242_v40 = vld [vmem:[%s6231_s27 + $0x18] sm:$0xff] }
 0x1d7   : > { %v1373_v57 = vadd.f32 0.001143296, %v1372_v49  ;;  %v1257_v60 = vadd.f32 0.112945676, %v1256_v52  ;;  %v1413_v8 = vadd.f32 0.001143296, %v1412_v63  ;;  %4223 = vmatpush.bf16.msrb.mxu0 %v5242_v40 }
 0x1d8   : > { %v1334_v56 = vmul.f32 %v1333_v48, %v6396_v37  ;;  %v1297_v62 = vadd.f32 0.112945676, %v1296_v54  ;;  %v1322_v29 = vadd.f32 0.00028619796, %v1321_v7  ;;  %v1246_v35 = vadd.f32 0.05243302, %v1245_v19  ;;  %v1024_v54 = vpop.f32.mrf.mxu2 }
 0x1d9   : > { %v1374_v2 = vmul.f32 %v1373_v57, %v6406_v43  ;;  %v1258_v4 = vmul.f32 %v1257_v60, %v6376_v24  ;;  %v1414_v30 = vmul.f32 %v1413_v8, %v6416_v55  ;;  %v1285_v39 = vmul.f32 %v1284_v21, %v6378_v26  ;;  %v5250_v42 = vld [vmem:[%s6231_s27 + $0x58] sm:$0xff] }
 0x1da   : > { %v1335_v0 = vadd.f32 0.014752088, %v1334_v56  ;;  %v1298_v6 = vmul.f32 %v1297_v62, %v6378_v26  ;;  %v1323_v45 = vmul.f32 %v1322_v29, %v6396_v37  ;;  %v1361_v46 = vmul.f32 2.1237322e-06, %v6406_v43  ;;  %4272 = vmatpush.bf16.msrb.mxu1 %v5250_v42  ;;  %v5266_v62 = vld [vmem:[%s6231_s27 + $0xd8] sm:$0xff] }
 0x1db   : > { %v1375_v13 = vadd.f32 0.014752088, %v1374_v2  ;;  %v1259_v20 = vadd.f32 0.4994258, %v1258_v4  ;;  %v1415_v47 = vadd.f32 0.014752088, %v1414_v30  ;;  %v1247_v51 = vmul.f32 %v1246_v35, %v6376_v24  ;;  %4370 = vmatpush.bf16.msrb.mxu3 %v5266_v62 }
 0x1dc   : > { %v1336_v9 = vmul.f32 %v1335_v0, %v6396_v37  ;;  %v1299_v25 = vadd.f32 0.4994258, %v1298_v6  ;;  %v6446_v49 = vmin.f32 %v1439_v32, 16.0  ;;  %v1286_v53 = vadd.f32 0.05243302, %v1285_v39 }
 0x1dd   : > { %v1376_v34 = vmul.f32 %v1375_v13, %v6406_v43  ;;  %v1260_v38 = vmul.f32 %v1259_v20, %v6376_v24  ;;  %v1324_v57 = vadd.f32 0.0036580483, %v1323_v45  ;;  %v1362_v58 = vadd.f32 0.00028619796, %v1361_v46 }
 0x1de   : > { %v1337_v31 = vadd.f32 0.112945676, %v1336_v9  ;;  %v1300_v44 = vmul.f32 %v1299_v25, %v6378_v26  ;;  %v1416_v59 = vmul.f32 %v1415_v47, %v6416_v55  ;;  %v1452_v61 = vmul.f32 3.8918573e-05, %v6446_v49  ;;  %v1073_v9 = vpop.f32.mrf.mxu3 }
 0x1df   : > { %v1377_v50 = vadd.f32 0.112945676, %v1376_v34  ;;  %v6449_v52 = vadd.f32 1.0, %v1260_v38  ;;  %v6458_v0 = vadd.f32 %v1024_v54, %v6365_v18  ;;  %v1248_v2 = vadd.f32 0.18741608, %v1247_v51 }
 0x1e0   : > { %v1338_v48 = vmul.f32 %v1337_v31, %v6396_v37  ;;  %v6451_v56 = vadd.f32 1.0, %v1300_v44  ;;  %v1287_v3 = vmul.f32 %v1286_v53, %v6378_v26  ;;  %v1325_v4 = vmul.f32 %v1324_v57, %v6396_v37 }
 0x1e1   : > { %v1378_v63 = vmul.f32 %v1377_v50, %v6406_v43  ;;  %5476 = vrcp.f32 %v6449_v52  ;;  %v1363_v5 = vmul.f32 %v1362_v58, %v6406_v43  ;;  %v1417_v6 = vadd.f32 0.112945676, %v1416_v59 }
 0x1e2   : > { %v1339_v60 = vadd.f32 0.4994258, %v1338_v48  ;;  %5478 = vrcp.f32 %v6451_v56  ;;  %v1453_v8 = vadd.f32 0.001143296, %v1452_v61  ;;  %v6467_v19 = vmul.f32 0.70710677, %v6458_v0 }
 0x1e3   : > { %v1379_v13 = vadd.f32 0.4994258, %v1378_v63  ;;  %v1249_v20 = vmul.f32 %v1248_v2, %v6376_v24  ;;  %v1288_v21 = vadd.f32 0.18741608, %v1287_v3  ;;  %v1326_v25 = vadd.f32 0.05243302, %v1325_v4 }
 0x1e4   : > { %v1340_v7 = vmul.f32 %v1339_v60, %v6396_v37  ;;  %v1364_v29 = vadd.f32 0.0036580483, %v1363_v5  ;;  %v1418_v30 = vmul.f32 %v1417_v6, %v6416_v55  ;;  %v6472_v31 = vadd.f32 %v1073_v9, %v6374_v23 }
 0x1e5   : > { %v1454_v35 = vmul.f32 %v1453_v8, %v6446_v49  ;;  %v6482_v39 = vmul.f32 0.5, %v6354_v14  ;;  %v1380_v24 = vmul.f32 %v1379_v13, %v6406_v43  ;;  %v1479_v40 = vmul.f32 %v6467_v19, %v6467_v19 }
 0x1e6   : > { %v6476_v34 = vadd.f32 1.0, %v1340_v7  ;;  %v1250_v42 = vadd.f32 1.1283791, %v1249_v20  ;;  %v6488_v44 = vmul.f32 0.5, %v6357_v15  ;;  %v1289_v45 = vmul.f32 %v1288_v21, %v6378_v26 }
 0x1e7   : > { %v6474_v32 = vpop.eup %5476  ;;  %v1401_v46 = vmul.f32 2.1237322e-06, %v6416_v55  ;;  %v1327_v47 = vmul.f32 %v1326_v25, %v6396_v37  ;;  %v1365_v48 = vmul.f32 %v1364_v29, %v6406_v43  ;;  %v1419_v50 = vadd.f32 0.4994258, %v1418_v30 }
 0x1e8   : > { %v6479_v38 = vpop.eup %5478  ;;  %v6495_v14 = vmul.f32 0.70710677, %v6472_v31  ;;  %v1263_v51 = vmul.f32 %v6474_v32, %v6449_v52  ;;  %5480 = vrcp.f32 %v6476_v34  ;;  %v1455_v15 = vadd.f32 0.014752088, %v1454_v35 }
 0x1e9   : > { %v1303_v53 = vmul.f32 %v6479_v38, %v6451_v56  ;;  %v6503_v26 = vmul.f32 0.5, %v6372_v22  ;;  %v6506_v54 = vmul.f32 0.5, %v6384_v28  ;;  %v6508_v57 = vadd.f32 1.0, %v1380_v24 }
 0x1ea   : > { %v6510_v58 = vmin.f32 %v1479_v40, 16.0  ;;  %v1290_v59 = vadd.f32 1.1283791, %v1289_v45  ;;  %v6513_v60 = vmul.f32 0.5, %v6394_v36  ;;  %v1402_v61 = vadd.f32 0.00028619796, %v1401_v46 }
 0x1eb   : > { %v6516_v62 = vmul.f32 0.5, %v6422_v1  ;;  %v1328_v63 = vadd.f32 0.18741608, %v1327_v47  ;;  %v1366_v2 = vadd.f32 0.05243302, %v1365_v48  ;;  %v1420_v22 = vmul.f32 %v1419_v50, %v6416_v55 }
 0x1ec   : > { %v1519_v28 = vmul.f32 %v6495_v14, %v6495_v14  ;;  %v6522_v3 = vmul.f32 %v1250_v42, %v6360_v16  ;;  %v1264_v4 = vsub.f32 1.0, %v1263_v51  ;;  %v1304_v5 = vsub.f32 1.0, %v1303_v53 }
 0x1ed   : > { %v1456_v6 = vmul.f32 %v1455_v15, %v6446_v49  ;;  %vm1267_vm0 = vweird.f32 %v6449_v52  ;;  %5482 = vrcp.f32 %v6508_v57  ;;  %v1441_v36 = vmul.f32 2.1237322e-06, %v6446_v49 }
 0x1ee   : > { %v1492_v1 = vmul.f32 3.8918573e-05, %v6510_v58  ;;  %v6529_v7 = vpop.eup %5480  ;;  %v1271_v8 = vand.u32 2147483647, %v6449_v52  ;;  %v1273_v9 = vand.u32 2147483648, %v6449_v52  ;;  %v6534_v16 = vmul.f32 %v1290_v59, %v6363_v17 }
 0x1ef   : > { %v1403_v13 = vmul.f32 %v1402_v61, %v6416_v55  ;;  %v1329_v20 = vmul.f32 %v1328_v63, %v6396_v37  ;;  %v1367_v21 = vmul.f32 %v1366_v2, %v6406_v43  ;;  %v6539_v25 = vadd.f32 1.0, %v1420_v22 }
 0x1f0   : > { %v6541_v29 = vmin.f32 %v1519_v28, 16.0  ;;  %v1265_v30 = vmul.f32 %v6474_v32, %v1264_v4  ;;  %v1305_v35 = vmul.f32 %v6479_v38, %v1304_v5  ;;  %vm1307_vm1 = vweird.f32 %v6451_v56 }
 0x1f1   : > { %v1457_v24 = vadd.f32 0.112945676, %v1456_v6  ;;  %v1311_v17 = vand.u32 2147483647, %v6451_v56  ;;  %v1343_v40 = vmul.f32 %v6529_v7, %v6476_v34  ;;  %v1442_v42 = vadd.f32 0.00028619796, %v1441_v36 }
 0x1f2   : > { %v1493_v37 = vadd.f32 0.001143296, %v1492_v1  ;;  %vm1268_vm2 = vweird.f32 %v6474_v32  ;;  %vm6550_vm3 = vcmp.eq.f32.partialorder %v1271_v8, 8.507059e+37  ;;  %v1274_v46 = vor.u32 1.1754944e-38, %v1273_v9  ;;  %v929_v9 = vpop.f32.mrf.mxu0 }
 0x1f3   : > { %v1313_v47 = vand.u32 2147483648, %v6451_v56  ;;  %v1404_v48 = vadd.f32 0.0036580483, %v1403_v13  ;;  %v6555_v50 = vpop.eup %5482  ;;  %v1330_v51 = vadd.f32 1.1283791, %v1329_v20  ;;  %5484 = vrcp.f32 %v6539_v25  ;;  %vm6573_vm6 = vmor %vm1267_vm0, %vm1268_vm2 }
 0x1f4   : > { %v1368_v53 = vadd.f32 0.18741608, %v1367_v21  ;;  %v1532_v15 = vmul.f32 3.8918573e-05, %v6541_v29  ;;  %v1266_v59 = vadd.f32 %v6474_v32, %v1265_v30  ;;  %v1306_v61 = vadd.f32 %v6479_v38, %v1305_v35 }
 0x1f5   : > { %vm1308_vm4 = vweird.f32 %v6479_v38  ;;  %v1458_v63 = vmul.f32 %v1457_v24, %v6446_v49  ;;  %vm6563_vm5 = vcmp.eq.f32.partialorder %v1311_v17, 8.507059e+37  ;;  %v1344_v22 = vsub.f32 1.0, %v1343_v40 }
 0x1f6   : > { %v1443_v28 = vmul.f32 %v1442_v42, %v6446_v49  ;;  %v1494_v4 = vmul.f32 %v1493_v37, %v6510_v58  ;;  %v1314_v6 = vor.u32 1.1754944e-38, %v1313_v47  ;;  %v1383_v36 = vmul.f32 %v6555_v50, %v6508_v57  ;;  %vm6585_vm7 = vmor %vm1307_vm1, %vm1308_vm4 }
 0x1f7   : > { %v1405_v1 = vmul.f32 %v1404_v48, %v6416_v55  ;;  %v6581_v8 = vmul.f32 0.5, %v6458_v0  ;;  %v6590_v52 = vmul.f32 %v1330_v51, %v6381_v27  ;;  %v1369_v20 = vmul.f32 %v1368_v53, %v6406_v43 }
 0x1f8   : > { %v1481_v21 = vmul.f32 2.1237322e-06, %v6510_v58  ;;  %v1533_v30 = vadd.f32 0.001143296, %v1532_v15  ;;  %v1270_v0 = vsel %vm6573_vm6, %v6474_v32, %v1266_v59  ;;  %v1310_v56 = vsel %vm6585_vm7, %v6479_v38, %v1306_v61 }
 0x1f9   : > { %vm1347_vm8 = vweird.f32 %v6476_v34  ;;  %v1459_v35 = vadd.f32 0.4994258, %v1458_v63  ;;  %v6601_v24 = vpop.eup %5484  ;;  %v1345_v27 = vmul.f32 %v6529_v7, %v1344_v22  ;;  %v1444_v43 = vadd.f32 0.0036580483, %v1443_v28  ;;  %v5257_v63 = vld [vmem:[%s6231_s27 + $0x90] sm:$0xff] }
 0x1fa   : > { %v1495_v17 = vadd.f32 0.014752088, %v1494_v4  ;;  %v6605_v40 = vadd.f32 %v929_v9, %v6349_v10  ;;  %v1351_v42 = vand.u32 2147483647, %v6476_v34  ;;  %v1353_v32 = vand.u32 2147483648, %v6476_v34  ;;  %4322 = vmatpush.bf16.msrb.mxu2 %v5257_v63 }
 0x1fb   : > { %v1384_v37 = vsub.f32 1.0, %v1383_v36  ;;  %v1406_v47 = vadd.f32 0.05243302, %v1405_v1  ;;  %v1275_v38 = vsel %vm6550_vm3, %v1274_v46, %v1270_v0  ;;  %v1370_v48 = vadd.f32 1.1283791, %v1369_v20 }
 0x1fc   : > { %v1482_v51 = vadd.f32 0.00028619796, %v1481_v21  ;;  %v1534_v53 = vmul.f32 %v1533_v30, %v6541_v29  ;;  %v1315_v15 = vsel %vm6563_vm5, %v1314_v6, %v1310_v56  ;;  %vm1348_vm9 = vweird.f32 %v6529_v7 }
 0x1fd   : > { %v1423_v59 = vmul.f32 %v6601_v24, %v6539_v25  ;;  %v1460_v61 = vmul.f32 %v1459_v35, %v6446_v49  ;;  %v1346_v22 = vadd.f32 %v6529_v7, %v1345_v27  ;;  %v1445_v45 = vmul.f32 %v1444_v43, %v6446_v49  ;;  %vm6642_vm11 = vmor %vm1347_vm8, %vm1348_vm9  ;;  %v5241_v27 = vld [vmem:[%s6231_s27 + $0x10] sm:$0xff] }
 0x1fe   : > { %v1496_v46 = vmul.f32 %v1495_v17, %v6510_v58  ;;  %v6623_v28 = vmul.f32 0.70710677, %v6605_v40  ;;  %vm6625_vm10 = vcmp.eq.f32.partialorder %v1351_v42, 8.507059e+37  ;;  %v1354_v4 = vor.u32 1.1754944e-38, %v1353_v32  ;;  %v5249_v43 = vld [vmem:[%s6231_s27 + $0x50] sm:$0xff]  ;;  %4224 = vmatpush.bf16.msrb.mxu0 %v5241_v27 }
 0x1ff   : > { %v1385_v5 = vmul.f32 %v6555_v50, %v1384_v37  ;;  %v1407_v6 = vmul.f32 %v1406_v47, %v6416_v55  ;;  %v6632_v36 = vmul.f32 %v1275_v38, %v6522_v3  ;;  %v6635_v1 = vmul.f32 %v1315_v15, %v6534_v16  ;;  %v5265_v47 = vld [vmem:[%s6231_s27 + $0xd0] sm:$0xff]  ;;  %4273 = vmatpush.bf16.msrb.mxu1 %v5249_v43 }
 0x200   : > { %v1483_v9 = vmul.f32 %v1482_v51, %v6510_v58  ;;  %v1535_v13 = vadd.f32 0.014752088, %v1534_v53  ;;  %v1371_v21 = vmul.f32 %v1370_v48, %v6391_v33  ;;  %v1424_v30 = vsub.f32 1.0, %v1423_v59  ;;  %4371 = vmatpush.bf16.msrb.mxu3 %v5265_v47 }
 0x201   : > { %v6647_v0 = vadd.f32 1.0, %v1460_v61  ;;  %v1521_v3 = vmul.f32 2.1237322e-06, %v6541_v29  ;;  %v1350_v16 = vsel %vm6642_vm11, %v6529_v7, %v1346_v22  ;;  %v1446_v56 = vadd.f32 0.05243302, %v1445_v45 }
 0x202   : > { %v1497_v35 = vadd.f32 0.112945676, %v1496_v46  ;;  %v1559_v34 = vmul.f32 %v6623_v28, %v6623_v28  ;;  %v1386_v17 = vadd.f32 %v6555_v50, %v1385_v5  ;;  %vm1388_vm12 = vweird.f32 %v6555_v50 }
 0x203   : > { %v1393_v33 = vand.u32 2147483648, %v6508_v57  ;;  %v1408_v42 = vadd.f32 0.18741608, %v1407_v6  ;;  %vm1387_vm13 = vweird.f32 %v6508_v57  ;;  %v1391_v32 = vand.u32 2147483647, %v6508_v57 }
 0x204   : > { %v1484_v37 = vadd.f32 0.0036580483, %v1483_v9  ;;  %v1536_v7 = vmul.f32 %v1535_v13, %v6541_v29  ;;  %v1355_v38 = vsel %vm6625_vm10, %v1354_v4, %v1350_v16  ;;  %v1425_v48 = vmul.f32 %v6601_v24, %v1424_v30  ;;  %vm6671_vm14 = vmor %vm1387_vm13, %vm1388_vm12  ;;  %v1027_v30 = vpop.f32.mrf.mxu2 }
 0x205   : > { %5486 = vrcp.f32 %v6647_v0  ;;  %v1522_v51 = vadd.f32 0.00028619796, %v1521_v3  ;;  %v4966_v53 = vclamps-f32 %v6632_v36, 1.0  ;;  %v1447_v15 = vmul.f32 %v1446_v56, %v6446_v49  ;;  %v978_v36 = vpop.f32.mrf.mxu1 }
 0x206   : > { %v1498_v59 = vmul.f32 %v1497_v35, %v6510_v58  ;;  %v6677_v61 = vmin.f32 %v1559_v34, 16.0  ;;  %v4967_v63 = vclamps-f32 %v6635_v1, 1.0  ;;  %v1390_v22 = vsel %vm6671_vm14, %v6555_v50, %v1386_v17 }
 0x207   : > { %v1394_v45 = vor.u32 1.1754944e-38, %v1393_v33  ;;  %v1409_v46 = vmul.f32 %v1408_v42, %v6416_v55  ;;  %v1356_v2 = vmul.f32 %v1355_v38, %v6590_v52  ;;  %v1433_v4 = vand.u32 2147483648, %v6539_v25 }
 0x208   : > { %9879 = vst [vmem:[#allocation32_spill] sm:$0xff] %v6677_v61  ;;  %v1485_v5 = vmul.f32 %v1484_v37, %v6510_v58  ;;  %v1537_v6 = vadd.f32 0.112945676, %v1536_v7  ;;  %vm1392_vm15 = vcmp.eq.f32.partialorder %v1391_v32, 8.507059e+37  ;;  %v1426_v9 = vadd.f32 %v6601_v24, %v1425_v48 }
 0x209   : > { %vm1428_vm0 = vweird.f32 %v6601_v24  ;;  %v1523_v1 = vmul.f32 %v1522_v51, %v6541_v29  ;;  %v1395_v13 = vsel %vm1392_vm15, %v1394_v45, %v1390_v22  ;;  %v1448_v50 = vadd.f32 0.18741608, %v1447_v15 }
 0x20a   : > { %v1499_v20 = vadd.f32 0.4994258, %v1498_v59  ;;  %v1561_v55 = vmul.f32 2.1237322e-06, %v6677_v61  ;;  %v1410_v3 = vadd.f32 1.1283791, %v1409_v46  ;;  %vm1427_vm1 = vweird.f32 %v6539_v25 }
 0x20b   : > { %v6691_v52 = vpop.eup %5486  ;;  %v1431_v16 = vand.u32 2147483647, %v6539_v25  ;;  %v979_v56 = vadd.f32 %v978_v36, %v6351_v12  ;;  %v4968_v35 = vclamps-f32 %v1356_v2, 1.0  ;;  %vm6696_vm2 = vmor %vm1427_vm1, %vm1428_vm0  ;;  %v1434_v27 = vor.u32 1.1754944e-38, %v1433_v4 }
 0x20c   : > { %v1486_v43 = vadd.f32 0.05243302, %v1485_v5  ;;  %v1538_v17 = vmul.f32 %v1537_v6, %v6541_v29  ;;  %v1396_v33 = vmul.f32 %v1395_v13, %v1371_v21  ;;  %v1430_v42 = vsel %vm6696_vm2, %v6601_v24, %v1426_v9  ;;  %v1076_v5 = vpop.f32.mrf.mxu3 }
 0x20d   : > { %v1524_v32 = vadd.f32 0.0036580483, %v1523_v1  ;;  %v6705_v37 = vadd.f32 %v1027_v30, %v6365_v18  ;;  %v1449_v25 = vmul.f32 %v1448_v50, %v6446_v49  ;;  %v1463_v7 = vmul.f32 %v6691_v52, %v6647_v0 }
 0x20e   : > { %v1500_v47 = vmul.f32 %v1499_v20, %v6510_v58  ;;  %v1562_v38 = vadd.f32 0.00028619796, %v1561_v55  ;;  %v3799_v48 = vadd.f32 1.0, %v4966_v53  ;;  %v3800_v51 = vadd.f32 1.0, %v4967_v63 }
 0x20f   : > { %vm1432_vm3 = vcmp.eq.f32.partialorder %v1431_v16, 8.507059e+37  ;;  %v6711_v21 = vmul.f32 0.70710677, %v979_v56  ;;  %v3801_v57 = vadd.f32 1.0, %v4968_v35  ;;  %v1487_v24 = vmul.f32 %v1486_v43, %v6510_v58  ;;  %v931_v35 = vpop.f32.mrf.mxu0 }
 0x210   : > { %v1435_v15 = vsel %vm1432_vm3, %v1434_v27, %v1430_v42  ;;  %v1539_v59 = vadd.f32 0.4994258, %v1538_v17  ;;  %v4969_v22 = vclamps-f32 %v1396_v33, 1.0  ;;  %v1411_v45 = vmul.f32 %v1410_v3, %v6403_v41  ;;  %v5256_v3 = vld [vmem:[%s6231_s27 + $0x88] sm:$0xff]  ;;  %v980_v17 = vpop.f32.mrf.mxu1 }
 0x211   : > { %v1525_v49 = vmul.f32 %v1524_v32, %v6541_v29  ;;  %v6717_v46 = vmul.f32 0.70710677, %v6705_v37  ;;  %v1450_v2 = vadd.f32 1.1283791, %v1449_v25  ;;  %v1464_v4 = vsub.f32 1.0, %v1463_v7  ;;  %4323 = vmatpush.bf16.msrb.mxu2 %v5256_v3  ;;  %v5240_v25 = vld [vmem:[%s6231_s27 + $0x8] sm:$0xff] }
 0x212   : > { %v6719_v53 = vadd.f32 1.0, %v1500_v47  ;;  %v1563_v63 = vmul.f32 %v1562_v38, %v6677_v61  ;;  %v6723_v6 = vmul.f32 %v3799_v48, %v6482_v39  ;;  %v6726_v36 = vmul.f32 %v3800_v51, %v6488_v44  ;;  %v5248_v7 = vld [vmem:[%s6231_s27 + $0x48] sm:$0xff]  ;;  %4225 = vmatpush.bf16.msrb.mxu0 %v5240_v25 }
 0x213   : > { %v1436_v41 = vmul.f32 %v1435_v15, %v1411_v45  ;;  %v1599_v9 = vmul.f32 %v6711_v21, %v6711_v21  ;;  %v6731_v1 = vmul.f32 %v3801_v57, %v6503_v26  ;;  %v1488_v13 = vadd.f32 0.18741608, %v1487_v24  ;;  %4274 = vmatpush.bf16.msrb.mxu1 %v5248_v7 }
 0x214   : > { %9882 = vst [vmem:[#allocation33_spill] sm:$0xff] %v6723_v6  ;;  %v6734_v50 = vmul.f32 0.5, %v6472_v31  ;;  %v1540_v20 = vmul.f32 %v1539_v59, %v6541_v29  ;;  %v3802_v55 = vadd.f32 1.0, %v4969_v22  ;;  %v1526_v30 = vadd.f32 0.05243302, %v1525_v49  ;;  %v1029_v22 = vpop.f32.mrf.mxu2 }
 0x215   : > { %9883 = vst [vmem:[#allocation34_spill] sm:$0xff] %v6726_v36  ;;  %v6738_v39 = vmul.f32 0.5, %v6605_v40  ;;  %v1639_v44 = vmul.f32 %v6717_v46, %v6717_v46  ;;  %v6744_v16 = vmul.f32 %v1450_v2, %v6431_v11  ;;  %v1465_v26 = vmul.f32 %v6691_v52, %v1464_v4 }
 0x216   : > { %9884 = vst [vmem:[#allocation35_spill] sm:$0xff] %v6731_v1  ;;  %5488 = vrcp.f32 %v6719_v53  ;;  %v1564_v31 = vadd.f32 0.0036580483, %v1563_v63  ;;  %v4970_v34 = vclamps-f32 %v1436_v41, 1.0  ;;  %v1471_v27 = vand.u32 2147483647, %v6647_v0  ;;  %v1078_v63 = vpop.f32.mrf.mxu3 }
 0x217   : > { %9885 = vst [vmem:[#allocation36_spill] sm:$0xff] %v6738_v39  ;;  %v1473_v40 = vand.u32 2147483648, %v6647_v0  ;;  %v6750_v43 = vmin.f32 %v1599_v9, 16.0  ;;  %v1489_v33 = vmul.f32 %v1488_v13, %v6510_v58  ;;  %v6753_v11 = vadd.f32 1.0, %v1540_v20 }
 0x218   : > { %v6755_v42 = vmul.f32 0.5, %v979_v56  ;;  %v1077_v32 = vadd.f32 %v1076_v5, %v6374_v23  ;;  %vm1467_vm4 = vweird.f32 %v6647_v0  ;;  %v1527_v47 = vmul.f32 %v1526_v30, %v6541_v29 }
 0x219   : > { %9886 = vst [vmem:[#allocation37_spill] sm:$0xff] %v6750_v43  ;;  %v6762_v38 = vmin.f32 %v1639_v44, 16.0  ;;  %v6765_v48 = vadd.f32 %v931_v35, %v6349_v10  ;;  %v1466_v51 = vadd.f32 %v6691_v52, %v1465_v26  ;;  %vm1468_vm5 = vweird.f32 %v6691_v52  ;;  %v5264_v44 = vld [vmem:[%s6231_s27 + $0xc8] sm:$0xff] }
 0x21a   : > { %9887 = vst [vmem:[#allocation38_spill] sm:$0xff] %v6755_v42  ;;  %v1565_v58 = vmul.f32 %v1564_v31, %v6677_v61  ;;  %v6771_v56 = vadd.f32 %v980_v17, %v6351_v12  ;;  %v3803_v57 = vadd.f32 1.0, %v4970_v34  ;;  %vm6773_vm6 = vcmp.eq.f32.partialorder %v1471_v27, 8.507059e+37  ;;  %vm6791_vm7 = vmor %vm1467_vm4, %vm1468_vm5  ;;  %v934_v17 = vpop.f32.mrf.mxu0  ;;  %4372 = vmatpush.bf16.msrb.mxu3 %v5264_v44 }
 0x21b   : > { %9888 = vst [vmem:[#allocation39_spill] sm:$0xff] %v6762_v38  ;;  %v1474_v24 = vor.u32 1.1754944e-38, %v1473_v40  ;;  %v1601_v59 = vmul.f32 2.1237322e-06, %v6750_v43  ;;  %v1490_v49 = vadd.f32 1.1283791, %v1489_v33  ;;  %5490 = vrcp.f32 %v6753_v11 }
 0x21c   : > { %v6778_v45 = vpop.eup %5488  ;;  %v1513_v2 = vand.u32 2147483648, %v6719_v53  ;;  %v6782_v4 = vmul.f32 0.70710677, %v1077_v32  ;;  %v6785_v5 = vmul.f32 %v3802_v55, %v6506_v54  ;;  %v1528_v9 = vadd.f32 0.18741608, %v1527_v47 }
 0x21d   : > { %v1641_v13 = vmul.f32 2.1237322e-06, %v6762_v38  ;;  %v6797_v20 = vmul.f32 0.70710677, %v6765_v48  ;;  %v1470_v30 = vsel %vm6791_vm7, %v6691_v52, %v1466_v51  ;;  %v1566_v54 = vadd.f32 0.05243302, %v1565_v58 }
 0x21e   : > { %9891 = vst [vmem:[#allocation40_spill] sm:$0xff] %v6785_v5  ;;  %v6803_v55 = vmul.f32 0.70710677, %v6771_v56  ;;  %v6806_v0 = vadd.f32 %v1029_v22, %v6365_v18  ;;  %v1503_v3 = vmul.f32 %v6778_v45, %v6719_v53  ;;  %v1602_v26 = vadd.f32 0.00028619796, %v1601_v59  ;;  %v983_v59 = vpop.f32.mrf.mxu1 }
 0x21f   : > { %v6812_v31 = vmul.f32 0.5, %v6705_v37  ;;  %v6815_v35 = vadd.f32 %v1078_v63, %v6374_v23  ;;  %v6818_v52 = vmul.f32 %v3803_v57, %v6513_v60  ;;  %v6821_v34 = vmul.f32 %v1490_v49, %v6467_v19 }
 0x220   : > { %v1511_v27 = vand.u32 2147483647, %v6719_v53  ;;  %v1679_v40 = vmul.f32 %v6782_v4, %v6782_v4  ;;  %v1475_v37 = vsel %vm6773_vm6, %v1474_v24, %v1470_v30  ;;  %v1529_v33 = vmul.f32 %v1528_v9, %v6541_v29  ;;  %v1032_v30 = vpop.f32.mrf.mxu2 }
 0x221   : > { %9894 = vst [vmem:[#allocation41_spill] sm:$0xff] %v6812_v31  ;;  %v1642_v25 = vadd.f32 0.00028619796, %v1641_v13  ;;  %v1719_v60 = vmul.f32 %v6797_v20, %v6797_v20  ;;  %v6831_v7 = vpop.eup %5490  ;;  %v6833_v19 = vor.u32 1.1754944e-38, %v1513_v2  ;;  %v1567_v47 = vmul.f32 %v1566_v54, %v6677_v61 }
 0x222   : > { %9895 = vst [vmem:[#allocation42_spill] sm:$0xff] %v6818_v52  ;;  %v1759_v51 = vmul.f32 %v6803_v55, %v6803_v55  ;;  %v6839_v58 = vmul.f32 0.70710677, %v6806_v0  ;;  %v1504_v57 = vsub.f32 1.0, %v1503_v3  ;;  %v1603_v15 = vmul.f32 %v1602_v26, %v6750_v43 }
 0x223   : > { %v6843_v29 = vmul.f32 0.70710677, %v6815_v35  ;;  %v6846_v24 = vadd.f32 %v934_v17, %v6349_v10  ;;  %v1476_v22 = vmul.f32 %v1475_v37, %v6744_v16  ;;  %vm1508_vm8 = vweird.f32 %v6778_v45 }
 0x224   : > { %v6850_v49 = vmul.f32 0.5, %v1077_v32  ;;  %v6852_v2 = vmin.f32 %v1679_v40, 16.0  ;;  %vm1507_vm9 = vweird.f32 %v6719_v53  ;;  %v1530_v63 = vadd.f32 1.1283791, %v1529_v33 }
 0x225   : > { %v1543_v41 = vmul.f32 %v6831_v7, %v6753_v11  ;;  %v1643_v9 = vmul.f32 %v1642_v25, %v6762_v38  ;;  %v6858_v13 = vmin.f32 %v1719_v60, 16.0  ;;  %v1568_v54 = vadd.f32 0.18741608, %v1567_v47  ;;  %vm6918_vm12 = vmor %vm1507_vm9, %vm1508_vm8 }
 0x226   : > { %9896 = vst [vmem:[#allocation43_spill] sm:$0xff] %v6850_v49  ;;  %v6860_v44 = vmin.f32 %v1759_v51, 16.0  ;;  %v1799_v16 = vmul.f32 %v6839_v58, %v6839_v58  ;;  %v6865_v32 = vadd.f32 %v983_v59, %v6351_v12  ;;  %v1505_v3 = vmul.f32 %v6778_v45, %v1504_v57  ;;  %v1081_v49 = vpop.f32.mrf.mxu3 }
 0x227   : > { %9897 = vst [vmem:[#allocation44_spill] sm:$0xff] %v6852_v2  ;;  %v1604_v26 = vadd.f32 0.0036580483, %v1603_v15  ;;  %v1839_v40 = vmul.f32 %v6843_v29, %v6843_v29  ;;  %v6871_v17 = vmul.f32 0.70710677, %v6846_v24  ;;  %v6876_v25 = vmul.f32 0.5, %v6765_v48 }
 0x228   : > { %9898 = vst [vmem:[#allocation45_spill] sm:$0xff] %v6858_v13  ;;  %v1551_v37 = vand.u32 2147483647, %v6753_v11  ;;  %v1681_v33 = vmul.f32 2.1237322e-06, %v6852_v2  ;;  %v6879_v60 = vadd.f32 %v1032_v30, %v6365_v18  ;;  %v4971_v47 = vclamps-f32 %v1476_v22, 1.0 }
 0x229   : > { %9899 = vst [vmem:[#allocation46_spill] sm:$0xff] %v6860_v44  ;;  %vm6881_vm10 = vcmp.eq.f32.partialorder %v1511_v27, 8.507059e+37  ;;  %v1544_v57 = vsub.f32 1.0, %v1543_v41  ;;  %v1644_v15 = vadd.f32 0.0036580483, %v1643_v9  ;;  %v6887_v31 = vmul.f32 %v1530_v63, %v6495_v14  ;;  %v5255_v27 = vld [vmem:[%s6231_s27 + $0x80] sm:$0xff] }
 0x22a   : > { %9900 = vst [vmem:[#allocation47_spill] sm:$0xff] %v6871_v17  ;;  %v1721_v59 = vmul.f32 2.1237322e-06, %v6858_v13  ;;  %v1761_v48 = vmul.f32 2.1237322e-06, %v6860_v44  ;;  %v6890_v42 = vmin.f32 %v1799_v16, 16.0  ;;  %v1506_v30 = vadd.f32 %v6778_v45, %v1505_v3  ;;  %4324 = vmatpush.bf16.msrb.mxu2 %v5255_v27 }
 0x22b   : > { %9901 = vst [vmem:[#allocation48_spill] sm:$0xff] %v6876_v25  ;;  %v6893_v22 = vmul.f32 0.70710677, %v6865_v32  ;;  %vm1547_vm11 = vweird.f32 %v6753_v11  ;;  %v1605_v41 = vmul.f32 %v1604_v26, %v6750_v43  ;;  %v6899_v9 = vmin.f32 %v1839_v40, 16.0  ;;  %v5239_v63 = vld [vmem:[%s6231_s27] sm:$0xff] }
 0x22c   : > { %9904 = vst [vmem:[#allocation49_spill] sm:$0xff] %v6890_v42  ;;  %v1879_v14 = vmul.f32 %v6871_v17, %v6871_v17  ;;  %v5247_v25 = vld [vmem:[%s6231_s27 + $0x40] sm:$0xff]  ;;  %v1553_v16 = vand.u32 2147483648, %v6753_v11  ;;  %v1682_v39 = vadd.f32 0.00028619796, %v1681_v33  ;;  %v6910_v1 = vadd.f32 %v1081_v49, %v6374_v23  ;;  %4226 = vmatpush.bf16.msrb.mxu0 %v5239_v63  ;;  %v985_v11 = vpop.f32.mrf.mxu1 }
 0x22d   : > { %9905 = vst [vmem:[#allocation50_spill] sm:$0xff] %v6893_v22  ;;  %v6907_v5 = vmul.f32 0.70710677, %v6879_v60  ;;  %v3804_v3 = vadd.f32 1.0, %v4971_v47  ;;  %v1545_v26 = vmul.f32 %v6831_v7, %v1544_v57  ;;  %v1645_v40 = vmul.f32 %v1644_v15, %v6762_v38  ;;  %4275 = vmatpush.bf16.msrb.mxu1 %v5247_v25 }
 0x22e   : > { %9906 = vst [vmem:[#allocation51_spill] sm:$0xff] %v6899_v9  ;;  %v1722_v36 = vadd.f32 0.00028619796, %v1721_v59  ;;  %v1569_v49 = vmul.f32 %v1568_v54, %v6677_v61  ;;  %v1762_v17 = vadd.f32 0.00028619796, %v1761_v48  ;;  %v1919_v57 = vmul.f32 %v6893_v22, %v6893_v22  ;;  %v936_v61 = vpop.f32.mrf.mxu0 }
 0x22f   : > { %9907 = vst [vmem:[#allocation52_spill] sm:$0xff] %v6907_v5  ;;  %v1801_v47 = vmul.f32 2.1237322e-06, %v6890_v42  ;;  %v1510_v25 = vsel %vm6918_vm12, %v6778_v45, %v1506_v30  ;;  %v1606_v15 = vadd.f32 0.05243302, %v1605_v41  ;;  %v6930_v59 = vmin.f32 %v1879_v14, 16.0 }
 0x230   : > { %v1841_v53 = vmul.f32 2.1237322e-06, %v6899_v9  ;;  %vm6932_vm13 = vcmp.eq.f32.partialorder %v1551_v37, 8.507059e+37  ;;  %v1683_v54 = vmul.f32 %v1682_v39, %v6852_v2  ;;  %v1959_v48 = vmul.f32 %v6907_v5, %v6907_v5  ;;  %v5263_v37 = vld [vmem:[%s6231_s27 + $0xc0] sm:$0xff] }
 0x231   : > { %9910 = vst [vmem:[#allocation53_spill] sm:$0xff] %v6930_v59  ;;  %v6940_v63 = vmul.f32 0.70710677, %v6910_v1  ;;  %v1546_v45 = vadd.f32 %v6831_v7, %v1545_v26  ;;  %vm1548_vm14 = vweird.f32 %v6831_v7  ;;  %v1646_v30 = vadd.f32 0.05243302, %v1645_v40  ;;  %4373 = vmatpush.bf16.msrb.mxu3 %v5263_v37 }
 0x232   : > { %v1723_v41 = vmul.f32 %v1722_v36, %v6858_v13  ;;  %v1515_v14 = vsel %vm6881_vm10, %v6833_v19, %v1510_v25  ;;  %v1763_v39 = vmul.f32 %v1762_v17, %v6860_v44  ;;  %v1802_v33 = vadd.f32 0.00028619796, %v1801_v47  ;;  %vm6959_vm15 = vmor %vm1547_vm11, %vm1548_vm14 }
 0x233   : > { %v6950_v5 = vmin.f32 %v1919_v57, 16.0  ;;  %v1554_v22 = vor.u32 1.1754944e-38, %v1553_v16  ;;  %v1607_v52 = vmul.f32 %v1606_v15, %v6750_v43  ;;  %v1842_v6 = vadd.f32 0.00028619796, %v1841_v53 }
 0x234   : > { %v1881_v26 = vmul.f32 2.1237322e-06, %v6930_v59  ;;  %v6955_v40 = vmul.f32 %v3804_v3, %v6516_v62  ;;  %v1684_v19 = vadd.f32 0.0036580483, %v1683_v54  ;;  %v6963_v17 = vmin.f32 %v1959_v48, 16.0 }
 0x235   : > { %9913 = vst [vmem:[#allocation54_spill] sm:$0xff] %v6950_v5  ;;  %v1999_v51 = vmul.f32 %v6940_v63, %v6940_v63  ;;  %v1516_v16 = vmul.f32 %v1515_v14, %v6821_v34  ;;  %v1550_v47 = vsel %vm6959_vm15, %v6831_v7, %v1546_v45  ;;  %v1647_v62 = vmul.f32 %v1646_v30, %v6762_v38 }
 0x236   : > { %9916 = vst [vmem:[#allocation55_spill] sm:$0xff] %v6963_v17  ;;  %v1724_v3 = vadd.f32 0.0036580483, %v1723_v41  ;;  %v1764_v57 = vadd.f32 0.0036580483, %v1763_v39  ;;  %v1803_v25 = vmul.f32 %v1802_v33, %v6890_v42  ;;  %v6975_v53 = vadd.f32 %v936_v61, %v6349_v10 }
 0x237   : > { %v1921_v15 = vmul.f32 2.1237322e-06, %v6950_v5  ;;  %v1570_v54 = vadd.f32 1.1283791, %v1569_v49  ;;  %v1608_v48 = vadd.f32 0.18741608, %v1607_v52  ;;  %v1843_v34 = vmul.f32 %v1842_v6, %v6899_v9 }
 0x238   : > { %v1882_v37 = vadd.f32 0.00028619796, %v1881_v26  ;;  %v1685_v14 = vmul.f32 %v1684_v19, %v6852_v2  ;;  %v6980_v7 = vmul.f32 0.5, %v6771_v56  ;;  %v1961_v45 = vmul.f32 2.1237322e-06, %v6963_v17  ;;  %v6992_v56 = vpop.f32.mrf.mxu0 }
 0x239   : > { %v6983_v30 = vmin.f32 %v1999_v51, 16.0  ;;  %v4972_v41 = vclamps-f32 %v1516_v16, 1.0  ;;  %v1555_v39 = vsel %vm6932_vm13, %v1554_v22, %v1550_v47  ;;  %v1648_v61 = vadd.f32 0.18741608, %v1647_v62 }
 0x23a   : > { %9917 = vst [vmem:[#allocation56_spill] sm:$0xff] %v6980_v7  ;;  %v1725_v49 = vmul.f32 %v1724_v3, %v6858_v13  ;;  %v1765_v52 = vmul.f32 %v1764_v57, %v6860_v44  ;;  %v1804_v6 = vadd.f32 0.0036580483, %v1803_v25  ;;  %v1922_v33 = vadd.f32 0.00028619796, %v1921_v15 }
 0x23b   : > { %9918 = vst [vmem:[#allocation57_spill] sm:$0xff] %v6983_v30  ;;  %v6990_v26 = vmul.f32 0.70710677, %v6975_v53  ;;  %v1609_v36 = vmul.f32 %v1608_v48, %v6750_v43  ;;  %v1844_v19 = vadd.f32 0.0036580483, %v1843_v34  ;;  %v1883_v51 = vmul.f32 %v1882_v37, %v6930_v59 }
 0x23c   : > { %v6997_v27 = vadd.f32 %v985_v11, %v6351_v12  ;;  %v7000_v22 = vmul.f32 %v1570_v54, %v6623_v28  ;;  %v1686_v16 = vadd.f32 0.05243302, %v1685_v14  ;;  %v1962_v47 = vadd.f32 0.00028619796, %v1961_v45 }
 0x23d   : > { %v2001_v62 = vmul.f32 2.1237322e-06, %v6983_v30  ;;  %v3805_v3 = vadd.f32 1.0, %v4972_v41  ;;  %v1556_v57 = vmul.f32 %v1555_v39, %v6887_v31  ;;  %v1649_v25 = vmul.f32 %v1648_v61, %v6762_v38  ;;  %v7013_v41 = vpop.f32.mrf.mxu1 }
 0x23e   : > { %9919 = vst [vmem:[#allocation58_spill] sm:$0xff] %v7000_v22  ;;  %v1726_v15 = vadd.f32 0.05243302, %v1725_v49  ;;  %v1766_v48 = vadd.f32 0.05243302, %v1765_v52  ;;  %v1805_v34 = vmul.f32 %v1804_v6, %v6890_v42  ;;  %v1923_v37 = vmul.f32 %v1922_v33, %v6950_v5  ;;  %v1034_v52 = vpop.f32.mrf.mxu2 }
 0x23f   : > { %v2039_v11 = vmul.f32 %v6990_v26, %v6990_v26  ;;  %v1610_v28 = vadd.f32 1.1283791, %v1609_v36  ;;  %v1845_v54 = vmul.f32 %v1844_v19, %v6899_v9  ;;  %v1884_v14 = vadd.f32 0.0036580483, %v1883_v51 }
 0x240   : > { %v7011_v45 = vmul.f32 0.70710677, %v6997_v27  ;;  %v1687_v31 = vmul.f32 %v1686_v16, %v6852_v2  ;;  %v7017_v39 = vmul.f32 0.5, %v6806_v0  ;;  %v1963_v61 = vmul.f32 %v1962_v47, %v6963_v17 }
 0x241   : > { %v2002_v49 = vadd.f32 0.00028619796, %v2001_v62  ;;  %v7021_v6 = vmul.f32 %v3805_v3, %v6581_v8  ;;  %v4973_v33 = vclamps-f32 %v1556_v57, 1.0  ;;  %v1650_v36 = vadd.f32 1.1283791, %v1649_v25 }
 0x242   : > { %9920 = vst [vmem:[#allocation59_spill] sm:$0xff] %v7017_v39  ;;  %v1727_v19 = vmul.f32 %v1726_v15, %v6858_v13  ;;  %v1767_v51 = vmul.f32 %v1766_v48, %v6860_v44  ;;  %v1806_v7 = vadd.f32 0.05243302, %v1805_v34  ;;  %v1924_v22 = vadd.f32 0.0036580483, %v1923_v37  ;;  %v7037_v15 = vpop.f32.mrf.mxu0 }
 0x243   : > { %v7025_v38 = vmin.f32 %v2039_v11, 16.0  ;;  %v1846_v16 = vadd.f32 0.05243302, %v1845_v54  ;;  %v1885_v0 = vmul.f32 %v1884_v14, %v6930_v59  ;;  %v2079_v47 = vmul.f32 %v7011_v45, %v7011_v45  ;;  %v1083_v54 = vpop.f32.mrf.mxu3 }
 0x244   : > { %v7031_v62 = vadd.f32 %v1034_v52, %v6365_v18  ;;  %v7034_v8 = vmul.f32 %v1610_v28, %v6711_v21  ;;  %v1688_v3 = vadd.f32 0.18741608, %v1687_v31  ;;  %v1964_v57 = vadd.f32 0.0036580483, %v1963_v61 }
 0x245   : > { %9921 = vst [vmem:[#allocation60_spill] sm:$0xff] %v7025_v38  ;;  %v2003_v25 = vmul.f32 %v2002_v49, %v6983_v30  ;;  %v3806_v48 = vadd.f32 1.0, %v4973_v33  ;;  %v7040_v34 = vmul.f32 %v1650_v36, %v6717_v46  ;;  %v1728_v37 = vadd.f32 0.18741608, %v1727_v19 }
 0x246   : > { %9922 = vst [vmem:[#allocation61_spill] sm:$0xff] %v7034_v8  ;;  %v7043_v11 = vmul.f32 0.5, %v6815_v35  ;;  %v1768_v14 = vadd.f32 0.18741608, %v1767_v51  ;;  %v1807_v52 = vmul.f32 %v1806_v7, %v6890_v42  ;;  %v1925_v21 = vmul.f32 %v1924_v22, %v6950_v5 }
 0x247   : > { %9923 = vst [vmem:[#allocation62_spill] sm:$0xff] %v7040_v34  ;;  %v2041_v28 = vmul.f32 2.1237322e-06, %v7025_v38  ;;  %v1847_v31 = vmul.f32 %v1846_v16, %v6899_v9  ;;  %v1886_v61 = vadd.f32 0.05243302, %v1885_v0  ;;  %v7049_v49 = vmin.f32 %v2079_v47, 16.0  ;;  %v7070_v0 = vpop.f32.mrf.mxu1 }
 0x248   : > { %9924 = vst [vmem:[#allocation63_spill] sm:$0xff] %v7043_v11  ;;  %v7052_v46 = vmul.f32 0.70710677, %v7031_v62  ;;  %v1689_v33 = vmul.f32 %v1688_v3, %v6852_v2  ;;  %v1965_v35 = vmul.f32 %v1964_v57, %v6963_v17  ;;  %v2004_v36 = vadd.f32 0.0036580483, %v2003_v25 }
 0x249   : > { %9925 = vst [vmem:[#allocation64_spill] sm:$0xff] %v7049_v49  ;;  %v7057_v19 = vadd.f32 %v1083_v54, %v6374_v23  ;;  %v7060_v7 = vmul.f32 %v3806_v48, %v6734_v50  ;;  %v1729_v22 = vmul.f32 %v1728_v37, %v6858_v13  ;;  %v7064_v51 = vmul.f32 0.5, %v6846_v24  ;;  %v1037_v37 = vpop.f32.mrf.mxu2 }
 0x24a   : > { %v7068_v16 = vadd.f32 %v6992_v56, %v6349_v10  ;;  %v1769_v47 = vmul.f32 %v1768_v14, %v6860_v44  ;;  %v1808_v3 = vadd.f32 0.18741608, %v1807_v52  ;;  %v1926_v57 = vadd.f32 0.05243302, %v1925_v21 }
 0x24b   : > { %9926 = vst [vmem:[#allocation65_spill] sm:$0xff] %v7064_v51  ;;  %v2042_v25 = vadd.f32 0.00028619796, %v2041_v28  ;;  %v1848_v54 = vadd.f32 0.18741608, %v1847_v31  ;;  %v1887_v50 = vmul.f32 %v1886_v61, %v6930_v59  ;;  %v2119_v24 = vmul.f32 %v7052_v46, %v7052_v46 }
 0x24c   : > { %v2081_v48 = vmul.f32 2.1237322e-06, %v7049_v49  ;;  %v1690_v51 = vadd.f32 1.1283791, %v1689_v33  ;;  %v1966_v11 = vadd.f32 0.05243302, %v1965_v35  ;;  %v2005_v56 = vmul.f32 %v2004_v36, %v6983_v30  ;;  %v944_v36 = vpop.f32.mrf.mxu0 }
 0x24d   : > { %v7079_v39 = vmul.f32 0.70710677, %v7057_v19  ;;  %v1730_v14 = vadd.f32 1.1283791, %v1729_v22  ;;  %v7082_v52 = vmul.f32 0.5, %v6865_v32  ;;  %v7085_v21 = vmul.f32 0.5, %v6879_v60 }
 0x24e   : > { %v7088_v28 = vmul.f32 0.70710677, %v7068_v16  ;;  %v1770_v31 = vadd.f32 1.1283791, %v1769_v47  ;;  %v1809_v61 = vmul.f32 %v1808_v3, %v6890_v42  ;;  %v1927_v33 = vmul.f32 %v1926_v57, %v6950_v5  ;;  %v9962_v42 = vld [vmem:[#allocation35_spill] sm:$0xff] }
 0x24f   : > { %9927 = vst [vmem:[#allocation66_spill] sm:$0xff] %v7082_v52  ;;  %v2043_v35 = vmul.f32 %v2042_v25, %v7025_v38  ;;  %v1849_v34 = vmul.f32 %v1848_v54, %v6899_v9  ;;  %v1888_v22 = vadd.f32 0.18741608, %v1887_v50  ;;  %v2082_v8 = vadd.f32 0.00028619796, %v2081_v48  ;;  %v1086_v54 = vpop.f32.mrf.mxu3 }
 0x250   : > { %9928 = vst [vmem:[#allocation67_spill] sm:$0xff] %v7085_v21  ;;  %v7094_v32 = vmin.f32 %v2119_v24, 16.0  ;;  %v7097_v60 = vmul.f32 %v1690_v51, %v6782_v4  ;;  %v1967_v21 = vmul.f32 %v1966_v11, %v6963_v17  ;;  %v2006_v52 = vadd.f32 0.05243302, %v2005_v56 }
 0x251   : > { %v2159_v47 = vmul.f32 %v7079_v39, %v7079_v39  ;;  %v7103_v3 = vmul.f32 %v1730_v14, %v6797_v20  ;;  %v7106_v57 = vmul.f32 0.5, %v6910_v1  ;;  %v2199_v25 = vmul.f32 %v7088_v28, %v7088_v28  ;;  %v993_v14 = vpop.f32.mrf.mxu1 }
 0x252   : > { %9929 = vst [vmem:[#allocation68_spill] sm:$0xff] %v7094_v32  ;;  %v7111_v50 = vadd.f32 %v944_v36, %v6349_v10  ;;  %v7114_v4 = vmul.f32 %v1770_v31, %v6803_v55  ;;  %v1810_v11 = vadd.f32 1.1283791, %v1809_v61  ;;  %v1928_v51 = vadd.f32 0.18741608, %v1927_v33 }
 0x253   : > { %9930 = vst [vmem:[#allocation69_spill] sm:$0xff] %v7097_v60  ;;  %v2044_v48 = vadd.f32 0.0036580483, %v2043_v35  ;;  %v1850_v24 = vadd.f32 1.1283791, %v1849_v34  ;;  %v1889_v20 = vmul.f32 %v1888_v22, %v6930_v59  ;;  %v2083_v56 = vmul.f32 %v2082_v8, %v7049_v49  ;;  %v7132_v8 = vpop.f32.mrf.mxu2 }
 0x254   : > { %9931 = vst [vmem:[#allocation70_spill] sm:$0xff] %v7103_v3  ;;  %v2121_v1 = vmul.f32 2.1237322e-06, %v7094_v32  ;;  %v2007_v60 = vmul.f32 %v2006_v52, %v6983_v30  ;;  %v7120_v9 = vmin.f32 %v2159_v47, 16.0  ;;  %v989_v55 = vadd.f32 %v7013_v41, %v6351_v12 }
 0x255   : > { %9932 = vst [vmem:[#allocation71_spill] sm:$0xff] %v7106_v57  ;;  %v1968_v57 = vadd.f32 0.18741608, %v1967_v21  ;;  %v7125_v31 = vmul.f32 0.5, %v6975_v53  ;;  %v7128_v34 = vmul.f32 0.5, %v6997_v27  ;;  %v7130_v61 = vmin.f32 %v2199_v25, 16.0 }
 0x256   : > { %9933 = vst [vmem:[#allocation72_spill] sm:$0xff] %v7114_v4  ;;  %v7135_v33 = vmul.f32 0.70710677, %v7111_v50  ;;  %v7138_v52 = vmul.f32 %v1810_v11, %v6839_v58  ;;  %v1929_v21 = vmul.f32 %v1928_v51, %v6950_v5  ;;  %v2045_v41 = vmul.f32 %v2044_v48, %v7025_v38 }
 0x257   : > { %9934 = vst [vmem:[#allocation73_spill] sm:$0xff] %v7120_v9  ;;  %v7143_v53 = vadd.f32 %v993_v14, %v6351_v12  ;;  %v7146_v27 = vmul.f32 %v1850_v24, %v6843_v29  ;;  %v1890_v35 = vadd.f32 1.1283791, %v1889_v20  ;;  %v2084_v36 = vadd.f32 0.0036580483, %v2083_v56  ;;  %v9943_v14 = vld [vmem:[#allocation47_spill] sm:$0xff] }
 0x258   : > { %9935 = vst [vmem:[#allocation74_spill] sm:$0xff] %v7125_v31  ;;  %v2122_v22 = vadd.f32 0.00028619796, %v2121_v1  ;;  %v1969_v47 = vmul.f32 %v1968_v57, %v6963_v17  ;;  %v2008_v25 = vadd.f32 0.18741608, %v2007_v60  ;;  %v7153_v11 = vmul.f32 0.5, %v7031_v62  ;;  %v7172_v17 = vpop.f32.mrf.mxu3 }
 0x259   : > { %9936 = vst [vmem:[#allocation75_spill] sm:$0xff] %v7128_v34  ;;  %v2161_v34 = vmul.f32 2.1237322e-06, %v7120_v9  ;;  %v7150_v58 = vmul.f32 0.70710677, %v989_v55  ;;  %v1038_v48 = vadd.f32 %v1037_v37, %v6365_v18  ;;  %v2519_v29 = vmul.f32 %v7135_v33, %v7135_v33  ;;  %v9941_v60 = vld [vmem:[#allocation33_spill] sm:$0xff] }
 0x25a   : > { %9937 = vst [vmem:[#allocation76_spill] sm:$0xff] %v7130_v61  ;;  %v2201_v51 = vmul.f32 2.1237322e-06, %v7130_v61  ;;  %v1930_v24 = vadd.f32 1.1283791, %v1929_v21  ;;  %v9942_v57 = vld [vmem:[#allocation42_spill] sm:$0xff]  ;;  %v7165_v31 = vmul.f32 %v1890_v35, %v9943_v14  ;;  %v2085_v62 = vmul.f32 %v2084_v36, %v7049_v49 }
 0x25b   : > { %9938 = vst [vmem:[#allocation77_spill] sm:$0xff] %v7138_v52  ;;  %v2046_v20 = vadd.f32 0.05243302, %v2045_v41  ;;  %v7160_v56 = vmul.f32 0.70710677, %v7143_v53  ;;  %v3927_v1 = vpack.c.bf16 %v9942_v57, %v9941_v60  ;;  %v7170_v37 = vmul.f32 0.5, %v7057_v19 }
 0x25c   : > { %9939 = vst [vmem:[#allocation78_spill] sm:$0xff] %v7146_v27  ;;  %v1970_v21 = vadd.f32 1.1283791, %v1969_v47  ;;  %v2009_v41 = vmul.f32 %v2008_v25, %v6983_v30  ;;  %v2162_v5 = vadd.f32 0.00028619796, %v2161_v34  ;;  %v2239_v59 = vmul.f32 %v7150_v58, %v7150_v58  ;;  %v9947_v19 = vld [vmem:[#allocation50_spill] sm:$0xff] }
 0x25d   : > { %9940 = vst [vmem:[#allocation79_spill] sm:$0xff] %v7153_v11  ;;  %v2123_v11 = vmul.f32 %v2122_v22, %v7094_v32  ;;  %4227 = vmatmul.bf16.vlgmr.msrb.gmra.mxu0 %v3927_v1  ;;  %v7178_v35 = vmul.f32 0.5, %v7068_v16  ;;  %v2202_v60 = vadd.f32 0.00028619796, %v2201_v51  ;;  %v7180_v36 = vmul.f32 0.70710677, %v1038_v48 }
 0x25e   : > { %9944 = vst [vmem:[#allocation33_spill] sm:$0xff] %v7165_v31  ;;  %v7182_v22 = vmin.f32 %v2519_v29, 16.0  ;;  %v7185_v57 = vmul.f32 %v1930_v24, %v9947_v19  ;;  %v2047_v47 = vmul.f32 %v2046_v20, %v7025_v38  ;;  %v2559_v34 = vmul.f32 %v7160_v56, %v7160_v56  ;;  %v9949_v25 = vld [vmem:[#allocation34_spill] sm:$0xff]  ;;  %v1042_v29 = vpop.f32.mrf.mxu2  ;;  %v9950_v24 = vld [vmem:[#allocation52_spill] sm:$0xff] }
 0x25f   : > { %9945 = vst [vmem:[#allocation42_spill] sm:$0xff] %v7170_v37  ;;  %v3928_v14 = vpack.c.bf16 %v6955_v40, %v9949_v25  ;;  %v2086_v1 = vadd.f32 0.05243302, %v2085_v62  ;;  %v2124_v37 = vadd.f32 0.0036580483, %v2123_v11  ;;  %v7193_v16 = vadd.f32 %v1086_v54, %v6374_v23 }
 0x260   : > { %9946 = vst [vmem:[#allocation47_spill] sm:$0xff] %v7178_v35  ;;  %v7197_v51 = vadd.f32 %v7037_v15, %v6349_v10  ;;  %v7200_v19 = vmul.f32 %v1970_v21, %v9950_v24  ;;  %v2010_v20 = vadd.f32 1.1283791, %v2009_v41  ;;  %v2163_v35 = vmul.f32 %v2162_v5, %v7120_v9 }
 0x261   : > { %9948 = vst [vmem:[#allocation50_spill] sm:$0xff] %v7185_v57  ;;  %v7203_v57 = vmin.f32 %v2239_v59, 16.0  ;;  %4276 = vmatmul.bf16.vlgmr.msrb.gmra.mxu1 %v3928_v14  ;;  %v2203_v40 = vmul.f32 %v2202_v60, %v7130_v61  ;;  %v7206_v11 = vmul.f32 0.5, %v989_v55  ;;  %v2279_v54 = vmul.f32 %v7180_v36, %v7180_v36 }
 0x262   : > { %9951 = vst [vmem:[#allocation34_spill] sm:$0xff] %v7200_v19  ;;  %v2532_v15 = vmul.f32 3.8918573e-05, %v7182_v22  ;;  %v2048_v62 = vadd.f32 0.18741608, %v2047_v47  ;;  %v7213_v21 = vadd.f32 %v7070_v0, %v6351_v12  ;;  %v7215_v41 = vmin.f32 %v2559_v34, 16.0 }
 0x263   : > { %9952 = vst [vmem:[#allocation52_spill] sm:$0xff] %v7203_v57  ;;  %v7218_v5 = vadd.f32 %v1042_v29, %v6365_v18  ;;  %v2087_v59 = vmul.f32 %v2086_v1, %v7049_v49  ;;  %v2125_v55 = vmul.f32 %v2124_v37, %v7094_v32  ;;  %v7223_v60 = vmul.f32 0.70710677, %v7193_v16 }
 0x264   : > { %9953 = vst [vmem:[#allocation80_spill] sm:$0xff] %v7206_v11  ;;  %v7226_v25 = vmul.f32 0.70710677, %v7197_v51  ;;  %v7229_v47 = vmul.f32 %v2010_v20, %v6940_v63  ;;  %v2164_v0 = vadd.f32 0.0036580483, %v2163_v35  ;;  %v7234_v14 = vadd.f32 %v7132_v8, %v6365_v18  ;;  %v1091_v11 = vpop.f32.mrf.mxu3 }
 0x265   : > { %v2241_v34 = vmul.f32 2.1237322e-06, %v7203_v57  ;;  %v2204_v29 = vadd.f32 0.0036580483, %v2203_v40  ;;  %v7236_v1 = vmul.f32 0.5, %v1038_v48  ;;  %v7238_v37 = vmin.f32 %v2279_v54, 16.0 }
 0x266   : > { %9954 = vst [vmem:[#allocation81_spill] sm:$0xff] %v7229_v47  ;;  %v2533_v24 = vadd.f32 0.001143296, %v2532_v15  ;;  %v2049_v19 = vmul.f32 %v2048_v62, %v7025_v38  ;;  %v7242_v30 = vmul.f32 0.70710677, %v7213_v21  ;;  %v2319_v48 = vmul.f32 %v7223_v60, %v7223_v60 }
 0x267   : > { %9955 = vst [vmem:[#allocation82_spill] sm:$0xff] %v7236_v1  ;;  %v2572_v63 = vmul.f32 3.8918573e-05, %v7215_v41  ;;  %v7246_v35 = vmul.f32 0.70710677, %v7218_v5  ;;  %v2359_v40 = vmul.f32 %v7226_v25, %v7226_v25  ;;  %v2165_v54 = vmul.f32 %v2164_v0, %v7120_v9 }
 0x268   : > { %9956 = vst [vmem:[#allocation83_spill] sm:$0xff] %v7238_v37  ;;  %v2088_v20 = vadd.f32 0.18741608, %v2087_v59  ;;  %v2126_v8 = vadd.f32 0.05243302, %v2125_v55  ;;  %v7259_v1 = vadd.f32 %v1091_v11, %v6374_v23  ;;  %v2205_v59 = vmul.f32 %v2204_v29, %v7130_v61 }
 0x269   : > { %9957 = vst [vmem:[#allocation84_spill] sm:$0xff] %v7246_v35  ;;  %v7254_v15 = vmul.f32 0.70710677, %v7234_v14  ;;  %v2599_v62 = vmul.f32 %v7246_v35, %v7246_v35  ;;  %v2242_v55 = vadd.f32 0.00028619796, %v2241_v34  ;;  %v2534_v31 = vmul.f32 %v2533_v24, %v7182_v22 }
 0x26a   : > { %v2281_v47 = vmul.f32 2.1237322e-06, %v7238_v37  ;;  %v2050_v38 = vadd.f32 1.1283791, %v2049_v19  ;;  %v2399_v0 = vmul.f32 %v7242_v30, %v7242_v30  ;;  %v2573_v27 = vadd.f32 0.001143296, %v2572_v63 }
 0x26b   : > { %v7266_v52 = vmin.f32 %v2599_v62, 16.0  ;;  %v2089_v4 = vmul.f32 %v2088_v20, %v7049_v49  ;;  %v7269_v2 = vmin.f32 %v2319_v48, 16.0  ;;  %v7271_v11 = vmin.f32 %v2359_v40, 16.0 }
 0x26c   : > { %v7275_v34 = vadd.f32 %v7172_v17, %v6374_v23  ;;  %v2127_v29 = vmul.f32 %v2126_v8, %v7094_v32  ;;  %v2166_v24 = vadd.f32 0.05243302, %v2165_v54  ;;  %v2439_v19 = vmul.f32 %v7254_v15, %v7254_v15 }
 0x26d   : > { %9958 = vst [vmem:[#allocation85_spill] sm:$0xff] %v7269_v2  ;;  %v7281_v63 = vmul.f32 0.70710677, %v7259_v1  ;;  %v2206_v62 = vadd.f32 0.05243302, %v2205_v59  ;;  %v2243_v20 = vmul.f32 %v2242_v55, %v7203_v57  ;;  %v7284_v40 = vmin.f32 %v2399_v0, 16.0 }
 0x26e   : > { %9959 = vst [vmem:[#allocation86_spill] sm:$0xff] %v7271_v11  ;;  %v2282_v48 = vadd.f32 0.00028619796, %v2281_v47  ;;  %v2535_v49 = vadd.f32 0.014752088, %v2534_v31  ;;  %v2574_v3 = vmul.f32 %v2573_v27, %v7215_v41  ;;  %v3929_v8 = vpack.c.bf16 %v7021_v6, %v9962_v42 }
 0x26f   : > { %9960 = vst [vmem:[#allocation87_spill] sm:$0xff] %v7281_v63  ;;  %v2612_v17 = vmul.f32 3.8918573e-05, %v7266_v52  ;;  %v7291_v54 = vmul.f32 %v2050_v38, %v6990_v26  ;;  %v2321_v44 = vmul.f32 2.1237322e-06, %v7269_v2  ;;  %v2167_v31 = vmul.f32 %v2166_v24, %v7120_v9 }
 0x270   : > { %9961 = vst [vmem:[#allocation88_spill] sm:$0xff] %v7284_v40  ;;  %v2361_v59 = vmul.f32 2.1237322e-06, %v7271_v11  ;;  %v7296_v55 = vmul.f32 0.70710677, %v7275_v34  ;;  %v7300_v47 = vmul.f32 0.5, %v7193_v16  ;;  %v2639_v42 = vmul.f32 %v7281_v63, %v7281_v63  ;;  %4325 = vmatmul.bf16.vlgmr.msrb.gmra.mxu2 %v3929_v8 }
 0x271   : > { %9963 = vst [vmem:[#allocation35_spill] sm:$0xff] %v7291_v54  ;;  %v7302_v27 = vmin.f32 %v2439_v19, 16.0  ;;  %v2090_v38 = vadd.f32 1.1283791, %v2089_v4  ;;  %v2128_v26 = vadd.f32 0.18741608, %v2127_v29  ;;  %v2536_v0 = vmul.f32 %v2535_v49, %v7182_v22 }
 0x272   : > { %9964 = vst [vmem:[#allocation89_spill] sm:$0xff] %v7300_v47  ;;  %v2244_v6 = vadd.f32 0.0036580483, %v2243_v20  ;;  %v2283_v54 = vmul.f32 %v2282_v48, %v7238_v37  ;;  %v2401_v43 = vmul.f32 2.1237322e-06, %v7284_v40  ;;  %v2207_v16 = vmul.f32 %v2206_v62, %v7130_v61  ;;  %v9966_v20 = vld [vmem:[#allocation40_spill] sm:$0xff] }
 0x273   : > { %9965 = vst [vmem:[#allocation90_spill] sm:$0xff] %v7302_v27  ;;  %v2575_v13 = vadd.f32 0.014752088, %v2574_v3  ;;  %v2613_v24 = vadd.f32 0.001143296, %v2612_v17  ;;  %v2479_v23 = vmul.f32 %v7296_v55, %v7296_v55  ;;  %v7313_v29 = vmin.f32 %v2639_v42, 16.0 }
 0x274   : > { %v2322_v47 = vadd.f32 0.00028619796, %v2321_v44  ;;  %v2362_v19 = vadd.f32 0.00028619796, %v2361_v59  ;;  %v2168_v63 = vadd.f32 0.18741608, %v2167_v31  ;;  %v3930_v49 = vpack.c.bf16 %v7060_v7, %v9966_v20 }
 0x275   : > { %v2441_v4 = vmul.f32 2.1237322e-06, %v7302_v27  ;;  %v2129_v48 = vmul.f32 %v2128_v26, %v7094_v32  ;;  %v2245_v3 = vmul.f32 %v2244_v6, %v7203_v57  ;;  %v7320_v17 = vmul.f32 0.5, %v7197_v51 }
 0x276   : > { %v2537_v44 = vadd.f32 0.112945676, %v2536_v0  ;;  %v2284_v62 = vadd.f32 0.0036580483, %v2283_v54  ;;  %v2402_v8 = vadd.f32 0.00028619796, %v2401_v43  ;;  %v2576_v59 = vmul.f32 %v2575_v13, %v7215_v41  ;;  %4374 = vmatmul.bf16.vlgmr.msrb.gmra.mxu3 %v3930_v49 }
 0x277   : > { %9967 = vst [vmem:[#allocation40_spill] sm:$0xff] %v7320_v17  ;;  %v2614_v31 = vmul.f32 %v2613_v24, %v7266_v52  ;;  %v2208_v42 = vadd.f32 0.18741608, %v2207_v16  ;;  %v2323_v35 = vmul.f32 %v2322_v47, %v7269_v2  ;;  %v2363_v7 = vmul.f32 %v2362_v19, %v7271_v11 }
 0x278   : > { %v7326_v20 = vmin.f32 %v2479_v23, 16.0  ;;  %v7329_v26 = vmul.f32 %v2090_v38, %v7011_v45  ;;  %v2169_v51 = vmul.f32 %v2168_v63, %v7120_v9  ;;  %v2442_v6 = vadd.f32 0.00028619796, %v2441_v4  ;;  %v946_v45 = vpop.f32.mrf.mxu0 }
 0x279   : > { %v2652_v43 = vmul.f32 3.8918573e-05, %v7313_v29  ;;  %v2130_v54 = vadd.f32 1.1283791, %v2129_v48  ;;  %v2246_v13 = vadd.f32 0.05243302, %v2245_v3  ;;  %v2538_v24 = vmul.f32 %v2537_v44, %v7182_v22 }
 0x27a   : > { %9968 = vst [vmem:[#allocation91_spill] sm:$0xff] %v7326_v20  ;;  %v7334_v0 = vmul.f32 0.5, %v7213_v21  ;;  %v2285_v47 = vmul.f32 %v2284_v62, %v7238_v37  ;;  %v2403_v23 = vmul.f32 %v2402_v8, %v7284_v40  ;;  %v2577_v16 = vadd.f32 0.112945676, %v2576_v59 }
 0x27b   : > { %9969 = vst [vmem:[#allocation92_spill] sm:$0xff] %v7329_v26  ;;  %v2615_v19 = vadd.f32 0.014752088, %v2614_v31  ;;  %v2209_v38 = vmul.f32 %v2208_v42, %v7130_v61  ;;  %v2324_v63 = vadd.f32 0.0036580483, %v2323_v35  ;;  %v2443_v3 = vmul.f32 %v2442_v6, %v7302_v27 }
 0x27c   : > { %9970 = vst [vmem:[#allocation93_spill] sm:$0xff] %v7334_v0  ;;  %v2364_v4 = vadd.f32 0.0036580483, %v2363_v7  ;;  %v2481_v49 = vmul.f32 2.1237322e-06, %v7326_v20  ;;  %v7344_v44 = vmul.f32 %v2130_v54, %v7052_v46  ;;  %v2247_v62 = vmul.f32 %v2246_v13, %v7203_v57 }
 0x27d   : > { %v2170_v48 = vadd.f32 1.1283791, %v2169_v51  ;;  %v2521_v21 = vmul.f32 2.1237322e-06, %v7182_v22  ;;  %v2653_v0 = vadd.f32 0.001143296, %v2652_v43  ;;  %v7348_v59 = vadd.f32 %v946_v45, %v6349_v10 }
 0x27e   : > { %9971 = vst [vmem:[#allocation94_spill] sm:$0xff] %v7344_v44  ;;  %v2539_v8 = vadd.f32 0.4994258, %v2538_v24  ;;  %v2286_v31 = vadd.f32 0.05243302, %v2285_v47  ;;  %v2578_v42 = vmul.f32 %v2577_v16, %v7215_v41  ;;  %v2616_v7 = vmul.f32 %v2615_v19, %v7266_v52 }
 0x27f   : > { %v2404_v35 = vadd.f32 0.0036580483, %v2403_v23  ;;  %v2210_v51 = vadd.f32 1.1283791, %v2209_v38  ;;  %v2325_v6 = vmul.f32 %v2324_v63, %v7269_v2  ;;  %v2365_v43 = vmul.f32 %v2364_v4, %v7271_v11 }
 0x280   : > { %v2482_v17 = vadd.f32 0.00028619796, %v2481_v49  ;;  %v7355_v46 = vmul.f32 %v2170_v48, %v7079_v39  ;;  %v2444_v54 = vadd.f32 0.0036580483, %v2443_v3  ;;  %v2522_v13 = vadd.f32 0.00028619796, %v2521_v21 }
 0x281   : > { %v2654_v24 = vmul.f32 %v2653_v0, %v7313_v29  ;;  %v2248_v45 = vadd.f32 0.18741608, %v2247_v62  ;;  %v2540_v47 = vmul.f32 %v2539_v8, %v7182_v22  ;;  %v2561_v23 = vmul.f32 2.1237322e-06, %v7215_v41 }
 0x282   : > { %9972 = vst [vmem:[#allocation95_spill] sm:$0xff] %v7355_v46  ;;  %v7361_v16 = vmul.f32 0.70710677, %v7348_v59  ;;  %v2287_v19 = vmul.f32 %v2286_v31, %v7238_v37  ;;  %v2405_v38 = vmul.f32 %v2404_v35, %v7284_v40  ;;  %v2579_v63 = vadd.f32 0.4994258, %v2578_v42 }
 0x283   : > { %v2617_v4 = vadd.f32 0.112945676, %v2616_v7  ;;  %v7366_v39 = vmul.f32 %v2210_v51, %v7088_v28  ;;  %v2326_v49 = vadd.f32 0.05243302, %v2325_v6  ;;  %v2366_v48 = vadd.f32 0.05243302, %v2365_v43  ;;  %v995_v6 = vpop.f32.mrf.mxu1 }
 0x284   : > { %v2483_v0 = vmul.f32 %v2482_v17, %v7326_v20  ;;  %v7370_v3 = vmul.f32 0.5, %v7234_v14  ;;  %v2445_v21 = vmul.f32 %v2444_v54, %v7302_v27  ;;  %v2523_v62 = vmul.f32 %v2522_v13, %v7182_v22 }
 0x285   : > { %9973 = vst [vmem:[#allocation96_spill] sm:$0xff] %v7366_v39  ;;  %v2655_v8 = vadd.f32 0.014752088, %v2654_v24  ;;  %v2249_v31 = vmul.f32 %v2248_v45, %v7203_v57  ;;  %v7375_v35 = vadd.f32 1.0, %v2540_v47  ;;  %v2562_v42 = vadd.f32 0.00028619796, %v2561_v23 }
 0x286   : > { %9974 = vst [vmem:[#allocation97_spill] sm:$0xff] %v7370_v3  ;;  %v2679_v28 = vmul.f32 %v7361_v16, %v7361_v16  ;;  %v2288_v7 = vadd.f32 0.18741608, %v2287_v19  ;;  %v2406_v51 = vadd.f32 0.05243302, %v2405_v38  ;;  %v2580_v17 = vmul.f32 %v2579_v63, %v7215_v41 }
 0x287   : > { %v2618_v14 = vmul.f32 %v2617_v4, %v7266_v52  ;;  %v2327_v43 = vmul.f32 %v2326_v49, %v7269_v2  ;;  %v2367_v54 = vmul.f32 %v2366_v48, %v7271_v11  ;;  %v7384_v13 = vmul.f32 0.5, %v7275_v34 }
 0x288   : > { %v2484_v24 = vadd.f32 0.0036580483, %v2483_v0  ;;  %v2446_v45 = vadd.f32 0.05243302, %v2445_v21  ;;  %v2524_v47 = vadd.f32 0.0036580483, %v2523_v62  ;;  %v2656_v19 = vmul.f32 %v2655_v8, %v7313_v29 }
 0x289   : > { %9975 = vst [vmem:[#allocation98_spill] sm:$0xff] %v7384_v13  ;;  %v2601_v23 = vmul.f32 2.1237322e-06, %v7266_v52  ;;  %5492 = vrcp.f32 %v7375_v35  ;;  %v2563_v38 = vmul.f32 %v2562_v42, %v7215_v41  ;;  %v7390_v63 = vmin.f32 %v2679_v28, 16.0 }
 0x28a   : > { %v7393_v4 = vadd.f32 %v995_v6, %v6351_v12  ;;  %v2289_v49 = vmul.f32 %v2288_v7, %v7238_v37  ;;  %v2407_v34 = vmul.f32 %v2406_v51, %v7284_v40  ;;  %v7397_v48 = vadd.f32 1.0, %v2580_v17 }
 0x28b   : > { %v2619_v0 = vadd.f32 0.4994258, %v2618_v14  ;;  %v2250_v21 = vadd.f32 1.1283791, %v2249_v31  ;;  %v2328_v62 = vadd.f32 0.18741608, %v2327_v43  ;;  %v2485_v8 = vmul.f32 %v2484_v24, %v7326_v20 }
 0x28c   : > { %v2368_v13 = vadd.f32 0.18741608, %v2367_v54  ;;  %v2447_v3 = vmul.f32 %v2446_v45, %v7302_v27  ;;  %v7402_v42 = vmul.f32 0.5, %v7111_v50  ;;  %v2602_v28 = vadd.f32 0.00028619796, %v2601_v23 }
 0x28d   : > { %v2657_v6 = vadd.f32 0.112945676, %v2656_v19  ;;  %v2525_v39 = vmul.f32 %v2524_v47, %v7182_v22  ;;  %v2564_v7 = vadd.f32 0.0036580483, %v2563_v38  ;;  %v2692_v51 = vmul.f32 3.8918573e-05, %v7390_v63 }
 0x28e   : > { %v7407_v17 = vmul.f32 0.70710677, %v7393_v4  ;;  %v2290_v31 = vadd.f32 1.1283791, %v2289_v49  ;;  %v2408_v14 = vadd.f32 0.18741608, %v2407_v34  ;;  %5494 = vrcp.f32 %v7397_v48 }
 0x28f   : > { %v2620_v43 = vmul.f32 %v2619_v0, %v7266_v52  ;;  %v7411_v54 = vpop.eup %5492  ;;  %v7414_v50 = vmul.f32 %v2250_v21, %v7150_v58  ;;  %v2329_v24 = vmul.f32 %v2328_v62, %v7269_v2  ;;  %v2369_v45 = vmul.f32 %v2368_v13, %v7271_v11 }
 0x290   : > { %v2486_v47 = vadd.f32 0.05243302, %v2485_v8  ;;  %v2448_v23 = vadd.f32 0.18741608, %v2447_v3  ;;  %v2603_v19 = vmul.f32 %v2602_v28, %v7266_v52  ;;  %v2641_v38 = vmul.f32 2.1237322e-06, %v7313_v29 }
 0x291   : > { %9976 = vst [vmem:[#allocation99_spill] sm:$0xff] %v7414_v50  ;;  %v2658_v49 = vmul.f32 %v2657_v6, %v7313_v29  ;;  %v2526_v34 = vadd.f32 0.05243302, %v2525_v39  ;;  %v2565_v0 = vmul.f32 %v2564_v7, %v7215_v41  ;;  %v2693_v37 = vadd.f32 0.001143296, %v2692_v51 }
 0x292   : > { %v2719_v58 = vmul.f32 %v7407_v17, %v7407_v17  ;;  %v7425_v21 = vmul.f32 %v2290_v31, %v7180_v36  ;;  %v2409_v13 = vmul.f32 %v2408_v14, %v7284_v40  ;;  %v2543_v3 = vmul.f32 %v7411_v54, %v7375_v35 }
 0x293   : > { %v7430_v62 = vadd.f32 1.0, %v2620_v43  ;;  %v2330_v8 = vadd.f32 1.1283791, %v2329_v24  ;;  %v2370_v28 = vadd.f32 1.1283791, %v2369_v45  ;;  %v2487_v39 = vmul.f32 %v2486_v47, %v7326_v20 }
 0x294   : > { %9977 = vst [vmem:[#allocation100_spill] sm:$0xff] %v7425_v21  ;;  %v7434_v6 = vmul.f32 0.5, %v7143_v53  ;;  %v7436_v7 = vpop.eup %5494  ;;  %v2449_v51 = vmul.f32 %v2448_v23, %v7302_v27  ;;  %v2604_v36 = vadd.f32 0.0036580483, %v2603_v19  ;;  %v2642_v31 = vadd.f32 0.00028619796, %v2641_v38 }
 0x295   : > { %v2659_v21 = vadd.f32 0.4994258, %v2658_v49  ;;  %v2527_v14 = vmul.f32 %v2526_v34, %v7182_v22  ;;  %v2566_v50 = vadd.f32 0.05243302, %v2565_v0  ;;  %v2694_v43 = vmul.f32 %v2693_v37, %v7390_v63 }
 0x296   : > { %v7441_v2 = vmin.f32 %v2719_v58, 16.0  ;;  %v2410_v24 = vadd.f32 1.1283791, %v2409_v13  ;;  %v2544_v45 = vsub.f32 1.0, %v2543_v3  ;;  %5496 = vrcp.f32 %v7430_v62  ;;  %v1044_v58 = vpop.f32.mrf.mxu2 }
 0x297   : > { %v2681_v53 = vmul.f32 2.1237322e-06, %v7390_v63  ;;  %v7446_v47 = vmul.f32 %v2330_v8, %v7223_v60  ;;  %v7449_v23 = vmul.f32 %v2370_v28, %v7226_v25  ;;  %v2488_v19 = vadd.f32 0.18741608, %v2487_v39 }
 0x298   : > { %v2583_v38 = vmul.f32 %v7436_v7, %v7397_v48  ;;  %v2450_v49 = vadd.f32 1.1283791, %v2449_v51  ;;  %v2605_v37 = vmul.f32 %v2604_v36, %v7266_v52  ;;  %v2643_v34 = vmul.f32 %v2642_v31, %v7313_v29 }
 0x299   : > { %9978 = vst [vmem:[#allocation101_spill] sm:$0xff] %v7446_v47  ;;  %v2660_v0 = vmul.f32 %v2659_v21, %v7313_v29  ;;  %v2528_v13 = vadd.f32 0.18741608, %v2527_v14  ;;  %v2567_v3 = vmul.f32 %v2566_v50, %v7215_v41  ;;  %v2695_v60 = vadd.f32 0.014752088, %v2694_v43 }
 0x29a   : > { %9979 = vst [vmem:[#allocation102_spill] sm:$0xff] %v7449_v23  ;;  %v2732_v8 = vmul.f32 3.8918573e-05, %v7441_v2  ;;  %v7459_v25 = vmul.f32 %v2410_v24, %v7242_v30  ;;  %v2545_v28 = vmul.f32 %v7411_v54, %v2544_v45  ;;  %v7463_v39 = vmul.f32 0.5, %v7218_v5 }
 0x29b   : > { %v2682_v51 = vadd.f32 0.00028619796, %v2681_v53  ;;  %v2489_v36 = vmul.f32 %v2488_v19, %v7326_v20  ;;  %v2584_v31 = vsub.f32 1.0, %v2583_v38  ;;  %v7467_v21 = vmul.f32 0.5, %v7259_v1 }
 0x29c   : > { %9980 = vst [vmem:[#allocation103_spill] sm:$0xff] %v7459_v25  ;;  %v7470_v50 = vadd.f32 %v1044_v58, %v6365_v18  ;;  %v7472_v14 = vpop.eup %5496  ;;  %v7475_v30 = vmul.f32 %v2450_v49, %v7254_v15  ;;  %v2606_v43 = vadd.f32 0.05243302, %v2605_v37  ;;  %v2644_v24 = vadd.f32 0.0036580483, %v2643_v34 }
 0x29d   : > { %v7477_v45 = vadd.f32 1.0, %v2660_v0  ;;  %v2529_v5 = vmul.f32 %v2528_v13, %v7182_v22  ;;  %v2568_v53 = vadd.f32 0.18741608, %v2567_v3  ;;  %v2696_v19 = vmul.f32 %v2695_v60, %v7390_v63 }
 0x29e   : > { %9981 = vst [vmem:[#allocation104_spill] sm:$0xff] %v7475_v30  ;;  %v2733_v38 = vadd.f32 0.001143296, %v2732_v8  ;;  %v2546_v1 = vadd.f32 %v7411_v54, %v2545_v28  ;;  %vm2548_vm0 = vweird.f32 %v7411_v54  ;;  %v2551_v58 = vand.u32 2147483647, %v7375_v35 }
 0x29f   : > { %v2683_v47 = vmul.f32 %v2682_v51, %v7390_v63  ;;  %vm2547_vm1 = vweird.f32 %v7375_v35  ;;  %v2585_v15 = vmul.f32 %v7436_v7, %v2584_v31  ;;  %v2623_v49 = vmul.f32 %v7472_v14, %v7430_v62 }
 0x2a0   : > { %v7490_v22 = vmul.f32 0.70710677, %v7470_v50  ;;  %v2553_v37 = vand.u32 2147483648, %v7375_v35  ;;  %v2607_v34 = vmul.f32 %v2606_v43, %v7266_v52  ;;  %v2645_v0 = vmul.f32 %v2644_v24, %v7313_v29  ;;  %vm7496_vm2 = vmor %vm2547_vm1, %vm2548_vm0 }
 0x2a1   : > { %5498 = vrcp.f32 %v7477_v45  ;;  %v2530_v13 = vadd.f32 1.1283791, %v2529_v5  ;;  %v2569_v60 = vmul.f32 %v2568_v53, %v7215_v41  ;;  %v2697_v8 = vadd.f32 0.112945676, %v2696_v19 }
 0x2a2   : > { %v2734_v28 = vmul.f32 %v2733_v38, %v7441_v2  ;;  %v2550_v35 = vsel %vm7496_vm2, %v7411_v54, %v2546_v1  ;;  %vm7505_vm3 = vcmp.eq.f32.partialorder %v2551_v58, 8.507059e+37  ;;  %vm2588_vm4 = vweird.f32 %v7436_v7 }
 0x2a3   : > { %v2684_v31 = vadd.f32 0.0036580483, %v2683_v47  ;;  %v2586_v43 = vadd.f32 %v7436_v7, %v2585_v15  ;;  %v2624_v24 = vsub.f32 1.0, %v2623_v49  ;;  %v2721_v5 = vmul.f32 2.1237322e-06, %v7441_v2 }
 0x2a4   : > { %v2759_v41 = vmul.f32 %v7490_v22, %v7490_v22  ;;  %v2554_v53 = vor.u32 1.1754944e-38, %v2553_v37  ;;  %v2593_v19 = vand.u32 2147483648, %v7397_v48  ;;  %v2608_v38 = vadd.f32 0.18741608, %v2607_v34 }
 0x2a5   : > { %v2646_v54 = vadd.f32 0.05243302, %v2645_v0  ;;  %vm2587_vm5 = vweird.f32 %v7397_v48  ;;  %v2591_v1 = vand.u32 2147483647, %v7397_v48  ;;  %v2698_v58 = vmul.f32 %v2697_v8, %v7390_v63 }
 0x2a6   : > { %v2735_v47 = vadd.f32 0.014752088, %v2734_v28  ;;  %v2490_v15 = vadd.f32 1.1283791, %v2489_v36  ;;  %v2555_v49 = vsel %vm7505_vm3, %v2554_v53, %v2550_v35  ;;  %v2570_v30 = vadd.f32 1.1283791, %v2569_v60  ;;  %vm7524_vm6 = vmor %vm2587_vm5, %vm2588_vm4 }
 0x2a7   : > { %v7518_v3 = vpop.eup %5498  ;;  %v2685_v34 = vmul.f32 %v2684_v31, %v7390_v63  ;;  %v2590_v48 = vsel %vm7524_vm6, %v7436_v7, %v2586_v43  ;;  %v2625_v0 = vmul.f32 %v7472_v14, %v2624_v24  ;;  %v2722_v8 = vadd.f32 0.00028619796, %v2721_v5 }
 0x2a8   : > { %v7533_v36 = vmin.f32 %v2759_v41, 16.0  ;;  %v2531_v28 = vmul.f32 %v2530_v13, %v7135_v33  ;;  %v2594_v60 = vor.u32 1.1754944e-38, %v2593_v19  ;;  %v2609_v35 = vmul.f32 %v2608_v38, %v7266_v52 }
 0x2a9   : > { %v2647_v51 = vmul.f32 %v2646_v54, %v7313_v29  ;;  %vm2592_vm7 = vcmp.eq.f32.partialorder %v2591_v1, 8.507059e+37  ;;  %v2663_v31 = vmul.f32 %v7518_v3, %v7477_v45  ;;  %v2699_v53 = vadd.f32 0.4994258, %v2698_v58 }
 0x2aa   : > { %v2736_v37 = vmul.f32 %v2735_v47, %v7441_v2  ;;  %v2556_v7 = vmul.f32 %v2555_v49, %v2531_v28  ;;  %v2571_v43 = vmul.f32 %v2570_v30, %v7160_v56  ;;  %v2595_v24 = vsel %vm2592_vm7, %v2594_v60, %v2590_v48  ;;  %v9991_v60 = vld [vmem:[#allocation84_spill] sm:$0xff] }
 0x2ab   : > { %v2686_v5 = vadd.f32 0.05243302, %v2685_v34  ;;  %v2626_v41 = vadd.f32 %v7472_v14, %v2625_v0  ;;  %vm2628_vm8 = vweird.f32 %v7472_v14  ;;  %v2723_v33 = vmul.f32 %v2722_v8, %v7441_v2  ;;  %v949_v34 = vpop.f32.mrf.mxu0 }
 0x2ac   : > { %v2761_v52 = vmul.f32 2.1237322e-06, %v7533_v36  ;;  %v2610_v13 = vadd.f32 1.1283791, %v2609_v35  ;;  %vm2627_vm9 = vweird.f32 %v7430_v62  ;;  %v2633_v19 = vand.u32 2147483648, %v7430_v62 }
 0x2ad   : > { %v2648_v38 = vadd.f32 0.18741608, %v2647_v51  ;;  %v2631_v54 = vand.u32 2147483647, %v7430_v62  ;;  %v2664_v1 = vsub.f32 1.0, %v2663_v31  ;;  %v2700_v56 = vmul.f32 %v2699_v53, %v7390_v63  ;;  %vm7553_vm10 = vmor %vm2627_vm9, %vm2628_vm8 }
 0x2ae   : > { %v2737_v30 = vadd.f32 0.112945676, %v2736_v37  ;;  %v7551_v58 = vmul.f32 %v2490_v15, %v7296_v55  ;;  %v4998_v47 = vclamps-f32 %v2556_v7, 1.0  ;;  %v2596_v49 = vmul.f32 %v2595_v24, %v2571_v43 }
 0x2af   : > { %v2687_v48 = vmul.f32 %v2686_v5, %v7390_v63  ;;  %v2630_v0 = vsel %vm7553_vm10, %v7472_v14, %v2626_v41  ;;  %v2724_v62 = vadd.f32 0.0036580483, %v2723_v33  ;;  %v2762_v8 = vadd.f32 0.00028619796, %v2761_v52  ;;  %v1093_v14 = vpop.f32.mrf.mxu3  ;;  %v9992_v5 = vld [vmem:[#allocation32_spill] sm:$0xff] }
 0x2b0   : > { %9988 = vst [vmem:[#allocation105_spill] sm:$0xff] %v7551_v58  ;;  %v2772_v28 = vmul.f32 3.8918573e-05, %v7533_v36  ;;  %v2611_v35 = vmul.f32 %v2610_v13, %v9991_v60  ;;  %v2634_v55 = vor.u32 1.1754944e-38, %v2633_v19  ;;  %v2649_v15 = vmul.f32 %v2648_v38, %v7313_v29  ;;  %v9993_v19 = vld [vmem:[#allocation31_spill] sm:$0xff] }
 0x2b1   : > { %v7565_v51 = vmul.f32 0.5, %v7348_v59  ;;  %vm2632_vm11 = vcmp.eq.f32.partialorder %v2631_v54, 8.507059e+37  ;;  %v2665_v31 = vmul.f32 %v7518_v3, %v2664_v1  ;;  %v7568_v53 = vadd.f32 1.0, %v2700_v56 }
 0x2b2   : > { %v2738_v37 = vmul.f32 %v2737_v30, %v7441_v2  ;;  %v3831_v7 = vadd.f32 1.0, %v4998_v47  ;;  %v4999_v43 = vclamps-f32 %v2596_v49, 1.0  ;;  %v2635_v24 = vsel %vm2632_vm11, %v2634_v55, %v2630_v0 }
 0x2b3   : > { %v1572_v41 = vmul.f32 3.8918573e-05, %v9992_v5  ;;  %v2688_v33 = vadd.f32 0.18741608, %v2687_v48  ;;  %v2725_v52 = vmul.f32 %v2724_v62, %v7441_v2  ;;  %v2763_v29 = vmul.f32 %v2762_v8, %v7533_v36 }
 0x2b4   : > { %v2773_v59 = vadd.f32 0.001143296, %v2772_v28  ;;  %v2650_v13 = vadd.f32 1.1283791, %v2649_v15  ;;  %vm2667_vm12 = vweird.f32 %v7477_v45  ;;  %vm2668_vm13 = vweird.f32 %v7518_v3 }
 0x2b5   : > { %v1094_v38 = vadd.f32 %v1093_v14, %v9993_v19  ;;  %v2636_v54 = vmul.f32 %v2635_v24, %v2611_v35  ;;  %v2666_v1 = vadd.f32 %v7518_v3, %v2665_v31  ;;  %5500 = vrcp.f32 %v7568_v53  ;;  %v9995_v35 = vld [vmem:[#allocation87_spill] sm:$0xff]  ;;  %vm7591_vm14 = vmor %vm2667_vm12, %vm2668_vm13 }
 0x2b6   : > { %v2739_v56 = vadd.f32 0.4994258, %v2738_v37  ;;  %v3832_v30 = vadd.f32 1.0, %v4999_v43  ;;  %v2671_v47 = vand.u32 2147483647, %v7477_v45  ;;  %v2673_v49 = vand.u32 2147483648, %v7477_v45 }
 0x2b7   : > { %v1573_v48 = vadd.f32 0.001143296, %v1572_v41  ;;  %v2689_v0 = vmul.f32 %v2688_v33, %v7390_v63  ;;  %v2726_v62 = vadd.f32 0.05243302, %v2725_v52  ;;  %v2764_v8 = vadd.f32 0.0036580483, %v2763_v29 }
 0x2b8   : > { %v2774_v28 = vmul.f32 %v2773_v59, %v7533_v36  ;;  %v7584_v60 = vmul.f32 %v3831_v7, %v7402_v42  ;;  %v2651_v55 = vmul.f32 %v2650_v13, %v9995_v35  ;;  %v7596_v31 = vmul.f32 0.5, %v7393_v4 }
 0x2b9   : > { %v7598_v63 = vmul.f32 0.70710677, %v1094_v38  ;;  %v5000_v37 = vclamps-f32 %v2636_v54, 1.0  ;;  %v2670_v42 = vsel %vm7591_vm14, %v7518_v3, %v2666_v1  ;;  %v2740_v14 = vmul.f32 %v2739_v56, %v7441_v2  ;;  %v9999_v54 = vld [vmem:[#allocation45_spill] sm:$0xff] }
 0x2ba   : > { %9994 = vst [vmem:[#allocation84_spill] sm:$0xff] %v7584_v60  ;;  %v7605_v7 = vadd.f32 %v949_v34, %v6349_v10  ;;  %v7608_v45 = vmul.f32 %v3832_v30, %v7434_v6  ;;  %vm2672_vm15 = vcmp.eq.f32.partialorder %v2671_v47, 8.507059e+37  ;;  %v2674_v43 = vor.u32 1.1754944e-38, %v2673_v49 }
 0x2bb   : > { %v1574_v4 = vmul.f32 %v1573_v48, %v9992_v5  ;;  %v7611_v24 = vpop.eup %5500  ;;  %v2690_v41 = vadd.f32 1.1283791, %v2689_v0  ;;  %v2727_v33 = vmul.f32 %v2726_v62, %v7441_v2  ;;  %v2765_v52 = vmul.f32 %v2764_v8, %v7533_v36 }
 0x2bc   : > { %9998 = vst [vmem:[#allocation32_spill] sm:$0xff] %v7608_v45  ;;  %v2775_v3 = vadd.f32 0.014752088, %v2774_v28  ;;  %v2675_v29 = vsel %vm2672_vm15, %v2674_v43, %v2670_v42  ;;  %v2799_v59 = vmul.f32 %v7598_v63, %v7598_v63  ;;  %v1732_v6 = vmul.f32 3.8918573e-05, %v9999_v54 }
 0x2bd   : > { %v1575_v13 = vadd.f32 0.014752088, %v1574_v4  ;;  %v3833_v1 = vadd.f32 1.0, %v5000_v37  ;;  %v7618_v56 = vadd.f32 1.0, %v2740_v14  ;;  %v7621_v30 = vmul.f32 0.5, %v7470_v50 }
 0x2be   : > { %v7624_v47 = vmul.f32 0.70710677, %v7605_v7  ;;  %v2703_v49 = vmul.f32 %v7611_v24, %v7568_v53  ;;  %v7628_v34 = vmul.f32 0.5, %v1094_v38  ;;  %v1733_v0 = vadd.f32 0.001143296, %v1732_v6 }
 0x2bf   : > { %v1576_v48 = vmul.f32 %v1575_v13, %v9992_v5  ;;  %v2676_v62 = vmul.f32 %v2675_v29, %v2651_v55  ;;  %v7632_v8 = vmul.f32 %v2690_v41, %v7361_v16  ;;  %v2766_v28 = vadd.f32 0.05243302, %v2765_v52  ;;  %v10001_v55 = vld [vmem:[#allocation37_spill] sm:$0xff] }
 0x2c0   : > { %v2776_v35 = vmul.f32 %v2775_v3, %v7533_v36  ;;  %v2728_v50 = vadd.f32 0.18741608, %v2727_v33  ;;  %v7635_v15 = vmin.f32 %v2799_v59, 16.0  ;;  %v1734_v42 = vmul.f32 %v1733_v0, %v9999_v54 }
 0x2c1   : > { %v1577_v37 = vadd.f32 0.112945676, %v1576_v48  ;;  %v7639_v14 = vmul.f32 %v3833_v1, %v7463_v39  ;;  %5502 = vrcp.f32 %v7618_v56  ;;  %v2839_v38 = vmul.f32 %v7624_v47, %v7624_v47  ;;  %v10002_v1 = vld [vmem:[#allocation46_spill] sm:$0xff] }
 0x2c2   : > { %v1612_v16 = vmul.f32 3.8918573e-05, %v10001_v55  ;;  %v2704_v43 = vsub.f32 1.0, %v2703_v49  ;;  %v2711_v4 = vand.u32 2147483647, %v7568_v53  ;;  %v2713_v41 = vand.u32 2147483648, %v7568_v53 }
 0x2c3   : > { %10000 = vst [vmem:[#allocation31_spill] sm:$0xff] %v7639_v14  ;;  %v1578_v33 = vmul.f32 %v1577_v37, %v9992_v5  ;;  %v5001_v52 = vclamps-f32 %v2676_v62, 1.0  ;;  %v2767_v3 = vmul.f32 %v2766_v28, %v7533_v36  ;;  %v2777_v29 = vadd.f32 0.112945676, %v2776_v35 }
 0x2c4   : > { %v1735_v39 = vadd.f32 0.014752088, %v1734_v42  ;;  %v2729_v59 = vmul.f32 %v2728_v50, %v7441_v2  ;;  %v2801_v13 = vmul.f32 2.1237322e-06, %v7635_v15  ;;  %v1772_v48 = vmul.f32 3.8918573e-05, %v10002_v1 }
 0x2c5   : > { %v1579_v6 = vadd.f32 0.4994258, %v1578_v33  ;;  %vm2707_vm0 = vweird.f32 %v7568_v53  ;;  %v7653_v49 = vmin.f32 %v2839_v38, 16.0  ;;  %v1613_v58 = vadd.f32 0.001143296, %v1612_v16 }
 0x2c6   : > { %v1736_v0 = vmul.f32 %v1735_v39, %v9999_v54  ;;  %v2705_v62 = vmul.f32 %v7611_v24, %v2704_v43  ;;  %v2714_v37 = vor.u32 1.1754944e-38, %v2713_v41  ;;  %v2812_v28 = vmul.f32 3.8918573e-05, %v7635_v15 }
 0x2c7   : > { %v1580_v35 = vmul.f32 %v1579_v6, %v9992_v5  ;;  %v7659_v2 = vpop.eup %5502  ;;  %v3834_v50 = vadd.f32 1.0, %v5001_v52  ;;  %v2768_v42 = vadd.f32 0.18741608, %v2767_v3  ;;  %v1614_v14 = vmul.f32 %v1613_v58, %v10001_v55 }
 0x2c8   : > { %v1737_v33 = vadd.f32 0.112945676, %v1736_v0  ;;  %vm7662_vm1 = vcmp.eq.f32.partialorder %v2711_v4, 8.507059e+37  ;;  %v2730_v39 = vadd.f32 1.1283791, %v2729_v59  ;;  %v2778_v16 = vmul.f32 %v2777_v29, %v7533_v36  ;;  %v998_v0 = vpop.f32.mrf.mxu1 }
 0x2c9   : > { %v2802_v43 = vadd.f32 0.00028619796, %v2801_v13  ;;  %v1773_v41 = vadd.f32 0.001143296, %v1772_v48  ;;  %v2753_v45 = vand.u32 2147483648, %v7618_v56  ;;  %v7669_v5 = vmul.f32 0.5, %v7605_v7 }
 0x2ca   : > { %v2841_v52 = vmul.f32 2.1237322e-06, %v7653_v49  ;;  %v7672_v3 = vadd.f32 1.0, %v1580_v35  ;;  %v2706_v58 = vadd.f32 %v7611_v24, %v2705_v62  ;;  %vm2708_vm2 = vweird.f32 %v7611_v24  ;;  %v10005_v62 = vld [vmem:[#allocation39_spill] sm:$0xff] }
 0x2cb   : > { %v2743_v4 = vmul.f32 %v7659_v2, %v7618_v56  ;;  %v2813_v59 = vadd.f32 0.001143296, %v2812_v28  ;;  %v2769_v29 = vmul.f32 %v2768_v42, %v7533_v36  ;;  %v1738_v13 = vmul.f32 %v1737_v33, %v9999_v54  ;;  %vm7689_vm3 = vmor %vm2707_vm0, %vm2708_vm2 }
 0x2cc   : > { %5504 = vrcp.f32 %v7672_v3  ;;  %v1615_v7 = vadd.f32 0.014752088, %v1614_v14  ;;  %v2779_v6 = vadd.f32 0.4994258, %v2778_v16  ;;  %v2803_v48 = vmul.f32 %v2802_v43, %v7635_v15 }
 0x2cd   : > { %v1774_v35 = vmul.f32 %v1773_v41, %v10002_v1  ;;  %v1652_v60 = vmul.f32 3.8918573e-05, %v10005_v62  ;;  %v7685_v20 = vmul.f32 %v3834_v50, %v7467_v21  ;;  %v7694_v42 = vmul.f32 %v2730_v39, %v7407_v17 }
 0x2ce   : > { %v2751_v14 = vand.u32 2147483647, %v7618_v56  ;;  %v2842_v33 = vadd.f32 0.00028619796, %v2841_v52  ;;  %v2710_v16 = vsel %vm7689_vm3, %v7611_v24, %v2706_v58  ;;  %v2744_v43 = vsub.f32 1.0, %v2743_v4 }
 0x2cf   : > { %10006 = vst [vmem:[#allocation87_spill] sm:$0xff] %v7685_v20  ;;  %v7700_v41 = vor.u32 1.1754944e-38, %v2753_v45  ;;  %v2814_v21 = vmul.f32 %v2813_v59, %v7635_v15  ;;  %v2770_v53 = vadd.f32 1.1283791, %v2769_v29  ;;  %v7704_v50 = vadd.f32 %v998_v0, %v6351_v12 }
 0x2d0   : > { %v1739_v20 = vadd.f32 0.4994258, %v1738_v13  ;;  %v1616_v17 = vmul.f32 %v1615_v7, %v10001_v55  ;;  %v2780_v39 = vmul.f32 %v2779_v6, %v7533_v36  ;;  %v2804_v25 = vadd.f32 0.0036580483, %v2803_v48 }
 0x2d1   : > { %v1775_v52 = vadd.f32 0.014752088, %v1774_v35  ;;  %v1653_v23 = vadd.f32 0.001143296, %v1652_v60  ;;  %v2715_v24 = vsel %vm7662_vm1, %v2714_v37, %v2710_v16  ;;  %vm2748_vm4 = vweird.f32 %v7659_v2 }
 0x2d2   : > { %v5505_v27 = vpop.eup %5504  ;;  %v2843_v45 = vmul.f32 %v2842_v33, %v7653_v49  ;;  %v1740_v58 = vmul.f32 %v1739_v20, %v9999_v54  ;;  %v1617_v4 = vadd.f32 0.112945676, %v1616_v17  ;;  %v2745_v59 = vmul.f32 %v7659_v2, %v2744_v43 }
 0x2d3   : > { %v2815_v29 = vadd.f32 0.014752088, %v2814_v21  ;;  %v2852_v13 = vmul.f32 3.8918573e-05, %v7653_v49  ;;  %v1583_v36 = vmul.f32 %v5505_v27, %v7672_v3  ;;  %vm2747_vm5 = vweird.f32 %v7618_v56  ;;  %v10009_v21 = vld [vmem:[#allocation49_spill] sm:$0xff] }
 0x2d4   : > { %v7717_v60 = vadd.f32 1.0, %v1740_v58  ;;  %v1618_v37 = vmul.f32 %v1617_v4, %v10001_v55  ;;  %v1776_v38 = vmul.f32 %v1775_v52, %v10002_v1  ;;  %v1654_v7 = vmul.f32 %v1653_v23, %v10005_v62  ;;  %vm7760_vm11 = vmor %vm2747_vm5, %vm2748_vm4 }
 0x2d5   : > { %v2716_v20 = vmul.f32 %v2715_v24, %v7632_v8  ;;  %v7724_v54 = vmul.f32 %v2770_v53, %v7490_v22  ;;  %v7726_v6 = vadd.f32 1.0, %v2780_v39  ;;  %v1584_v48 = vsub.f32 1.0, %v1583_v36 }
 0x2d6   : > { %v2805_v0 = vmul.f32 %v2804_v25, %v7635_v15  ;;  %v2844_v35 = vadd.f32 0.0036580483, %v2843_v45  ;;  %v1591_v28 = vand.u32 2147483647, %v7672_v3  ;;  %5506 = vrcp.f32 %v7717_v60 }
 0x2d7   : > { %v1585_v33 = vmul.f32 %v5505_v27, %v1584_v48  ;;  %vm1588_vm6 = vweird.f32 %v5505_v27  ;;  %v1593_v16 = vand.u32 2147483648, %v7672_v3  ;;  %v1619_v23 = vadd.f32 0.4994258, %v1618_v37 }
 0x2d8   : > { %v2816_v8 = vmul.f32 %v2815_v29, %v7635_v15  ;;  %v1777_v43 = vadd.f32 0.112945676, %v1776_v38  ;;  %v1655_v22 = vadd.f32 0.014752088, %v1654_v7  ;;  %v1812_v53 = vmul.f32 3.8918573e-05, %v10009_v21 }
 0x2d9   : > { %v2746_v17 = vadd.f32 %v7659_v2, %v2745_v59  ;;  %vm7735_vm7 = vcmp.eq.f32.partialorder %v2751_v14, 8.507059e+37  ;;  %v1586_v39 = vadd.f32 %v5505_v27, %v1585_v33  ;;  %vm1587_vm8 = vweird.f32 %v7672_v3 }
 0x2da   : > { %v1620_v52 = vmul.f32 %v1619_v23, %v10001_v55  ;;  %v7743_v45 = vmul.f32 0.70710677, %v7704_v50  ;;  %vm7745_vm9 = vmor %vm1587_vm8, %vm1588_vm6  ;;  %v1778_v4 = vmul.f32 %v1777_v43, %v10002_v1  ;;  %v1656_v14 = vmul.f32 %v1655_v22, %v10005_v62 }
 0x2db   : > { %v1590_v59 = vsel %vm7745_vm9, %v5505_v27, %v1586_v39  ;;  %vm1592_vm10 = vcmp.eq.f32.partialorder %v1591_v28, 8.507059e+37  ;;  %v1594_v3 = vor.u32 1.1754944e-38, %v1593_v16  ;;  %5508 = vrcp.f32 %v7726_v6  ;;  %v10016_v39 = vld [vmem:[#allocation58_spill] sm:$0xff] }
 0x2dc   : > { %v7753_v29 = vadd.f32 1.0, %v1620_v52  ;;  %v5507_v55 = vpop.eup %5506  ;;  %v1779_v36 = vadd.f32 0.4994258, %v1778_v4  ;;  %v1657_v37 = vadd.f32 0.112945676, %v1656_v14  ;;  %v5002_v7 = vclamps-f32 %v2716_v20, 1.0 }
 0x2dd   : > { %v1813_v38 = vadd.f32 0.001143296, %v1812_v53  ;;  %v2793_v27 = vand.u32 2147483648, %v7726_v6  ;;  %v1595_v28 = vsel %vm1592_vm10, %v1594_v3, %v1590_v59  ;;  %v1743_v33 = vmul.f32 %v5507_v55, %v7717_v60 }
 0x2de   : > { %v2750_v16 = vsel %vm7760_vm11, %v7659_v2, %v2746_v17  ;;  %v2806_v23 = vadd.f32 0.05243302, %v2805_v0  ;;  %v2817_v43 = vadd.f32 0.112945676, %v2816_v8  ;;  %5510 = vrcp.f32 %v7753_v29 }
 0x2df   : > { %v2845_v20 = vmul.f32 %v2844_v35, %v7653_v49  ;;  %v2879_v56 = vmul.f32 %v7743_v45, %v7743_v45  ;;  %v1744_v22 = vsub.f32 1.0, %v1743_v33  ;;  %v1753_v53 = vand.u32 2147483648, %v7717_v60 }
 0x2e0   : > { %v1596_v52 = vmul.f32 %v1595_v28, %v10016_v39  ;;  %v1780_v58 = vmul.f32 %v1779_v36, %v10002_v1  ;;  %v1658_v4 = vmul.f32 %v1657_v37, %v10005_v62  ;;  %v1814_v2 = vmul.f32 %v1813_v38, %v10009_v21  ;;  %v1047_v37 = vpop.f32.mrf.mxu2 }
 0x2e1   : > { %v7778_v0 = vadd.f32 0.001143296, %v2852_v13  ;;  %v1745_v8 = vmul.f32 %v5507_v55, %v1744_v22  ;;  %vm1748_vm12 = vweird.f32 %v5507_v55  ;;  %v1751_v35 = vand.u32 2147483647, %v7717_v60  ;;  %v7781_v17 = vpop.eup %5508 }
 0x2e2   : > { %v7783_v14 = vadd.f32 1.0, %v5002_v7  ;;  %v7788_v59 = vsel %vm7735_vm7, %v7700_v41, %v2750_v16  ;;  %v7790_v1 = vor.u32 1.1754944e-38, %v2793_v27  ;;  %v7792_v3 = vadd.f32 1.0, %v1780_v58 }
 0x2e3   : > { %v7794_v36 = vmin.f32 %v2879_v56, 16.0  ;;  %v1746_v13 = vadd.f32 %v5507_v55, %v1745_v8  ;;  %vm1747_vm13 = vweird.f32 %v7717_v60  ;;  %v1659_v38 = vadd.f32 0.4994258, %v1658_v4  ;;  %v1096_v8 = vpop.f32.mrf.mxu3 }
 0x2e4   : > { %v5511_v48 = vpop.eup %5510  ;;  %v4974_v28 = vclamps-f32 %v1596_v52, 1.0  ;;  %vm1749_vm14 = vmor %vm1747_vm13, %vm1748_vm12  ;;  %v1754_v7 = vor.u32 1.1754944e-38, %v1753_v53  ;;  %5512 = vrcp.f32 %v7792_v3  ;;  %v1815_v25 = vadd.f32 0.014752088, %v1814_v2  ;;  %v10017_v53 = vld [vmem:[#allocation70_spill] sm:$0xff] }
 0x2e5   : > { %v2807_v41 = vmul.f32 %v2806_v23, %v7635_v15  ;;  %v1750_v27 = vsel %vm1749_vm14, %v5507_v55, %v1746_v13  ;;  %vm1752_vm15 = vcmp.eq.f32.partialorder %v1751_v35, 8.507059e+37  ;;  %v1623_v33 = vmul.f32 %v5511_v48, %v7753_v29 }
 0x2e6   : > { %v2818_v16 = vmul.f32 %v2817_v43, %v7635_v15  ;;  %v1755_v56 = vsel %vm1752_vm15, %v1754_v7, %v1750_v27  ;;  %v1631_v60 = vand.u32 2147483647, %v7753_v29  ;;  %v7803_v22 = vadd.f32 %v1047_v37, %v6365_v18 }
 0x2e7   : > { %v7805_v39 = vadd.f32 0.05243302, %v2845_v20  ;;  %v1756_v52 = vmul.f32 %v1755_v56, %v10017_v53  ;;  %v1624_v58 = vsub.f32 1.0, %v1623_v33  ;;  %v1660_v4 = vmul.f32 %v1659_v38, %v10005_v62  ;;  %v10020_v38 = vld [vmem:[#allocation44_spill] sm:$0xff] }
 0x2e8   : > { %v2892_v55 = vmul.f32 3.8918573e-05, %v7794_v36  ;;  %v3807_v23 = vadd.f32 1.0, %v4974_v28  ;;  %v1633_v2 = vand.u32 2147483648, %v7753_v29  ;;  %v1816_v43 = vmul.f32 %v1815_v25, %v10009_v21  ;;  %v10021_v53 = vld [vmem:[#allocation36_spill] sm:$0xff] }
 0x2e9   : > { %v4978_v35 = vclamps-f32 %v1756_v52, 1.0  ;;  %v1625_v13 = vmul.f32 %v5511_v48, %v1624_v58  ;;  %vm1628_vm0 = vweird.f32 %v5511_v48  ;;  %v7812_v37 = vadd.f32 1.0, %v1660_v4  ;;  %v10022_v58 = vld [vmem:[#allocation48_spill] sm:$0xff] }
 0x2ea   : > { %v5513_v20 = vpop.eup %5512  ;;  %vm1627_vm1 = vweird.f32 %v7753_v29  ;;  %vm7815_vm2 = vcmp.eq.f32.partialorder %v1631_v60, 8.507059e+37  ;;  %v7820_v62 = vmul.f32 0.70710677, %v7803_v22  ;;  %v1692_v28 = vmul.f32 3.8918573e-05, %v10020_v38 }
 0x2eb   : > { %v3811_v27 = vadd.f32 1.0, %v4978_v35  ;;  %v1626_v33 = vadd.f32 %v5511_v48, %v1625_v13  ;;  %v1783_v25 = vmul.f32 %v5513_v20, %v7792_v3  ;;  %v7825_v56 = vadd.f32 %v1096_v8, %v9993_v19  ;;  %vm1629_vm3 = vmor %vm1627_vm1, %vm1628_vm0  ;;  %v1098_v9 = vpop.f32.mrf.mxu3 }
 0x2ec   : > { %v3871_v52 = vmul.f32 %v3807_v23, %v10021_v53  ;;  %v1634_v29 = vor.u32 1.1754944e-38, %v1633_v2  ;;  %5514 = vrcp.f32 %v7812_v37  ;;  %v1817_v60 = vadd.f32 0.112945676, %v1816_v43  ;;  %v10023_v2 = vld [vmem:[#allocation61_spill] sm:$0xff] }
 0x2ed   : > { %v3875_v4 = vmul.f32 %v3811_v27, %v10022_v58  ;;  %v1630_v24 = vsel %vm1629_vm3, %v5511_v48, %v1626_v33  ;;  %v1784_v40 = vsub.f32 1.0, %v1783_v25  ;;  %v1791_v57 = vand.u32 2147483647, %v7792_v3 }
 0x2ee   : > { %v1635_v35 = vsel %vm7815_vm2, %v1634_v29, %v1630_v24  ;;  %vm1788_vm4 = vweird.f32 %v5513_v20  ;;  %v1793_v8 = vand.u32 2147483648, %v7792_v3  ;;  %v2919_v23 = vmul.f32 %v7820_v62, %v7820_v62 }
 0x2ef   : > { %v3931_v13 = vpack.c.bf16 %v3875_v4, %v3871_v52  ;;  %v1636_v53 = vmul.f32 %v1635_v35, %v10023_v2  ;;  %v1785_v11 = vmul.f32 %v5513_v20, %v1784_v40  ;;  %v7838_v43 = vmul.f32 0.70710677, %v7825_v56 }
 0x2f0   : > { %v2808_v48 = vadd.f32 0.18741608, %v2807_v41  ;;  %v2854_v27 = vmul.f32 %v7778_v0, %v7653_v49  ;;  %v2893_v33 = vadd.f32 0.001143296, %v2892_v55  ;;  %v1818_v24 = vmul.f32 %v1817_v60, %v10009_v21 }
 0x2f1   : > { %v2783_v7 = vmul.f32 %v7781_v17, %v7726_v6  ;;  %v2819_v25 = vadd.f32 0.4994258, %v2818_v16  ;;  %4232 = vmatmul.bf16.gmra.mxu0 %v3931_v13  ;;  %v1786_v29 = vadd.f32 %v5513_v20, %v1785_v11  ;;  %vm1787_vm5 = vweird.f32 %v7792_v3 }
 0x2f2   : > { %v7846_v52 = vpop.eup %5514  ;;  %vm1789_vm6 = vmor %vm1787_vm5, %vm1788_vm4  ;;  %vm1792_vm7 = vcmp.eq.f32.partialorder %v1791_v57, 8.507059e+37  ;;  %v1794_v40 = vor.u32 1.1754944e-38, %v1793_v8  ;;  %v7849_v41 = vmin.f32 %v2919_v23, 16.0  ;;  %v1693_v0 = vadd.f32 0.001143296, %v1692_v28  ;;  %v10024_v8 = vld [vmem:[#allocation72_spill] sm:$0xff] }
 0x2f3   : > { %v4975_v55 = vclamps-f32 %v1636_v53, 1.0  ;;  %v1790_v58 = vsel %vm1789_vm6, %v5513_v20, %v1786_v29  ;;  %v2959_v60 = vmul.f32 %v7838_v43, %v7838_v43  ;;  %v1663_v16 = vmul.f32 %v7846_v52, %v7812_v37 }
 0x2f4   : > { %v2855_v11 = vadd.f32 0.014752088, %v2854_v27  ;;  %v2894_v3 = vmul.f32 %v2893_v33, %v7794_v36  ;;  %v1795_v4 = vsel %vm1792_vm7, %v1794_v40, %v1790_v58  ;;  %v1819_v35 = vadd.f32 0.4994258, %v1818_v24 }
 0x2f5   : > { %v7858_v57 = vmul.f32 %v7788_v59, %v7694_v42  ;;  %v2847_v28 = vmul.f32 %v7805_v39, %v7653_v49  ;;  %v1796_v20 = vmul.f32 %v1795_v4, %v10024_v8  ;;  %v1664_v23 = vsub.f32 1.0, %v1663_v16  ;;  %v10026_v16 = vld [vmem:[#allocation38_spill] sm:$0xff] }
 0x2f6   : > { %v7865_v13 = vmul.f32 %v7783_v14, %v7565_v51  ;;  %v2784_v2 = vsub.f32 1.0, %v2783_v7  ;;  %v2809_v53 = vmul.f32 %v2808_v48, %v7635_v15  ;;  %v1694_v27 = vmul.f32 %v1693_v0, %v10020_v38 }
 0x2f7   : > { %v4979_v33 = vclamps-f32 %v1796_v20, 1.0  ;;  %v3808_v24 = vadd.f32 1.0, %v4975_v55  ;;  %v2932_v42 = vmul.f32 3.8918573e-05, %v7849_v41  ;;  %v7870_v59 = vmin.f32 %v2959_v60, 16.0 }
 0x2f8   : > { %10025 = vst [vmem:[#allocation45_spill] sm:$0xff] %v7865_v13  ;;  %vm2787_vm8 = vweird.f32 %v7726_v6  ;;  %v2820_v39 = vmul.f32 %v2819_v25, %v7635_v15  ;;  %v2856_v29 = vmul.f32 %v2855_v11, %v7653_v49  ;;  %v2895_v40 = vadd.f32 0.014752088, %v2894_v3  ;;  %v10027_v15 = vld [vmem:[#allocation56_spill] sm:$0xff] }
 0x2f9   : > { %v1820_v51 = vmul.f32 %v1819_v35, %v10009_v21  ;;  %vm2788_vm9 = vweird.f32 %v7781_v17  ;;  %v2848_v14 = vadd.f32 0.18741608, %v2847_v28  ;;  %v3812_v48 = vadd.f32 1.0, %v4979_v33 }
 0x2fa   : > { %v1665_v7 = vmul.f32 %v7846_v52, %v1664_v23  ;;  %v2785_v0 = vmul.f32 %v7781_v17, %v2784_v2  ;;  %v2810_v55 = vadd.f32 1.1283791, %v2809_v53  ;;  %v1695_v60 = vadd.f32 0.014752088, %v1694_v27  ;;  %vm7920_vm14 = vmor %vm2787_vm8, %vm2788_vm9 }
 0x2fb   : > { %v7879_v58 = vadd.f32 1.0, %v1820_v51  ;;  %v3872_v4 = vmul.f32 %v3808_v24, %v10026_v16  ;;  %v3876_v25 = vmul.f32 %v3812_v48, %v10027_v15  ;;  %v2933_v11 = vadd.f32 0.001143296, %v2932_v42  ;;  %v10031_v42 = vld [vmem:[#allocation51_spill] sm:$0xff] }
 0x2fc   : > { %v2972_v3 = vmul.f32 3.8918573e-05, %v7870_v59  ;;  %v10028_v21 = vand.u32 2147483647, %v7726_v6  ;;  %v7890_v28 = vadd.f32 1.0, %v2820_v39  ;;  %v2896_v23 = vmul.f32 %v2895_v40, %v7794_v36 }
 0x2fd   : > { %v2857_v8 = vadd.f32 0.112945676, %v2856_v29  ;;  %v2881_v20 = vmul.f32 2.1237322e-06, %v7794_v36  ;;  %v3932_v2 = vpack.c.bf16 %v3876_v25, %v3872_v4  ;;  %v1666_v53 = vadd.f32 %v7846_v52, %v1665_v7 }
 0x2fe   : > { %vm7886_vm10 = vcmp.eq.f32.partialorder %v10028_v21, 8.507059e+37  ;;  %vm1668_vm11 = vweird.f32 %v7846_v52  ;;  %5516 = vrcp.f32 %v7879_v58  ;;  %v2786_v27 = vadd.f32 %v7781_v17, %v2785_v0 }
 0x2ff   : > { %v1673_v33 = vand.u32 2147483648, %v7812_v37  ;;  %v1696_v24 = vmul.f32 %v1695_v60, %v10020_v38  ;;  %v1852_v39 = vmul.f32 3.8918573e-05, %v10031_v42  ;;  %4281 = vmatmul.bf16.gmra.mxu1 %v3932_v2  ;;  %v2934_v29 = vmul.f32 %v2933_v11, %v7849_v41 }
 0x300   : > { %v2973_v51 = vadd.f32 0.001143296, %v2972_v3  ;;  %vm1667_vm12 = vweird.f32 %v7812_v37  ;;  %v1671_v40 = vand.u32 2147483647, %v7812_v37  ;;  %v7906_v7 = vmul.f32 %v2810_v55, %v7598_v63 }
 0x301   : > { %5518 = vrcp.f32 %v7890_v28  ;;  %v2849_v0 = vmul.f32 %v2848_v14, %v7653_v49  ;;  %vm7912_vm13 = vmor %vm1667_vm12, %vm1668_vm11  ;;  %v2858_v63 = vmul.f32 %v2857_v8, %v7653_v49  ;;  %v2882_v55 = vadd.f32 0.00028619796, %v2881_v20 }
 0x302   : > { %v2897_v16 = vadd.f32 0.112945676, %v2896_v23  ;;  %v1670_v14 = vsel %vm7912_vm13, %v7846_v52, %v1666_v53  ;;  %v2790_v4 = vsel %vm7920_vm14, %v7781_v17, %v2786_v27  ;;  %v1674_v15 = vor.u32 1.1754944e-38, %v1673_v33 }
 0x303   : > { %v1697_v25 = vadd.f32 0.112945676, %v1696_v24  ;;  %v1853_v11 = vadd.f32 0.001143296, %v1852_v39  ;;  %v2831_v3 = vand.u32 2147483647, %v7890_v28  ;;  %v2974_v2 = vmul.f32 %v2973_v51, %v7870_v59 }
 0x304   : > { %v5517_v6 = vpop.eup %5516  ;;  %v2935_v21 = vadd.f32 0.014752088, %v2934_v29  ;;  %vm1672_vm15 = vcmp.eq.f32.partialorder %v1671_v40, 8.507059e+37  ;;  %v2795_v17 = vsel %vm7886_vm10, %v7790_v1, %v2790_v4  ;;  %v2833_v53 = vand.u32 2147483648, %v7890_v28 }
 0x305   : > { %v1675_v8 = vsel %vm1672_vm15, %v1674_v15, %v1670_v14  ;;  %v1823_v20 = vmul.f32 %v5517_v6, %v7879_v58  ;;  %v1698_v23 = vmul.f32 %v1697_v25, %v10020_v38  ;;  %v1854_v52 = vmul.f32 %v1853_v11, %v10031_v42  ;;  %v10036_v14 = vld [vmem:[#allocation62_spill] sm:$0xff] }
 0x306   : > { %v2859_v27 = vadd.f32 0.4994258, %v2858_v63  ;;  %v2883_v33 = vmul.f32 %v2882_v55, %v7794_v36  ;;  %v2898_v39 = vmul.f32 %v2897_v16, %v7794_v36  ;;  %v2936_v60 = vmul.f32 %v2935_v21, %v7849_v41 }
 0x307   : > { %v7941_v24 = vpop.eup %5518  ;;  %v1824_v29 = vsub.f32 1.0, %v1823_v20  ;;  %v1699_v51 = vadd.f32 0.4994258, %v1698_v23  ;;  %v1855_v40 = vadd.f32 0.014752088, %v1854_v52  ;;  %v1676_v15 = vmul.f32 %v1675_v8, %v10036_v14 }
 0x308   : > { %v2975_v37 = vadd.f32 0.014752088, %v2974_v2  ;;  %v1833_v35 = vand.u32 2147483648, %v7879_v58  ;;  %vm1828_vm0 = vweird.f32 %v5517_v6  ;;  %v1831_v63 = vand.u32 2147483647, %v7879_v58 }
 0x309   : > { %v1825_v1 = vmul.f32 %v5517_v6, %v1824_v29  ;;  %v1700_v55 = vmul.f32 %v1699_v51, %v10020_v38  ;;  %v2823_v4 = vmul.f32 %v7941_v24, %v7890_v28  ;;  %v2860_v16 = vmul.f32 %v2859_v27, %v7653_v49 }
 0x30a   : > { %v2884_v25 = vadd.f32 0.0036580483, %v2883_v33  ;;  %v1856_v11 = vmul.f32 %v1855_v40, %v10031_v42  ;;  %v2899_v21 = vadd.f32 0.4994258, %v2898_v39  ;;  %vm1827_vm1 = vweird.f32 %v7879_v58 }
 0x30b   : > { %v1826_v2 = vadd.f32 %v5517_v6, %v1825_v1  ;;  %v7954_v8 = vadd.f32 1.0, %v1700_v55  ;;  %v2937_v20 = vadd.f32 0.112945676, %v2936_v60  ;;  %v2976_v23 = vmul.f32 %v2975_v37, %v7870_v59  ;;  %vm1829_vm2 = vmor %vm1827_vm1, %vm1828_vm0  ;;  %v10037_v37 = vld [vmem:[#allocation77_spill] sm:$0xff] }
 0x30c   : > { %v1834_v52 = vor.u32 1.1754944e-38, %v1833_v35  ;;  %v1857_v38 = vadd.f32 0.112945676, %v1856_v11  ;;  %v4976_v29 = vclamps-f32 %v1676_v15, 1.0  ;;  %vm1832_vm3 = vcmp.eq.f32.partialorder %v1831_v63, 8.507059e+37 }
 0x30d   : > { %v1830_v51 = vsel %vm1829_vm2, %v5517_v6, %v1826_v2  ;;  %5520 = vrcp.f32 %v7954_v8  ;;  %v2824_v49 = vsub.f32 1.0, %v2823_v4  ;;  %v2885_v27 = vmul.f32 %v2884_v25, %v7794_v36  ;;  %v951_v25 = vpop.f32.mrf.mxu0 }
 0x30e   : > { %v1835_v33 = vsel %vm1832_vm3, %v1834_v52, %v1830_v51  ;;  %v1858_v39 = vmul.f32 %v1857_v38, %v10031_v42  ;;  %v2850_v58 = vadd.f32 1.1283791, %v2849_v0  ;;  %v2900_v40 = vmul.f32 %v2899_v21, %v7794_v36 }
 0x30f   : > { %v2921_v60 = vmul.f32 2.1237322e-06, %v7849_v41  ;;  %v1836_v14 = vmul.f32 %v1835_v33, %v10037_v37  ;;  %v7963_v35 = vor.u32 1.1754944e-38, %v2833_v53  ;;  %v7965_v15 = vadd.f32 1.0, %v2860_v16 }
 0x310   : > { %v2938_v6 = vmul.f32 %v2937_v20, %v7849_v41  ;;  %v1859_v1 = vadd.f32 0.4994258, %v1858_v39  ;;  %v7969_v63 = vmul.f32 %v2795_v17, %v7724_v54  ;;  %vm2827_vm4 = vweird.f32 %v7890_v28  ;;  %v1000_v39 = vpop.f32.mrf.mxu1 }
 0x311   : > { %v2977_v55 = vadd.f32 0.112945676, %v2976_v23  ;;  %v4980_v0 = vclamps-f32 %v1836_v14, 1.0  ;;  %v3809_v4 = vadd.f32 1.0, %v4976_v29  ;;  %v2825_v11 = vmul.f32 %v7941_v24, %v2824_v49  ;;  %v10039_v49 = vld [vmem:[#allocation59_spill] sm:$0xff] }
 0x312   : > { %v2886_v21 = vadd.f32 0.05243302, %v2885_v27  ;;  %v1860_v53 = vmul.f32 %v1859_v1, %v10031_v42  ;;  %v7975_v16 = vadd.f32 %v951_v25, %v6349_v10  ;;  %vm2828_vm5 = vweird.f32 %v7941_v24  ;;  %v10038_v42 = vld [vmem:[#allocation41_spill] sm:$0xff] }
 0x313   : > { %v5521_v2 = vpop.eup %5520  ;;  %v7978_v20 = vadd.f32 1.0, %v2900_v40  ;;  %v2922_v54 = vadd.f32 0.00028619796, %v2921_v60  ;;  %v3813_v17 = vadd.f32 1.0, %v4980_v0  ;;  %5522 = vrcp.f32 %v7965_v15  ;;  %vm8016_vm8 = vmor %vm2827_vm4, %vm2828_vm5 }
 0x314   : > { %v2939_v23 = vadd.f32 0.4994258, %v2938_v6  ;;  %v1703_v52 = vmul.f32 %v5521_v2, %v7954_v8  ;;  %v7982_v38 = vadd.f32 1.0, %v1860_v53  ;;  %v2978_v29 = vmul.f32 %v2977_v55, %v7870_v59 }
 0x315   : > { %v3873_v51 = vmul.f32 %v3809_v4, %v10038_v42  ;;  %v3877_v27 = vmul.f32 %v3813_v17, %v10039_v49  ;;  %v7988_v33 = vmul.f32 0.70710677, %v7975_v16  ;;  %v2826_v40 = vadd.f32 %v7941_v24, %v2825_v11 }
 0x316   : > { %vm7993_vm6 = vcmp.eq.f32.partialorder %v2831_v3, 8.507059e+37  ;;  %v2887_v37 = vmul.f32 %v2886_v21, %v7794_v36  ;;  %v1704_v14 = vsub.f32 1.0, %v1703_v52  ;;  %5524 = vrcp.f32 %v7982_v38 }
 0x317   : > { %5526 = vrcp.f32 %v7978_v20  ;;  %v2923_v6 = vmul.f32 %v2922_v54, %v7849_v41  ;;  %v3933_v1 = vpack.c.bf16 %v3877_v27, %v3873_v51  ;;  %v1713_v55 = vand.u32 2147483648, %v7954_v8 }
 0x318   : > { %v1705_v0 = vmul.f32 %v5521_v2, %v1704_v14  ;;  %vm1708_vm7 = vweird.f32 %v5521_v2  ;;  %v2999_v3 = vmul.f32 %v7988_v33, %v7988_v33  ;;  %v8005_v4 = vadd.f32 %v1000_v39, %v6351_v12 }
 0x319   : > { %v2940_v25 = vmul.f32 %v2939_v23, %v7849_v41  ;;  %v2961_v11 = vmul.f32 2.1237322e-06, %v7870_v59  ;;  %v2979_v21 = vadd.f32 0.4994258, %v2978_v29  ;;  %4330 = vmatmul.bf16.gmra.mxu2 %v3933_v1  ;;  %v1711_v53 = vand.u32 2147483647, %v7954_v8  ;;  %v8010_v54 = vpop.eup %5522 }
 0x31a   : > { %v1706_v52 = vadd.f32 %v5521_v2, %v1705_v0  ;;  %vm1707_vm9 = vweird.f32 %v7954_v8  ;;  %v8021_v23 = vmin.f32 %v2999_v3, 16.0  ;;  %v8024_v29 = vmul.f32 0.70710677, %v8005_v4 }
 0x31b   : > { %v8028_v51 = vmul.f32 %v2850_v58, %v7624_v47  ;;  %v2873_v49 = vand.u32 2147483648, %v7965_v15  ;;  %v2888_v28 = vadd.f32 0.18741608, %v2887_v37  ;;  %vm1709_vm10 = vmor %vm1707_vm9, %vm1708_vm7  ;;  %v2830_v8 = vsel %vm8016_vm8, %v7941_v24, %v2826_v40 }
 0x31c   : > { %v5525_v27 = vpop.eup %5524  ;;  %v1710_v39 = vsel %vm1709_vm10, %v5521_v2, %v1706_v52  ;;  %v1714_v14 = vor.u32 1.1754944e-38, %v1713_v55  ;;  %v3012_v1 = vmul.f32 3.8918573e-05, %v8021_v23  ;;  %v2924_v3 = vadd.f32 0.0036580483, %v2923_v6  ;;  %v10044_v52 = vld [vmem:[#allocation69_spill] sm:$0xff] }
 0x31d   : > { %v8036_v0 = vpop.eup %5526  ;;  %vm1712_vm11 = vcmp.eq.f32.partialorder %v1711_v53, 8.507059e+37  ;;  %v1863_v47 = vmul.f32 %v5525_v27, %v7982_v38  ;;  %v3039_v58 = vmul.f32 %v8024_v29, %v8024_v29  ;;  %v8041_v37 = vadd.f32 1.0, %v2940_v25 }
 0x31e   : > { %v2962_v42 = vadd.f32 0.00028619796, %v2961_v11  ;;  %v2980_v48 = vmul.f32 %v2979_v21, %v7870_v59  ;;  %v1715_v17 = vsel %vm1712_vm11, %v1714_v14, %v1710_v39  ;;  %v2835_v24 = vsel %vm7993_vm6, %v7963_v35, %v2830_v8  ;;  %v1049_v21 = vpop.f32.mrf.mxu2 }
 0x31f   : > { %v2863_v2 = vmul.f32 %v8010_v54, %v7965_v15  ;;  %v1864_v40 = vsub.f32 1.0, %v1863_v47  ;;  %v3013_v6 = vadd.f32 0.001143296, %v3012_v1  ;;  %v2889_v55 = vmul.f32 %v2888_v28, %v7794_v36 }
 0x320   : > { %v2903_v53 = vmul.f32 %v8036_v0, %v7978_v20  ;;  %v1871_v25 = vand.u32 2147483647, %v7982_v38  ;;  %v1873_v11 = vand.u32 2147483648, %v7982_v38  ;;  %v1716_v39 = vmul.f32 %v1715_v17, %v10044_v52 }
 0x321   : > { %v1865_v14 = vmul.f32 %v5525_v27, %v1864_v40  ;;  %vm1868_vm12 = vweird.f32 %v5525_v27  ;;  %v8055_v35 = vmin.f32 %v3039_v58, 16.0  ;;  %v2925_v60 = vmul.f32 %v2924_v3, %v7849_v41 }
 0x322   : > { %5528 = vrcp.f32 %v8041_v37  ;;  %v2963_v36 = vmul.f32 %v2962_v42, %v7870_v59  ;;  %v8060_v28 = vadd.f32 1.0, %v2980_v48  ;;  %vm1867_vm13 = vweird.f32 %v7982_v38 }
 0x323   : > { %v1866_v8 = vadd.f32 %v5525_v27, %v1865_v14  ;;  %v3014_v1 = vmul.f32 %v3013_v6, %v8021_v23  ;;  %v8065_v47 = vadd.f32 %v1049_v21, %v6365_v18  ;;  %v8068_v17 = vmul.f32 %v2835_v24, %v7906_v7  ;;  %vm1869_vm14 = vmor %vm1867_vm13, %vm1868_vm12  ;;  %v10045_v21 = vld [vmem:[#allocation78_spill] sm:$0xff] }
 0x324   : > { %v2864_v58 = vsub.f32 1.0, %v2863_v2  ;;  %v2904_v40 = vsub.f32 1.0, %v2903_v53  ;;  %v1874_v3 = vor.u32 1.1754944e-38, %v1873_v11  ;;  %v4977_v52 = vclamps-f32 %v1716_v39, 1.0 }
 0x325   : > { %v1870_v13 = vsel %vm1869_vm14, %v5525_v27, %v1866_v8  ;;  %vm1872_vm15 = vcmp.eq.f32.partialorder %v1871_v25, 8.507059e+37  ;;  %v3052_v48 = vmul.f32 3.8918573e-05, %v8055_v35  ;;  %v2926_v42 = vadd.f32 0.05243302, %v2925_v60 }
 0x326   : > { %v2964_v14 = vadd.f32 0.0036580483, %v2963_v36  ;;  %5530 = vrcp.f32 %v8060_v28  ;;  %v1875_v38 = vsel %vm1872_vm15, %v1874_v3, %v1870_v13  ;;  %v2871_v6 = vand.u32 2147483647, %v7965_v15 }
 0x327   : > { %v1876_v46 = vmul.f32 %v1875_v38, %v10045_v21  ;;  %v3015_v7 = vadd.f32 0.014752088, %v3014_v1  ;;  %v8075_v24 = vmul.f32 0.70710677, %v8065_v47  ;;  %v2865_v27 = vmul.f32 %v8010_v54, %v2864_v58  ;;  %v10050_v38 = vld [vmem:[#allocation43_spill] sm:$0xff] }
 0x328   : > { %v8077_v2 = vpop.eup %5528  ;;  %vm2867_vm0 = vweird.f32 %v7965_v15  ;;  %vm2868_vm1 = vweird.f32 %v8010_v54  ;;  %v2874_v53 = vor.u32 1.1754944e-38, %v2873_v49  ;;  %v2890_v25 = vadd.f32 1.1283791, %v2889_v55  ;;  %v10051_v21 = vld [vmem:[#allocation63_spill] sm:$0xff] }
 0x329   : > { %10046 = vst [vmem:[#allocation37_spill] sm:$0xff] %v8075_v24  ;;  %v4981_v11 = vclamps-f32 %v1876_v46, 1.0  ;;  %v3810_v13 = vadd.f32 1.0, %v4977_v52  ;;  %v3053_v39 = vadd.f32 0.001143296, %v3052_v48  ;;  %v2905_v36 = vmul.f32 %v8036_v0, %v2904_v40  ;;  %vm8111_vm5 = vmor %vm2867_vm0, %vm2868_vm1 }
 0x32a   : > { %v2927_v8 = vmul.f32 %v2926_v42, %v7849_v41  ;;  %v2965_v1 = vmul.f32 %v2964_v14, %v7870_v59  ;;  %vm8086_vm2 = vcmp.eq.f32.partialorder %v2871_v6, 8.507059e+37  ;;  %vm2907_vm3 = vweird.f32 %v7978_v20  ;;  %v10049_v42 = vld [vmem:[#allocation53_spill] sm:$0xff] }
 0x32b   : > { %v3814_v58 = vadd.f32 1.0, %v4981_v11  ;;  %v3016_v49 = vmul.f32 %v3015_v7, %v8021_v23  ;;  %v3079_v46 = vmul.f32 %v8075_v24, %v8075_v24  ;;  %v2866_v40 = vadd.f32 %v8010_v54, %v2865_v27 }
 0x32c   : > { %v8094_v55 = vpop.eup %5530  ;;  %v2911_v52 = vand.u32 2147483647, %v7978_v20  ;;  %v2943_v48 = vmul.f32 %v8077_v2, %v8041_v37  ;;  %v1892_v14 = vmul.f32 3.8918573e-05, %v10049_v42  ;;  %v3874_v6 = vmul.f32 %v3810_v13, %v10050_v38 }
 0x32d   : > { %v3878_v11 = vmul.f32 %v3814_v58, %v10051_v21  ;;  %v3001_v7 = vmul.f32 2.1237322e-06, %v8021_v23  ;;  %v3054_v60 = vmul.f32 %v3053_v39, %v8055_v35  ;;  %v2906_v61 = vadd.f32 %v8036_v0, %v2905_v36 }
 0x32e   : > { %vm2908_vm4 = vweird.f32 %v8036_v0  ;;  %v2928_v27 = vadd.f32 0.18741608, %v2927_v8  ;;  %v2966_v44 = vadd.f32 0.05243302, %v2965_v1  ;;  %v2983_v13 = vmul.f32 %v8094_v55, %v8060_v28 }
 0x32f   : > { %v3934_v58 = vpack.c.bf16 %v3878_v11, %v3874_v6  ;;  %v3017_v39 = vadd.f32 0.112945676, %v3016_v49  ;;  %v8117_v38 = vmin.f32 %v3079_v46, 16.0  ;;  %v2870_v36 = vsel %vm8111_vm5, %v8010_v54, %v2866_v40  ;;  %vm8134_vm6 = vmor %vm2907_vm3, %vm2908_vm4 }
 0x330   : > { %v2913_v8 = vand.u32 2147483648, %v7978_v20  ;;  %v3041_v1 = vmul.f32 2.1237322e-06, %v8055_v35  ;;  %v1893_v15 = vadd.f32 0.001143296, %v1892_v14  ;;  %v2944_v21 = vsub.f32 1.0, %v2943_v48 }
 0x331   : > { %4379 = vmatmul.bf16.gmra.mxu3 %v3934_v58  ;;  %v3002_v18 = vadd.f32 0.00028619796, %v3001_v7  ;;  %v3055_v32 = vadd.f32 0.014752088, %v3054_v60  ;;  %v8125_v24 = vadd.f32 %v1098_v9, %v9993_v19  ;;  %v8128_v49 = vmul.f32 %v2890_v25, %v7743_v45 }
 0x332   : > { %vm2912_vm7 = vcmp.eq.f32.partialorder %v2911_v52, 8.507059e+37  ;;  %v2929_v54 = vmul.f32 %v2928_v27, %v7849_v41  ;;  %v2967_v46 = vmul.f32 %v2966_v44, %v7870_v59  ;;  %v2910_v9 = vsel %vm8134_vm6, %v8036_v0, %v2906_v61 }
 0x333   : > { %v2984_v60 = vsub.f32 1.0, %v2983_v13  ;;  %v3018_v45 = vmul.f32 %v3017_v39, %v8021_v23  ;;  %v3092_v25 = vmul.f32 3.8918573e-05, %v8117_v38  ;;  %v2875_v20 = vsel %vm8086_vm2, %v2874_v53, %v2870_v36 }
 0x334   : > { %v2914_v40 = vor.u32 1.1754944e-38, %v2913_v8  ;;  %v3042_v48 = vadd.f32 0.00028619796, %v3041_v1  ;;  %v1894_v52 = vmul.f32 %v1893_v15, %v10049_v42  ;;  %v2945_v41 = vmul.f32 %v8077_v2, %v2944_v21 }
 0x335   : > { %v3003_v44 = vmul.f32 %v3002_v18, %v8021_v23  ;;  %v3056_v14 = vmul.f32 %v3055_v32, %v8055_v35  ;;  %v8152_v61 = vmul.f32 0.70710677, %v8125_v24  ;;  %v2930_v6 = vadd.f32 1.1283791, %v2929_v54 }
 0x336   : > { %v2915_v0 = vsel %vm2912_vm7, %v2914_v40, %v2910_v9  ;;  %v2968_v11 = vadd.f32 0.18741608, %v2967_v46  ;;  %v3081_v7 = vmul.f32 2.1237322e-06, %v8117_v38  ;;  %vm2947_vm8 = vweird.f32 %v8041_v37 }
 0x337   : > { %v2985_v53 = vmul.f32 %v8094_v55, %v2984_v60  ;;  %v3019_v3 = vadd.f32 0.4994258, %v3018_v45  ;;  %v3093_v27 = vadd.f32 0.001143296, %v3092_v25  ;;  %vm2948_vm9 = vweird.f32 %v8077_v2 }
 0x338   : > { %v2951_v18 = vand.u32 2147483647, %v8041_v37  ;;  %v3043_v32 = vmul.f32 %v3042_v48, %v8055_v35  ;;  %v1895_v13 = vadd.f32 0.014752088, %v1894_v52  ;;  %v2946_v58 = vadd.f32 %v8077_v2, %v2945_v41  ;;  %vm8174_vm11 = vmor %vm2947_vm8, %vm2948_vm9 }
 0x339   : > { %v3004_v39 = vadd.f32 0.0036580483, %v3003_v44  ;;  %v3057_v36 = vadd.f32 0.112945676, %v3056_v14  ;;  %v3119_v8 = vmul.f32 %v8152_v61, %v8152_v61  ;;  %v2953_v1 = vand.u32 2147483648, %v8041_v37 }
 0x33a   : > { %v2969_v15 = vmul.f32 %v2968_v11, %v7870_v59  ;;  %v2991_v21 = vand.u32 2147483647, %v8060_v28  ;;  %v3082_v26 = vadd.f32 0.00028619796, %v3081_v7  ;;  %v2986_v54 = vadd.f32 %v8094_v55, %v2985_v53 }
 0x33b   : > { %vm2988_vm10 = vweird.f32 %v8094_v55  ;;  %v3020_v46 = vmul.f32 %v3019_v3, %v8021_v23  ;;  %v3094_v9 = vmul.f32 %v3093_v27, %v8117_v38  ;;  %vm2987_vm12 = vweird.f32 %v8060_v28 }
 0x33c   : > { %v2993_v59 = vand.u32 2147483648, %v8060_v28  ;;  %v3044_v45 = vadd.f32 0.0036580483, %v3043_v32  ;;  %v1896_v25 = vmul.f32 %v1895_v13, %v10049_v42  ;;  %v2950_v40 = vsel %vm8174_vm11, %v8077_v2, %v2946_v58  ;;  %vm8190_vm14 = vmor %vm2987_vm12, %vm2988_vm10 }
 0x33d   : > { %v3005_v48 = vmul.f32 %v3004_v39, %v8021_v23  ;;  %v3058_v52 = vmul.f32 %v3057_v36, %v8055_v35  ;;  %v8186_v37 = vmin.f32 %v3119_v8, 16.0  ;;  %vm2952_vm13 = vcmp.eq.f32.partialorder %v2951_v18, 8.507059e+37 }
 0x33e   : > { %v2954_v41 = vor.u32 1.1754944e-38, %v2953_v1  ;;  %v2970_v44 = vadd.f32 1.1283791, %v2969_v15  ;;  %v3083_v14 = vmul.f32 %v3082_v26, %v8117_v38  ;;  %v2990_v2 = vsel %vm8190_vm14, %v8094_v55, %v2986_v54 }
 0x33f   : > { %vm2992_vm15 = vcmp.eq.f32.partialorder %v2991_v21, 8.507059e+37  ;;  %v8198_v11 = vadd.f32 1.0, %v3020_v46  ;;  %v3095_v7 = vadd.f32 0.014752088, %v3094_v9  ;;  %v2994_v3 = vor.u32 1.1754944e-38, %v2993_v59 }
 0x340   : > { %v2955_v53 = vsel %vm2952_vm13, %v2954_v41, %v2950_v40  ;;  %v3045_v27 = vmul.f32 %v3044_v45, %v8055_v35  ;;  %v1897_v18 = vadd.f32 0.112945676, %v1896_v25  ;;  %v2931_v32 = vmul.f32 %v2930_v6, %v7820_v62 }
 0x341   : > { %v3006_v13 = vadd.f32 0.05243302, %v3005_v48  ;;  %v3059_v58 = vadd.f32 0.4994258, %v3058_v52  ;;  %v3121_v39 = vmul.f32 2.1237322e-06, %v8186_v37  ;;  %v2876_v36 = vmul.f32 %v2875_v20, %v8028_v51 }
 0x342   : > { %v2916_v8 = vmul.f32 %v2915_v0, %v8128_v49  ;;  %v2995_v55 = vsel %vm2992_vm15, %v2994_v3, %v2990_v2  ;;  %v3084_v1 = vadd.f32 0.0036580483, %v3083_v14  ;;  %v2956_v15 = vmul.f32 %v2955_v53, %v2931_v32  ;;  %v954_v3 = vpop.f32.mrf.mxu0 }
 0x343   : > { %v2971_v21 = vmul.f32 %v2970_v44, %v7838_v43  ;;  %5532 = vrcp.f32 %v8198_v11  ;;  %v3096_v26 = vmul.f32 %v3095_v7, %v8117_v38  ;;  %v10060_v54 = vclamps-f32 %v7858_v57, 1.0 }
 0x344   : > { %v10061_v6 = vclamps-f32 %v7969_v63, 1.0  ;;  %v3046_v9 = vadd.f32 0.05243302, %v3045_v27  ;;  %v1898_v51 = vmul.f32 %v1897_v18, %v10049_v42  ;;  %v3007_v49 = vmul.f32 %v3006_v13, %v8021_v23 }
 0x345   : > { %v3836_v62 = vadd.f32 1.0, %v10060_v54  ;;  %v2996_v20 = vmul.f32 %v2995_v55, %v2971_v21  ;;  %v3060_v0 = vmul.f32 %v3059_v58, %v8055_v35  ;;  %v3122_v60 = vadd.f32 0.00028619796, %v3121_v39 }
 0x346   : > { %v3837_v46 = vadd.f32 1.0, %v10061_v6  ;;  %v10062_v43 = vclamps-f32 %v8068_v17, 1.0  ;;  %v5006_v45 = vclamps-f32 %v2876_v36, 1.0  ;;  %v5007_v25 = vclamps-f32 %v2916_v8, 1.0 }
 0x347   : > { %v3085_v57 = vmul.f32 %v3084_v1, %v8117_v38  ;;  %v1152_v40 = vmul.f32 0.5, %v7704_v50  ;;  %v5008_v63 = vclamps-f32 %v2956_v15, 1.0  ;;  %v3097_v48 = vadd.f32 0.112945676, %v3096_v26 }
 0x348   : > { %v3838_v59 = vadd.f32 1.0, %v10062_v43  ;;  %v3132_v52 = vmul.f32 3.8918573e-05, %v8186_v37  ;;  %v8221_v41 = vmul.f32 %v3836_v62, %v7596_v31  ;;  %v8224_v44 = vmul.f32 %v3837_v46, %v7621_v30 }
 0x349   : > { %v3047_v28 = vmul.f32 %v3046_v9, %v8055_v35  ;;  %v1899_v17 = vadd.f32 0.4994258, %v1898_v51  ;;  %v8227_v14 = vpop.eup %5532  ;;  %v5009_v2 = vclamps-f32 %v2996_v20, 1.0  ;;  %v3008_v7 = vadd.f32 0.18741608, %v3007_v49 }
 0x34a   : > { %v8229_v53 = vadd.f32 1.0, %v3060_v0  ;;  %v3123_v50 = vmul.f32 %v3122_v60, %v8186_v37  ;;  %v8233_v27 = vmul.f32 %v3838_v59, %v7628_v34  ;;  %v3839_v31 = vadd.f32 1.0, %v5006_v45 }
 0x34b   : > { %v3840_v18 = vadd.f32 1.0, %v5007_v25  ;;  %v3086_v32 = vadd.f32 0.05243302, %v3085_v57  ;;  %v1153_v30 = vmul.f32 0.5, %v7803_v22  ;;  %v3841_v13 = vadd.f32 1.0, %v5008_v63 }
 0x34c   : > { %10063 = vst [vmem:[#allocation46_spill] sm:$0xff] %v8233_v27  ;;  %v3098_v58 = vmul.f32 %v3097_v48, %v8117_v38  ;;  %v3133_v39 = vadd.f32 0.001143296, %v3132_v52  ;;  %v3023_v36 = vmul.f32 %v8227_v14, %v8198_v11  ;;  %v3048_v8 = vadd.f32 0.18741608, %v3047_v28  ;;  %v10067_v28 = vld [vmem:[#allocation60_spill] sm:$0xff] }
 0x34d   : > { %v955_v55 = vadd.f32 %v954_v3, %v6349_v10  ;;  %v1900_v1 = vmul.f32 %v1899_v17, %v10049_v42  ;;  %v3842_v15 = vadd.f32 1.0, %v5009_v2  ;;  %v3009_v34 = vmul.f32 %v3008_v7, %v8021_v23  ;;  %v10068_v2 = vld [vmem:[#allocation54_spill] sm:$0xff] }
 0x34e   : > { %5534 = vrcp.f32 %v8229_v53  ;;  %v3124_v21 = vadd.f32 0.0036580483, %v3123_v50  ;;  %v8244_v22 = vmul.f32 %v3839_v31, %v7669_v5  ;;  %v8246_v26 = vmul.f32 %v3840_v18, %v1152_v40 }
 0x34f   : > { %v1154_v54 = vmul.f32 0.5, %v7825_v56  ;;  %v3087_v62 = vmul.f32 %v3086_v32, %v8117_v38  ;;  %v8250_v6 = vmul.f32 %v3841_v13, %v1153_v30  ;;  %v8253_v46 = vmul.f32 0.5, %v7975_v16 }
 0x350   : > { %10064 = vst [vmem:[#allocation39_spill] sm:$0xff] %v8246_v26  ;;  %v3099_v42 = vadd.f32 0.4994258, %v3098_v58  ;;  %v3134_v23 = vmul.f32 %v3133_v39, %v8186_v37  ;;  %v3024_v9 = vsub.f32 1.0, %v3023_v36  ;;  %v3049_v51 = vmul.f32 %v3048_v8, %v8055_v35  ;;  %v1003_v36 = vpop.f32.mrf.mxu1 }
 0x351   : > { %10065 = vst [vmem:[#allocation49_spill] sm:$0xff] %v8250_v6  ;;  %v8257_v20 = vmul.f32 0.70710677, %v955_v55  ;;  %v8259_v5 = vadd.f32 1.0, %v1900_v1  ;;  %v8261_v49 = vmul.f32 %v3842_v15, %v1154_v54  ;;  %v3010_v56 = vadd.f32 1.1283791, %v3009_v34 }
 0x352   : > { %v8264_v0 = vmul.f32 0.5, %v8005_v4  ;;  %v3125_v60 = vmul.f32 %v3124_v21, %v8186_v37  ;;  %v8268_v16 = vmul.f32 0.5, %v8065_v47  ;;  %v3088_v43 = vadd.f32 0.18741608, %v3087_v62 }
 0x353   : > { %10066 = vst [vmem:[#allocation58_spill] sm:$0xff] %v8261_v49  ;;  %v8271_v59 = vmul.f32 0.5, %v8125_v24  ;;  %v8273_v35 = vmul.f32 0.5, %v955_v55  ;;  %v3031_v25 = vand.u32 2147483647, %v8198_v11  ;;  %v3033_v57 = vand.u32 2147483648, %v8198_v11 }
 0x354   : > { %v8275_v45 = vpop.eup %5534  ;;  %v3100_v4 = vmul.f32 %v3099_v42, %v8117_v38  ;;  %v3135_v40 = vadd.f32 0.014752088, %v3134_v23  ;;  %v3025_v63 = vmul.f32 %v8227_v14, %v3024_v9  ;;  %v3050_v48 = vadd.f32 1.1283791, %v3049_v51 }
 0x355   : > { %v3159_v47 = vmul.f32 %v8257_v20, %v8257_v20  ;;  %5536 = vrcp.f32 %v8259_v5  ;;  %v3011_v24 = vmul.f32 %v3010_v56, %v7988_v33  ;;  %v3126_v52 = vadd.f32 0.05243302, %v3125_v60 }
 0x356   : > { %v2052_v17 = vmul.f32 3.8918573e-05, %v10067_v28  ;;  %v1932_v7 = vmul.f32 3.8918573e-05, %v10068_v2  ;;  %vm3027_vm0 = vweird.f32 %v8198_v11  ;;  %v3063_v50 = vmul.f32 %v8275_v45, %v8229_v53 }
 0x357   : > { %v3073_v3 = vand.u32 2147483648, %v8229_v53  ;;  %v3089_v31 = vmul.f32 %v3088_v43, %v8117_v38  ;;  %v8292_v18 = vadd.f32 1.0, %v3100_v4  ;;  %v3136_v32 = vmul.f32 %v3135_v40, %v8186_v37  ;;  %v10073_v4 = vld [vmem:[#allocation64_spill] sm:$0xff] }
 0x358   : > { %v2053_v30 = vadd.f32 0.001143296, %v2052_v17  ;;  %v1933_v33 = vadd.f32 0.001143296, %v1932_v7  ;;  %v3026_v13 = vadd.f32 %v8227_v14, %v3025_v63  ;;  %vm3028_vm1 = vweird.f32 %v8227_v14  ;;  %v10075_v7 = vld [vmem:[#allocation37_spill] sm:$0xff] }
 0x359   : > { %vm8297_vm2 = vcmp.eq.f32.partialorder %v3031_v25, 8.507059e+37  ;;  %v8301_v39 = vmin.f32 %v3159_v47, 16.0  ;;  %v3034_v8 = vor.u32 1.1754944e-38, %v3033_v57  ;;  %v8304_v38 = vmul.f32 %v3050_v48, %v8024_v29  ;;  %vm8316_vm3 = vmor %vm3027_vm0, %vm3028_vm1  ;;  %v10074_v47 = vld [vmem:[#allocation55_spill] sm:$0xff] }
 0x35a   : > { %v3071_v55 = vand.u32 2147483647, %v8229_v53  ;;  %v3127_v1 = vmul.f32 %v3126_v52, %v8186_v37  ;;  %v3064_v34 = vsub.f32 1.0, %v3063_v50  ;;  %v8310_v21 = vor.u32 1.1754944e-38, %v3073_v3 }
 0x35b   : > { %v8308_v15 = vpop.eup %5536  ;;  %v2054_v54 = vmul.f32 %v2053_v30, %v10067_v28  ;;  %v1934_v62 = vmul.f32 %v1933_v33, %v10068_v2  ;;  %v3090_v29 = vadd.f32 1.1283791, %v3089_v31  ;;  %5538 = vrcp.f32 %v8292_v18 }
 0x35c   : > { %v3137_v23 = vadd.f32 0.112945676, %v3136_v32  ;;  %v1004_v9 = vadd.f32 %v1003_v36, %v6351_v12  ;;  %v3030_v51 = vsel %vm8316_vm3, %v8227_v14, %v3026_v13  ;;  %vm3067_vm4 = vweird.f32 %v8229_v53 }
 0x35d   : > { %v3161_v56 = vmul.f32 2.1237322e-06, %v8301_v39  ;;  %v2055_v60 = vadd.f32 0.014752088, %v2054_v54  ;;  %v1935_v11 = vadd.f32 0.014752088, %v1934_v62  ;;  %v1903_v57 = vmul.f32 %v8308_v15, %v8259_v5 }
 0x35e   : > { %v3128_v43 = vadd.f32 0.18741608, %v3127_v1  ;;  %v8327_v25 = vmul.f32 0.5, %v1004_v9  ;;  %v2092_v40 = vmul.f32 3.8918573e-05, %v10073_v4  ;;  %v3065_v63 = vmul.f32 %v8275_v45, %v3064_v34 }
 0x35f   : > { %v2056_v48 = vmul.f32 %v2055_v60, %v10067_v28  ;;  %v1936_v14 = vmul.f32 %v1935_v11, %v10068_v2  ;;  %v1972_v52 = vmul.f32 3.8918573e-05, %v10074_v47  ;;  %v3035_v17 = vsel %vm8297_vm2, %v3034_v8, %v3030_v51 }
 0x360   : > { %vm3068_vm5 = vweird.f32 %v8275_v45  ;;  %v8340_v50 = vmul.f32 %v3090_v29, %v10075_v7  ;;  %v3172_v3 = vmul.f32 3.8918573e-05, %v8301_v39  ;;  %v3138_v31 = vmul.f32 %v3137_v23, %v8186_v37 }
 0x361   : > { %v3162_v32 = vadd.f32 0.00028619796, %v3161_v56  ;;  %v2057_v30 = vadd.f32 0.112945676, %v2056_v48  ;;  %v1937_v33 = vadd.f32 0.112945676, %v1936_v14  ;;  %v8344_v13 = vpop.eup %5538  ;;  %v3036_v8 = vmul.f32 %v3035_v17, %v3011_v24  ;;  %vm8366_vm7 = vmor %vm3067_vm4, %vm3068_vm5 }
 0x362   : > { %v3113_v36 = vand.u32 2147483648, %v8292_v18  ;;  %v1904_v1 = vsub.f32 1.0, %v1903_v57  ;;  %v2093_v34 = vadd.f32 0.001143296, %v2092_v40  ;;  %v1973_v58 = vadd.f32 0.001143296, %v1972_v52 }
 0x363   : > { %v3066_v54 = vadd.f32 %v8275_v45, %v3065_v63  ;;  %v3129_v62 = vmul.f32 %v3128_v43, %v8186_v37  ;;  %v8349_v42 = vmul.f32 0.70710677, %v1004_v9  ;;  %vm8351_vm6 = vcmp.eq.f32.partialorder %v3071_v55, 8.507059e+37 }
 0x364   : > { %v3173_v23 = vadd.f32 0.001143296, %v3172_v3  ;;  %v2058_v51 = vmul.f32 %v2057_v30, %v10067_v28  ;;  %v1938_v56 = vmul.f32 %v1937_v33, %v10068_v2  ;;  %v2094_v60 = vmul.f32 %v2093_v34, %v10073_v4 }
 0x365   : > { %v3103_v24 = vmul.f32 %v8344_v13, %v8292_v18  ;;  %v3139_v11 = vadd.f32 0.4994258, %v3138_v31  ;;  %v3163_v57 = vmul.f32 %v3162_v32, %v8301_v39  ;;  %v1974_v9 = vmul.f32 %v1973_v58, %v10074_v47 }
 0x366   : > { %v1905_v43 = vmul.f32 %v8308_v15, %v1904_v1  ;;  %v2059_v40 = vadd.f32 0.4994258, %v2058_v51  ;;  %v1939_v63 = vadd.f32 0.4994258, %v1938_v56  ;;  %v2095_v48 = vadd.f32 0.014752088, %v2094_v60 }
 0x367   : > { %v5010_v14 = vclamps-f32 %v3036_v8, 1.0  ;;  %v3070_v52 = vsel %vm8366_vm7, %v8275_v45, %v3066_v54  ;;  %v3130_v17 = vadd.f32 1.1283791, %v3129_v62  ;;  %v1975_v7 = vadd.f32 0.014752088, %v1974_v9 }
 0x368   : > { %v3174_v3 = vmul.f32 %v3173_v23, %v8301_v39  ;;  %v2060_v53 = vmul.f32 %v2059_v40, %v10067_v28  ;;  %v1940_v31 = vmul.f32 %v1939_v63, %v10068_v2  ;;  %v2096_v32 = vmul.f32 %v2095_v48, %v10073_v4 }
 0x369   : > { %v3104_v30 = vsub.f32 1.0, %v3103_v24  ;;  %v3140_v33 = vmul.f32 %v3139_v11, %v8186_v37  ;;  %v3164_v1 = vadd.f32 0.0036580483, %v3163_v57  ;;  %v1976_v34 = vmul.f32 %v1975_v7, %v10074_v47  ;;  %v10080_v7 = vld [vmem:[#allocation68_spill] sm:$0xff] }
 0x36a   : > { %v3199_v58 = vmul.f32 %v8349_v42, %v8349_v42  ;;  %v1906_v45 = vadd.f32 %v8308_v15, %v1905_v43  ;;  %vm1908_vm8 = vweird.f32 %v8308_v15  ;;  %v8384_v8 = vadd.f32 1.0, %v2060_v53 }
 0x36b   : > { %v1913_v28 = vand.u32 2147483648, %v8259_v5  ;;  %v8387_v2 = vadd.f32 1.0, %v1940_v31  ;;  %v2097_v54 = vadd.f32 0.112945676, %v2096_v32  ;;  %v1977_v62 = vadd.f32 0.112945676, %v1976_v34 }
 0x36c   : > { %v3175_v23 = vadd.f32 0.014752088, %v3174_v3  ;;  %vm1907_vm9 = vweird.f32 %v8259_v5  ;;  %v1911_v37 = vand.u32 2147483647, %v8259_v5  ;;  %5540 = vrcp.f32 %v8384_v8 }
 0x36d   : > { %v3843_v51 = vadd.f32 1.0, %v5010_v14  ;;  %v3075_v56 = vsel %vm8351_vm6, %v8310_v21, %v3070_v52  ;;  %v3111_v60 = vand.u32 2147483647, %v8292_v18  ;;  %vm1909_vm10 = vmor %vm1907_vm9, %vm1908_vm8  ;;  %5542 = vrcp.f32 %v8387_v2 }
 0x36e   : > { %v3105_v24 = vmul.f32 %v8344_v13, %v3104_v30  ;;  %v8398_v11 = vadd.f32 1.0, %v3140_v33  ;;  %v3165_v57 = vmul.f32 %v3164_v1, %v8301_v39  ;;  %v1910_v5 = vsel %vm1909_vm10, %v8308_v15, %v1906_v45  ;;  %v10081_v1 = vld [vmem:[#allocation33_spill] sm:$0xff]  ;;  %v10082_v45 = vld [vmem:[#allocation30_spill] sm:$0xff] }
 0x36f   : > { %v8402_v9 = vmin.f32 %v3199_v58, 16.0  ;;  %v1914_v55 = vor.u32 1.1754944e-38, %v1913_v28  ;;  %v2098_v43 = vmul.f32 %v2097_v54, %v10073_v4  ;;  %v1978_v21 = vmul.f32 %v1977_v62, %v10074_v47 }
 0x370   : > { %v8406_v29 = vor.u32 1.1754944e-38, %v3113_v36  ;;  %v8409_v40 = vmul.f32 %v3130_v17, %v8152_v61  ;;  %v3176_v63 = vmul.f32 %v3175_v23, %v8301_v39  ;;  %vm1912_vm11 = vcmp.eq.f32.partialorder %v1911_v37, 8.507059e+37  ;;  %v1052_v61 = vpop.f32.mrf.mxu2 }
 0x371   : > { %v1915_v48 = vsel %vm1912_vm11, %v1914_v55, %v1910_v5  ;;  %v2099_v14 = vadd.f32 0.4994258, %v2098_v43  ;;  %v1979_v52 = vadd.f32 0.4994258, %v1978_v21  ;;  %v2132_v15 = vmul.f32 3.8918573e-05, %v10080_v7 }
 0x372   : > { %v5541_v3 = vpop.eup %5540  ;;  %v8414_v53 = vmul.f32 %v3843_v51, %v8253_v46  ;;  %v8417_v31 = vmul.f32 %v3075_v56, %v8304_v38  ;;  %v8420_v36 = vadd.f32 %v8344_v13, %v3105_v24  ;;  %vm3108_vm12 = vweird.f32 %v8344_v13  ;;  %v10083_v24 = vld [vmem:[#allocation57_spill] sm:$0xff] }
 0x373   : > { %5544 = vrcp.f32 %v8398_v11  ;;  %v5543_v17 = vpop.eup %5542  ;;  %v8424_v32 = vadd.f32 0.05243302, %v3165_v57  ;;  %v3201_v30 = vmul.f32 2.1237322e-06, %v8402_v9  ;;  %v2063_v33 = vmul.f32 %v5541_v3, %v8384_v8 }
 0x374   : > { %v2100_v46 = vmul.f32 %v2099_v14, %v10073_v4  ;;  %vm3107_vm13 = vweird.f32 %v8292_v18  ;;  %v3177_v38 = vadd.f32 0.112945676, %v3176_v63  ;;  %v1916_v34 = vmul.f32 %v1915_v48, %v10081_v1 }
 0x375   : > { %v1943_v58 = vmul.f32 %v5543_v17, %v8387_v2  ;;  %v8433_v28 = vadd.f32 %v1052_v61, %v10082_v45  ;;  %v2064_v54 = vsub.f32 1.0, %v2063_v33  ;;  %v1980_v23 = vmul.f32 %v1979_v52, %v10074_v47  ;;  %vm8469_vm5 = vmor %vm3107_vm13, %vm3108_vm12 }
 0x376   : > { %v8435_v62 = vadd.f32 1.0, %v2100_v46  ;;  %v2133_v37 = vadd.f32 0.001143296, %v2132_v15  ;;  %v2073_v51 = vand.u32 2147483648, %v8384_v8  ;;  %v2012_v57 = vmul.f32 3.8918573e-05, %v10083_v24  ;;  %v1101_v46 = vpop.f32.mrf.mxu3 }
 0x377   : > { %v1944_v56 = vsub.f32 1.0, %v1943_v58  ;;  %v8440_v4 = vmul.f32 0.70710677, %v8433_v28  ;;  %v2065_v5 = vmul.f32 %v5541_v3, %v2064_v54  ;;  %vm2068_vm14 = vweird.f32 %v5541_v3 }
 0x378   : > { %v2071_v55 = vand.u32 2147483647, %v8384_v8  ;;  %5546 = vrcp.f32 %v8435_v62  ;;  %vm1948_vm15 = vweird.f32 %v5543_v17  ;;  %v1953_v47 = vand.u32 2147483648, %v8387_v2 }
 0x379   : > { %v8445_v43 = vpop.eup %5544  ;;  %v1945_v21 = vmul.f32 %v5543_v17, %v1944_v56  ;;  %v3239_v63 = vmul.f32 %v8440_v4, %v8440_v4  ;;  %v2066_v48 = vadd.f32 %v5541_v3, %v2065_v5  ;;  %vm2067_vm0 = vweird.f32 %v8384_v8 }
 0x37a   : > { %v8451_v14 = vadd.f32 1.0, %v1980_v23  ;;  %v2134_v52 = vmul.f32 %v2133_v37, %v10080_v7  ;;  %vm2069_vm1 = vmor %vm2067_vm0, %vm2068_vm14  ;;  %v2074_v15 = vor.u32 1.1754944e-38, %v2073_v51  ;;  %vm1947_vm2 = vweird.f32 %v8387_v2 }
 0x37b   : > { %v1946_v61 = vadd.f32 %v5543_v17, %v1945_v21  ;;  %v1951_v33 = vand.u32 2147483647, %v8387_v2  ;;  %v4982_v1 = vclamps-f32 %v1916_v34, 1.0  ;;  %v2070_v58 = vsel %vm2069_vm1, %v5541_v3, %v2066_v48  ;;  %vm8457_vm4 = vmor %vm1947_vm2, %vm1948_vm15  ;;  %v10088_v3 = vld [vmem:[#allocation35_spill] sm:$0xff] }
 0x37c   : > { %vm2072_vm3 = vcmp.eq.f32.partialorder %v2071_v55, 8.507059e+37  ;;  %v2013_v8 = vadd.f32 0.001143296, %v2012_v57  ;;  %v1954_v51 = vor.u32 1.1754944e-38, %v1953_v47  ;;  %v8463_v56 = vmin.f32 %v3239_v63, 16.0 }
 0x37d   : > { %v2075_v23 = vsel %vm2072_vm3, %v2074_v15, %v2070_v58  ;;  %v1950_v37 = vsel %vm8457_vm4, %v5543_v17, %v1946_v61  ;;  %v8475_v57 = vadd.f32 %v1101_v46, %v9993_v19  ;;  %5548 = vrcp.f32 %v8451_v14 }
 0x37e   : > { %v5547_v5 = vpop.eup %5546  ;;  %v2076_v34 = vmul.f32 %v2075_v23, %v10088_v3  ;;  %v2135_v17 = vadd.f32 0.014752088, %v2134_v52  ;;  %v3110_v55 = vsel %vm8469_vm5, %v8344_v13, %v8420_v36  ;;  %v3212_v21 = vmul.f32 3.8918573e-05, %v8402_v9  ;;  %v10092_v23 = vld [vmem:[#allocation50_spill] sm:$0xff]  ;;  %v10093_v3 = vld [vmem:[#allocation65_spill] sm:$0xff] }
 0x37f   : > { %10089 = vst [vmem:[#allocation70_spill] sm:$0xff] %v8475_v57  ;;  %vm1952_vm6 = vcmp.eq.f32.partialorder %v1951_v33, 8.507059e+37  ;;  %v2103_v47 = vmul.f32 %v5547_v5, %v8435_v62  ;;  %v3178_v63 = vmul.f32 %v3177_v38, %v8301_v39  ;;  %v3815_v15 = vadd.f32 1.0, %v4982_v1 }
 0x380   : > { %v4986_v48 = vclamps-f32 %v2076_v34, 1.0  ;;  %v1955_v61 = vsel %vm1952_vm6, %v1954_v51, %v1950_v37  ;;  %vm8487_vm7 = vcmp.eq.f32.partialorder %v3111_v60, 8.507059e+37  ;;  %v3202_v52 = vadd.f32 0.00028619796, %v3201_v30  ;;  %v10094_v34 = vld [vmem:[#allocation74_spill] sm:$0xff] }
 0x381   : > { %v2104_v58 = vsub.f32 1.0, %v2103_v47  ;;  %v3252_v13 = vmul.f32 3.8918573e-05, %v8463_v56  ;;  %v2014_v36 = vmul.f32 %v2013_v8, %v10083_v24  ;;  %v2113_v54 = vand.u32 2147483648, %v8435_v62 }
 0x382   : > { %v3819_v33 = vadd.f32 1.0, %v4986_v48  ;;  %v8495_v38 = vmul.f32 0.70710677, %v8475_v57  ;;  %v2136_v1 = vmul.f32 %v2135_v17, %v10080_v7  ;;  %v1956_v18 = vmul.f32 %v1955_v61, %v10092_v23 }
 0x383   : > { %v2105_v60 = vmul.f32 %v5547_v5, %v2104_v58  ;;  %vm2108_vm8 = vweird.f32 %v5547_v5  ;;  %v2111_v37 = vand.u32 2147483647, %v8435_v62  ;;  %v8500_v30 = vpop.eup %5548  ;;  %v3179_v51 = vadd.f32 0.4994258, %v3178_v63 }
 0x384   : > { %v3213_v2 = vadd.f32 0.001143296, %v3212_v21  ;;  %v3879_v8 = vmul.f32 %v3815_v15, %v10093_v3  ;;  %v3883_v47 = vmul.f32 %v3819_v33, %v10094_v34  ;;  %vm2107_vm9 = vweird.f32 %v8435_v62 }
 0x385   : > { %v2106_v48 = vadd.f32 %v5547_v5, %v2105_v60  ;;  %v3253_v57 = vadd.f32 0.001143296, %v3252_v13  ;;  %v2015_v49 = vadd.f32 0.014752088, %v2014_v36  ;;  %vm2109_vm10 = vmor %vm2107_vm9, %vm2108_vm8  ;;  %v2114_v61 = vor.u32 1.1754944e-38, %v2113_v54  ;;  %v10095_v54 = vld [vmem:[#allocation92_spill] sm:$0xff] }
 0x386   : > { %v3935_v17 = vpack.c.bf16 %v3883_v47, %v3879_v8  ;;  %v3279_v58 = vmul.f32 %v8495_v38, %v8495_v38  ;;  %v2137_v23 = vadd.f32 0.112945676, %v2136_v1  ;;  %v4983_v27 = vclamps-f32 %v1956_v18, 1.0 }
 0x387   : > { %v2110_v6 = vsel %vm2109_vm10, %v5547_v5, %v2106_v48  ;;  %vm2112_vm11 = vcmp.eq.f32.partialorder %v2111_v37, 8.507059e+37  ;;  %v1983_v21 = vmul.f32 %v8500_v30, %v8451_v14  ;;  %v3143_v63 = vmul.f32 %v8445_v43, %v8398_v11 }
 0x388   : > { %v3203_v62 = vmul.f32 %v3202_v52, %v8402_v9  ;;  %v3214_v15 = vmul.f32 %v3213_v2, %v8402_v9  ;;  %4237 = vmatmul.bf16.gmra.mxu0 %v3935_v17  ;;  %v2115_v13 = vsel %vm2112_vm11, %v2114_v61, %v2110_v6  ;;  %v5011_v36 = vclamps-f32 %v8417_v31, 1.0  ;;  %v10096_v61 = vld [vmem:[#allocation66_spill] sm:$0xff] }
 0x389   : > { %v3151_v33 = vand.u32 2147483647, %v8398_v11  ;;  %v2116_v1 = vmul.f32 %v2115_v13, %v10095_v54  ;;  %v3254_v5 = vmul.f32 %v3253_v57, %v8463_v56  ;;  %v3115_v18 = vsel %vm8487_vm7, %v8406_v29, %v3110_v55 }
 0x38a   : > { %v3180_v60 = vmul.f32 %v3179_v51, %v8301_v39  ;;  %v8521_v37 = vmin.f32 %v3279_v58, 16.0  ;;  %v2138_v52 = vmul.f32 %v2137_v23, %v10080_v7  ;;  %v3816_v6 = vadd.f32 1.0, %v4983_v27  ;;  %v10097_v23 = vld [vmem:[#allocation75_spill] sm:$0xff] }
 0x38b   : > { %v4987_v2 = vclamps-f32 %v2116_v1, 1.0  ;;  %v1984_v3 = vsub.f32 1.0, %v1983_v21  ;;  %v2016_v31 = vmul.f32 %v2015_v49, %v10083_v24  ;;  %v3144_v8 = vsub.f32 1.0, %v3143_v63 }
 0x38c   : > { %v3167_v34 = vmul.f32 %v8424_v32, %v8301_v39  ;;  %v3204_v57 = vadd.f32 0.0036580483, %v3203_v62  ;;  %v3215_v47 = vadd.f32 0.014752088, %v3214_v15  ;;  %v3153_v46 = vand.u32 2147483648, %v8398_v11 }
 0x38d   : > { %v3820_v29 = vadd.f32 1.0, %v4987_v2  ;;  %v3255_v55 = vadd.f32 0.014752088, %v3254_v5  ;;  %v2139_v51 = vadd.f32 0.4994258, %v2138_v52  ;;  %v3116_v48 = vmul.f32 %v3115_v18, %v8340_v50  ;;  %v10098_v2 = vld [vmem:[#allocation73_spill] sm:$0xff] }
 0x38e   : > { %vm3147_vm12 = vweird.f32 %v8398_v11  ;;  %v8530_v17 = vadd.f32 1.0, %v3180_v60  ;;  %v3292_v27 = vmul.f32 3.8918573e-05, %v8521_v37  ;;  %v2017_v49 = vadd.f32 0.112945676, %v2016_v31 }
 0x38f   : > { %v3880_v58 = vmul.f32 %v3816_v6, %v10096_v61  ;;  %v3884_v32 = vmul.f32 %v3820_v29, %v10097_v23  ;;  %v1985_v21 = vmul.f32 %v8500_v30, %v1984_v3  ;;  %v2140_v63 = vmul.f32 %v2139_v51, %v10080_v7 }
 0x390   : > { %v3844_v62 = vadd.f32 1.0, %v5011_v36  ;;  %v3145_v15 = vmul.f32 %v8445_v43, %v3144_v8  ;;  %v3168_v13 = vadd.f32 0.18741608, %v3167_v34  ;;  %v3216_v50 = vmul.f32 %v3215_v47, %v8402_v9 }
 0x391   : > { %v3936_v54 = vpack.c.bf16 %v3884_v32, %v3880_v58  ;;  %v3256_v1 = vmul.f32 %v3255_v55, %v8463_v56  ;;  %v8540_v5 = vadd.f32 1.0, %v2140_v63  ;;  %v2018_v18 = vmul.f32 %v2017_v49, %v10083_v24 }
 0x392   : > { %v5012_v60 = vclamps-f32 %v3116_v48, 1.0  ;;  %5550 = vrcp.f32 %v8530_v17  ;;  %v3205_v52 = vmul.f32 %v3204_v57, %v8402_v9  ;;  %v2172_v7 = vmul.f32 3.8918573e-05, %v10098_v2 }
 0x393   : > { %4286 = vmatmul.bf16.gmra.mxu1 %v3936_v54  ;;  %v3293_v36 = vadd.f32 0.001143296, %v3292_v27  ;;  %v1986_v6 = vadd.f32 %v8500_v30, %v1985_v21  ;;  %vm1988_vm13 = vweird.f32 %v8500_v30  ;;  %5552 = vrcp.f32 %v8540_v5 }
 0x394   : > { %v3146_v3 = vadd.f32 %v8445_v43, %v3145_v15  ;;  %vm3148_vm14 = vweird.f32 %v8445_v43  ;;  %v3217_v31 = vadd.f32 0.112945676, %v3216_v50  ;;  %v1993_v8 = vand.u32 2147483648, %v8451_v14 }
 0x395   : > { %v3257_v34 = vadd.f32 0.112945676, %v3256_v1  ;;  %vm1987_vm15 = vweird.f32 %v8451_v14  ;;  %v1991_v57 = vand.u32 2147483647, %v8451_v14  ;;  %v2019_v47 = vadd.f32 0.4994258, %v2018_v18  ;;  %vm8565_vm2 = vmor %vm3147_vm12, %vm3148_vm14 }
 0x396   : > { %v3845_v29 = vadd.f32 1.0, %v5012_v60  ;;  %vm8554_vm0 = vcmp.eq.f32.partialorder %v3151_v33, 8.507059e+37  ;;  %v3169_v51 = vmul.f32 %v3168_v13, %v8301_v39  ;;  %vm8559_vm1 = vmor %vm1987_vm15, %vm1988_vm13  ;;  %v2173_v27 = vadd.f32 0.001143296, %v2172_v7 }
 0x397   : > { %v3206_v14 = vadd.f32 0.05243302, %v3205_v52  ;;  %v3294_v61 = vmul.f32 %v3293_v36, %v8521_v37  ;;  %v1990_v33 = vsel %vm8559_vm1, %v8500_v30, %v1986_v6  ;;  %v2020_v39 = vmul.f32 %v2019_v47, %v10083_v24  ;;  %v10107_v36 = vld [vmem:[#allocation34_spill] sm:$0xff] }
 0x398   : > { %v8574_v58 = vpop.eup %5550  ;;  %v3150_v23 = vsel %vm8565_vm2, %v8445_v43, %v3146_v3  ;;  %v3218_v11 = vmul.f32 %v3217_v31, %v8402_v9  ;;  %v1994_v32 = vor.u32 1.1754944e-38, %v1993_v8  ;;  %v2174_v21 = vmul.f32 %v2173_v27, %v10098_v2 }
 0x399   : > { %v5553_v63 = vpop.eup %5552  ;;  %v8582_v15 = vmul.f32 %v3844_v62, %v8264_v0  ;;  %v3154_v13 = vor.u32 1.1754944e-38, %v3153_v46  ;;  %v3258_v30 = vmul.f32 %v3257_v34, %v8463_v56  ;;  %vm1992_vm3 = vcmp.eq.f32.partialorder %v1991_v57, 8.507059e+37 }
 0x39a   : > { %v8586_v24 = vmul.f32 %v3845_v29, %v8268_v16  ;;  %v3170_v50 = vadd.f32 1.1283791, %v3169_v51  ;;  %v1995_v54 = vsel %vm1992_vm3, %v1994_v32, %v1990_v33  ;;  %v2143_v43 = vmul.f32 %v5553_v63, %v8540_v5 }
 0x39b   : > { %10105 = vst [vmem:[#allocation44_spill] sm:$0xff] %v8582_v15  ;;  %v3155_v1 = vsel %vm8554_vm0, %v3154_v13, %v3150_v23  ;;  %v3295_v18 = vadd.f32 0.014752088, %v3294_v61  ;;  %v8591_v60 = vadd.f32 1.0, %v2020_v39  ;;  %v2175_v52 = vadd.f32 0.014752088, %v2174_v21 }
 0x39c   : > { %10106 = vst [vmem:[#allocation36_spill] sm:$0xff] %v8586_v24  ;;  %v3183_v0 = vmul.f32 %v8574_v58, %v8530_v17  ;;  %v3207_v46 = vmul.f32 %v3206_v14, %v8402_v9  ;;  %v3219_v62 = vadd.f32 0.4994258, %v3218_v11  ;;  %v2144_v7 = vsub.f32 1.0, %v2143_v43 }
 0x39d   : > { %v3259_v16 = vadd.f32 0.4994258, %v3258_v30  ;;  %v1996_v6 = vmul.f32 %v1995_v54, %v10107_v36  ;;  %v2153_v3 = vand.u32 2147483648, %v8540_v5  ;;  %5554 = vrcp.f32 %v8591_v60 }
 0x39e   : > { %v2145_v31 = vmul.f32 %v5553_v63, %v2144_v7  ;;  %vm2148_vm4 = vweird.f32 %v5553_v63  ;;  %v2151_v8 = vand.u32 2147483647, %v8540_v5  ;;  %v2176_v34 = vmul.f32 %v2175_v52, %v10098_v2 }
 0x39f   : > { %v3156_v57 = vmul.f32 %v3155_v1, %v8409_v40  ;;  %v8603_v47 = vmul.f32 %v3170_v50, %v8257_v20  ;;  %v3191_v29 = vand.u32 2147483647, %v8530_v17  ;;  %v3296_v55 = vmul.f32 %v3295_v18, %v8521_v37  ;;  %v10108_v50 = vld [vmem:[#allocation94_spill] sm:$0xff] }
 0x3a0   : > { %v3208_v51 = vadd.f32 0.18741608, %v3207_v46  ;;  %v3220_v48 = vmul.f32 %v3219_v62, %v8402_v9  ;;  %v2146_v27 = vadd.f32 %v5553_v63, %v2145_v31  ;;  %vm2147_vm5 = vweird.f32 %v8540_v5 }
 0x3a1   : > { %v3184_v49 = vsub.f32 1.0, %v3183_v0  ;;  %v3241_v14 = vmul.f32 2.1237322e-06, %v8463_v56  ;;  %vm2149_vm6 = vmor %vm2147_vm5, %vm2148_vm4  ;;  %v2154_v61 = vor.u32 1.1754944e-38, %v2153_v3  ;;  %v2177_v33 = vadd.f32 0.112945676, %v2176_v34 }
 0x3a2   : > { %v3260_v40 = vmul.f32 %v3259_v16, %v8463_v56  ;;  %v4984_v20 = vclamps-f32 %v1996_v6, 1.0  ;;  %v2150_v39 = vsel %vm2149_vm6, %v5553_v63, %v2146_v27  ;;  %vm2152_vm7 = vcmp.eq.f32.partialorder %v2151_v8, 8.507059e+37  ;;  %v956_v16 = vpop.f32.mrf.mxu0 }
 0x3a3   : > { %v8611_v23 = vpop.eup %5554  ;;  %v3193_v11 = vand.u32 2147483648, %v8530_v17  ;;  %v3297_v32 = vadd.f32 0.112945676, %v3296_v55  ;;  %v2155_v21 = vsel %vm2152_vm7, %v2154_v61, %v2150_v39  ;;  %v2178_v13 = vmul.f32 %v2177_v33, %v10098_v2  ;;  %v1005_v33 = vpop.f32.mrf.mxu1 }
 0x3a4   : > { %v5013_v5 = vclamps-f32 %v3156_v57, 1.0  ;;  %v3209_v30 = vmul.f32 %v3208_v51, %v8402_v9  ;;  %v2156_v54 = vmul.f32 %v2155_v21, %v10108_v50  ;;  %v2023_v43 = vmul.f32 %v8611_v23, %v8591_v60 }
 0x3a5   : > { %v3185_v1 = vmul.f32 %v8574_v58, %v3184_v49  ;;  %vm3187_vm8 = vweird.f32 %v8530_v17  ;;  %v8621_v63 = vadd.f32 1.0, %v3220_v48  ;;  %v3242_v18 = vadd.f32 0.00028619796, %v3241_v14  ;;  %v10112_v49 = vld [vmem:[#allocation79_spill] sm:$0xff] }
 0x3a6   : > { %v2179_v52 = vadd.f32 0.4994258, %v2178_v13  ;;  %v8623_v0 = vadd.f32 1.0, %v3260_v40  ;;  %v4988_v46 = vclamps-f32 %v2156_v54, 1.0  ;;  %v3817_v62 = vadd.f32 1.0, %v4984_v20  ;;  %v10117_v54 = vld [vmem:[#allocation81_spill] sm:$0xff] }
 0x3a7   : > { %v2024_v7 = vsub.f32 1.0, %v2023_v43  ;;  %v3281_v9 = vmul.f32 2.1237322e-06, %v8521_v37  ;;  %v3298_v36 = vmul.f32 %v3297_v32, %v8521_v37  ;;  %v8629_v3 = vadd.f32 %v956_v16, %v6349_v10 }
 0x3a8   : > { %v2180_v6 = vmul.f32 %v2179_v52, %v10098_v2  ;;  %vm3188_vm9 = vweird.f32 %v8574_v58  ;;  %v3194_v31 = vor.u32 1.1754944e-38, %v3193_v11  ;;  %v3821_v8 = vadd.f32 1.0, %v4988_v46  ;;  %v10111_v2 = vld [vmem:[#allocation67_spill] sm:$0xff] }
 0x3a9   : > { %v2025_v34 = vmul.f32 %v8611_v23, %v2024_v7  ;;  %v3186_v57 = vadd.f32 %v8574_v58, %v3185_v1  ;;  %vm8634_vm10 = vcmp.eq.f32.partialorder %v3191_v29, 8.507059e+37  ;;  %v3210_v51 = vadd.f32 1.1283791, %v3209_v30  ;;  %vm8666_vm12 = vmor %vm3187_vm8, %vm3188_vm9  ;;  %v1054_v1 = vpop.f32.mrf.mxu2 }
 0x3aa   : > { %5556 = vrcp.f32 %v8621_v63  ;;  %v8639_v48 = vadd.f32 1.0, %v2180_v6  ;;  %v3881_v27 = vmul.f32 %v3817_v62, %v10111_v2  ;;  %v3885_v14 = vmul.f32 %v3821_v8, %v10112_v49 }
 0x3ab   : > { %5558 = vrcp.f32 %v8623_v0  ;;  %v8645_v61 = vmul.f32 0.70710677, %v8629_v3  ;;  %v3243_v29 = vmul.f32 %v3242_v18, %v8463_v56  ;;  %v3282_v40 = vadd.f32 0.00028619796, %v3281_v9 }
 0x3ac   : > { %v3299_v20 = vadd.f32 0.4994258, %v3298_v36  ;;  %5560 = vrcp.f32 %v8639_v48  ;;  %v3937_v39 = vpack.c.bf16 %v3885_v14, %v3881_v27  ;;  %v2026_v11 = vadd.f32 %v8611_v23, %v2025_v34 }
 0x3ad   : > { %vm2028_vm11 = vweird.f32 %v8611_v23  ;;  %v3319_v32 = vmul.f32 %v8645_v61, %v8645_v61  ;;  %v8653_v21 = vadd.f32 1.0, %v5013_v5  ;;  %v8656_v13 = vmul.f32 %v3210_v51, %v8349_v42 }
 0x3ae   : > { %v2033_v30 = vand.u32 2147483648, %v8591_v60  ;;  %v8660_v50 = vadd.f32 %v1005_v33, %v6351_v12  ;;  %4335 = vmatmul.bf16.gmra.mxu2 %v3937_v39  ;;  %vm2027_vm13 = vweird.f32 %v8591_v60  ;;  %v2031_v42 = vand.u32 2147483647, %v8591_v60 }
 0x3af   : > { %v8673_v5 = vmin.f32 %v3319_v32, 16.0  ;;  %v3190_v17 = vsel %vm8666_vm12, %v8574_v58, %v3186_v57  ;;  %v3300_v52 = vmul.f32 %v3299_v20, %v8521_v37  ;;  %vm8683_vm14 = vmor %vm2027_vm13, %vm2028_vm11  ;;  %v8691_v60 = vadd.f32 %v1054_v1, %v10082_v45 }
 0x3b0   : > { %v8675_v18 = vpop.eup %5556  ;;  %v8688_v62 = vmul.f32 0.70710677, %v8660_v50  ;;  %v3244_v16 = vadd.f32 0.0036580483, %v3243_v29  ;;  %v3283_v9 = vmul.f32 %v3282_v40, %v8521_v37  ;;  %v2030_v58 = vsel %vm8683_vm14, %v8611_v23, %v2026_v11 }
 0x3b1   : > { %v8693_v7 = vpop.eup %5558  ;;  %v3332_v36 = vmul.f32 3.8918573e-05, %v8673_v5  ;;  %v3233_v8 = vand.u32 2147483648, %v8621_v63  ;;  %v2034_v34 = vor.u32 1.1754944e-38, %v2033_v30  ;;  %v8704_v51 = vmul.f32 0.70710677, %v8691_v60 }
 0x3b2   : > { %v5561_v6 = vpop.eup %5560  ;;  %v3359_v57 = vmul.f32 %v8688_v62, %v8688_v62  ;;  %v3195_v2 = vsel %vm8634_vm10, %v3194_v31, %v3190_v17  ;;  %v3223_v27 = vmul.f32 %v8675_v18, %v8621_v63  ;;  %vm2032_vm15 = vcmp.eq.f32.partialorder %v2031_v42, 8.507059e+37 }
 0x3b3   : > { %v2183_v23 = vmul.f32 %v5561_v6, %v8639_v48  ;;  %v8711_v49 = vadd.f32 1.0, %v3300_v52  ;;  %v2035_v14 = vsel %vm2032_vm15, %v2034_v34, %v2030_v58  ;;  %v3333_v33 = vadd.f32 0.001143296, %v3332_v36  ;;  %v1103_v34 = vpop.f32.mrf.mxu3 }
 0x3b4   : > { %v8713_v29 = vmin.f32 %v3359_v57, 16.0  ;;  %v3245_v40 = vmul.f32 %v3244_v16, %v8463_v56  ;;  %v3284_v20 = vadd.f32 0.0036580483, %v3283_v9  ;;  %v3399_v55 = vmul.f32 %v8704_v51, %v8704_v51 }
 0x3b5   : > { %v2184_v39 = vsub.f32 1.0, %v2183_v23  ;;  %v3263_v31 = vmul.f32 %v8693_v7, %v8623_v0  ;;  %v2193_v11 = vand.u32 2147483648, %v8639_v48  ;;  %v3334_v32 = vmul.f32 %v3333_v33, %v8673_v5  ;;  %v10118_v33 = vld [vmem:[#allocation76_spill] sm:$0xff] }
 0x3b6   : > { %v3372_v30 = vmul.f32 3.8918573e-05, %v8713_v29  ;;  %v2036_v42 = vmul.f32 %v2035_v14, %v10117_v54  ;;  %vm2188_vm0 = vweird.f32 %v5561_v6  ;;  %v2191_v17 = vand.u32 2147483647, %v8639_v48 }
 0x3b7   : > { %v2185_v1 = vmul.f32 %v5561_v6, %v2184_v39  ;;  %v3224_v52 = vsub.f32 1.0, %v3223_v27  ;;  %5562 = vrcp.f32 %v8711_v49  ;;  %v3335_v46 = vadd.f32 0.014752088, %v3334_v32 }
 0x3b8   : > { %v3373_v16 = vadd.f32 0.001143296, %v3372_v30  ;;  %v3246_v9 = vadd.f32 0.05243302, %v3245_v40  ;;  %vm2187_vm1 = vweird.f32 %v8639_v48  ;;  %v8727_v36 = vmin.f32 %v3399_v55, 16.0 }
 0x3b9   : > { %v2186_v58 = vadd.f32 %v5561_v6, %v2185_v1  ;;  %v3285_v57 = vmul.f32 %v3284_v20, %v8521_v37  ;;  %vm2189_vm2 = vmor %vm2187_vm1, %vm2188_vm0  ;;  %v2194_v23 = vor.u32 1.1754944e-38, %v2193_v11  ;;  %v3336_v14 = vmul.f32 %v3335_v46, %v8673_v5  ;;  %v10120_v20 = vld [vmem:[#allocation95_spill] sm:$0xff] }
 0x3ba   : > { %v2212_v39 = vmul.f32 3.8918573e-05, %v10118_v33  ;;  %v3264_v27 = vsub.f32 1.0, %v3263_v31  ;;  %v4985_v54 = vclamps-f32 %v2036_v42, 1.0  ;;  %vm2192_vm3 = vcmp.eq.f32.partialorder %v2191_v17, 8.507059e+37 }
 0x3bb   : > { %v2190_v43 = vsel %vm2189_vm2, %v5561_v6, %v2186_v58  ;;  %v3337_v40 = vadd.f32 0.112945676, %v3336_v14  ;;  %v3374_v30 = vmul.f32 %v3373_v16, %v8713_v29  ;;  %v8734_v48 = vadd.f32 %v1103_v34, %v9993_v19 }
 0x3bc   : > { %v2195_v32 = vsel %vm2192_vm3, %v2194_v23, %v2190_v43  ;;  %v8736_v55 = vor.u32 1.1754944e-38, %v3233_v8  ;;  %v3321_v11 = vmul.f32 2.1237322e-06, %v8673_v5  ;;  %v3412_v46 = vmul.f32 3.8918573e-05, %v8727_v36 }
 0x3bd   : > { %10119 = vst [vmem:[#allocation48_spill] sm:$0xff] %v8734_v48  ;;  %v2196_v1 = vmul.f32 %v2195_v32, %v10120_v20  ;;  %v8741_v24 = vpop.eup %5562  ;;  %v8744_v6 = vmul.f32 %v3195_v2, %v8603_v47  ;;  %v3225_v43 = vmul.f32 %v8675_v18, %v3224_v52  ;;  %vm3227_vm4 = vweird.f32 %v8621_v63 }
 0x3be   : > { %vm3228_vm5 = vweird.f32 %v8675_v18  ;;  %v3338_v8 = vmul.f32 %v3337_v40, %v8673_v5  ;;  %v3247_v31 = vmul.f32 %v3246_v9, %v8463_v56  ;;  %v3286_v42 = vadd.f32 0.05243302, %v3285_v57 }
 0x3bf   : > { %v4989_v17 = vclamps-f32 %v2196_v1, 1.0  ;;  %v3818_v16 = vadd.f32 1.0, %v4985_v54  ;;  %v3265_v58 = vmul.f32 %v8693_v7, %v3264_v27  ;;  %v3375_v34 = vadd.f32 0.014752088, %v3374_v30  ;;  %v10124_v1 = vld [vmem:[#allocation71_spill] sm:$0xff]  ;;  %vm8782_vm8 = vmor %vm3227_vm4, %vm3228_vm5 }
 0x3c0   : > { %v8753_v23 = vmul.f32 0.70710677, %v8734_v48  ;;  %v2213_v47 = vadd.f32 0.001143296, %v2212_v39  ;;  %v3303_v2 = vmul.f32 %v8741_v24, %v8711_v49  ;;  %v3322_v14 = vadd.f32 0.00028619796, %v3321_v11 }
 0x3c1   : > { %v3822_v52 = vadd.f32 1.0, %v4989_v17  ;;  %v3413_v32 = vadd.f32 0.001143296, %v3412_v46  ;;  %v3226_v40 = vadd.f32 %v8675_v18, %v3225_v43  ;;  %v10121_v9 = vand.u32 2147483647, %v8621_v63  ;;  %v10125_v11 = vld [vmem:[#allocation42_spill] sm:$0xff] }
 0x3c2   : > { %v3339_v27 = vadd.f32 0.4994258, %v3338_v8  ;;  %v3361_v54 = vmul.f32 2.1237322e-06, %v8713_v29  ;;  %v3401_v30 = vmul.f32 2.1237322e-06, %v8727_v36  ;;  %v3287_v20 = vmul.f32 %v3286_v42, %v8521_v37 }
 0x3c3   : > { %vm8760_vm6 = vcmp.eq.f32.partialorder %v10121_v9, 8.507059e+37  ;;  %v3248_v39 = vadd.f32 0.18741608, %v3247_v31  ;;  %v3882_v17 = vmul.f32 %v3818_v16, %v10124_v1  ;;  %v3886_v46 = vmul.f32 %v3822_v52, %v10125_v11 }
 0x3c4   : > { %vm3268_vm7 = vweird.f32 %v8693_v7  ;;  %v3376_v43 = vmul.f32 %v3375_v34, %v8713_v29  ;;  %v3439_v9 = vmul.f32 %v8753_v23, %v8753_v23  ;;  %v2214_v8 = vmul.f32 %v2213_v47, %v10118_v33 }
 0x3c5   : > { %v3266_v48 = vadd.f32 %v8693_v7, %v3265_v58  ;;  %v3304_v15 = vsub.f32 1.0, %v3303_v2  ;;  %v3938_v26 = vpack.c.bf16 %v3886_v46, %v3882_v17  ;;  %v3414_v31 = vmul.f32 %v3413_v32, %v8727_v36 }
 0x3c6   : > { %v3323_v42 = vmul.f32 %v3322_v14, %v8673_v5  ;;  %v3340_v16 = vmul.f32 %v3339_v27, %v8673_v5  ;;  %v3362_v52 = vadd.f32 0.00028619796, %v3361_v54  ;;  %v3402_v1 = vadd.f32 0.00028619796, %v3401_v30 }
 0x3c7   : > { %v3249_v58 = vmul.f32 %v3248_v39, %v8463_v56  ;;  %vm3267_vm9 = vweird.f32 %v8623_v0  ;;  %v3271_v47 = vand.u32 2147483647, %v8623_v0  ;;  %v3273_v2 = vand.u32 2147483648, %v8623_v0  ;;  %4384 = vmatmul.bf16.gmra.mxu3 %v3938_v26 }
 0x3c8   : > { %v3230_v14 = vsel %vm8782_vm8, %v8675_v18, %v3226_v40  ;;  %vm8795_vm10 = vmor %vm3267_vm9, %vm3268_vm7  ;;  %v3288_v32 = vadd.f32 0.18741608, %v3287_v20  ;;  %v3377_v27 = vadd.f32 0.112945676, %v3376_v43  ;;  %v8799_v56 = vmin.f32 %v3439_v9, 16.0  ;;  %v959_v43 = vpop.f32.mrf.mxu0 }
 0x3c9   : > { %v3270_v54 = vsel %vm8795_vm10, %v8693_v7, %v3266_v48  ;;  %v3305_v26 = vmul.f32 %v8741_v24, %v3304_v15  ;;  %v3415_v0 = vadd.f32 0.014752088, %v3414_v31  ;;  %v2215_v30 = vadd.f32 0.014752088, %v2214_v8 }
 0x3ca   : > { %v3324_v39 = vadd.f32 0.0036580483, %v3323_v42  ;;  %v8805_v18 = vadd.f32 1.0, %v3340_v16  ;;  %v3363_v40 = vmul.f32 %v3362_v52, %v8713_v29  ;;  %v3403_v17 = vmul.f32 %v3402_v1, %v8727_v36 }
 0x3cb   : > { %v3235_v20 = vsel %vm8760_vm6, %v8736_v55, %v3230_v14  ;;  %v3250_v11 = vadd.f32 1.1283791, %v3249_v58  ;;  %vm3272_vm11 = vcmp.eq.f32.partialorder %v3271_v47, 8.507059e+37  ;;  %v3274_v46 = vor.u32 1.1754944e-38, %v3273_v2 }
 0x3cc   : > { %v3289_v7 = vmul.f32 %v3288_v32, %v8521_v37  ;;  %vm3308_vm12 = vweird.f32 %v8741_v24  ;;  %v3378_v15 = vmul.f32 %v3377_v27, %v8713_v29  ;;  %v3441_v48 = vmul.f32 2.1237322e-06, %v8799_v56 }
 0x3cd   : > { %v3275_v9 = vsel %vm3272_vm11, %v3274_v46, %v3270_v54  ;;  %v3306_v8 = vadd.f32 %v8741_v24, %v3305_v26  ;;  %v3416_v31 = vmul.f32 %v3415_v0, %v8727_v36  ;;  %v2216_v57 = vmul.f32 %v2215_v30, %v10118_v33 }
 0x3ce   : > { %v3325_v55 = vmul.f32 %v3324_v39, %v8673_v5  ;;  %5564 = vrcp.f32 %v8805_v18  ;;  %v3364_v42 = vadd.f32 0.0036580483, %v3363_v40  ;;  %v3404_v37 = vadd.f32 0.0036580483, %v3403_v17 }
 0x3cf   : > { %v3236_v16 = vmul.f32 %v3235_v20, %v8656_v13  ;;  %v3251_v52 = vmul.f32 %v3250_v11, %v8440_v4  ;;  %v3313_v1 = vand.u32 2147483648, %v8711_v49  ;;  %v8825_v34 = vadd.f32 %v959_v43, %v6349_v10 }
 0x3d0   : > { %vm3307_vm13 = vweird.f32 %v8711_v49  ;;  %v3311_v58 = vand.u32 2147483647, %v8711_v49  ;;  %v3379_v47 = vadd.f32 0.4994258, %v3378_v15  ;;  %v3442_v2 = vadd.f32 0.00028619796, %v3441_v48 }
 0x3d1   : > { %v3276_v14 = vmul.f32 %v3275_v9, %v3251_v52  ;;  %v3290_v63 = vadd.f32 1.1283791, %v3289_v7  ;;  %vm8831_vm14 = vmor %vm3307_vm13, %vm3308_vm12  ;;  %v3417_v4 = vadd.f32 0.112945676, %v3416_v31  ;;  %v2217_v13 = vadd.f32 0.112945676, %v2216_v57 }
 0x3d2   : > { %v3310_v27 = vsel %vm8831_vm14, %v8741_v24, %v3306_v8  ;;  %v3326_v54 = vadd.f32 0.05243302, %v3325_v55  ;;  %v3365_v26 = vmul.f32 %v3364_v42, %v8713_v29  ;;  %v3405_v49 = vmul.f32 %v3404_v37, %v8727_v36  ;;  %v1008_v8 = vpop.f32.mrf.mxu1 }
 0x3d3   : > { %v5014_v0 = vclamps-f32 %v8744_v6, 1.0  ;;  %v3314_v30 = vor.u32 1.1754944e-38, %v3313_v1  ;;  %v3452_v39 = vmul.f32 3.8918573e-05, %v8799_v56  ;;  %v8843_v40 = vmul.f32 0.70710677, %v8825_v34 }
 0x3d4   : > { %v8845_v17 = vpop.eup %5564  ;;  %v5015_v20 = vclamps-f32 %v3236_v16, 1.0  ;;  %vm3312_vm15 = vcmp.eq.f32.partialorder %v3311_v58, 8.507059e+37  ;;  %v3380_v11 = vmul.f32 %v3379_v47, %v8713_v29  ;;  %v3443_v24 = vmul.f32 %v3442_v2, %v8799_v56 }
 0x3d5   : > { %v5016_v46 = vclamps-f32 %v3276_v14, 1.0  ;;  %v3291_v7 = vmul.f32 %v3290_v63, %v8495_v38  ;;  %v3315_v15 = vsel %vm3312_vm15, %v3314_v30, %v3310_v27  ;;  %v3418_v6 = vmul.f32 %v3417_v4, %v8727_v36 }
 0x3d6   : > { %v3327_v48 = vmul.f32 %v3326_v54, %v8673_v5  ;;  %v3366_v43 = vadd.f32 0.05243302, %v3365_v26  ;;  %v3406_v9 = vadd.f32 0.05243302, %v3405_v49  ;;  %v2218_v31 = vmul.f32 %v2217_v13, %v10118_v33 }
 0x3d7   : > { %v8855_v57 = vmul.f32 %v8653_v21, %v8271_v59  ;;  %v3343_v55 = vmul.f32 %v8845_v17, %v8805_v18  ;;  %v3453_v42 = vadd.f32 0.001143296, %v3452_v39  ;;  %v3479_v38 = vmul.f32 %v8843_v40, %v8843_v40 }
 0x3d8   : > { %v3847_v37 = vadd.f32 1.0, %v5014_v0  ;;  %v3316_v16 = vmul.f32 %v3315_v15, %v3291_v7  ;;  %v8861_v52 = vadd.f32 1.0, %v3380_v11  ;;  %v3444_v1 = vadd.f32 0.0036580483, %v3443_v24 }
 0x3d9   : > { %v3848_v58 = vadd.f32 1.0, %v5015_v20  ;;  %v3849_v47 = vadd.f32 1.0, %v5016_v46  ;;  %v3419_v2 = vadd.f32 0.4994258, %v3418_v6  ;;  %v1009_v14 = vadd.f32 %v1008_v8, %v6351_v12 }
 0x3da   : > { %v3328_v63 = vadd.f32 0.18741608, %v3327_v48  ;;  %v3367_v59 = vmul.f32 %v3366_v43, %v8713_v29  ;;  %v3407_v21 = vmul.f32 %v3406_v9, %v8727_v36  ;;  %v2219_v32 = vadd.f32 0.4994258, %v2218_v31 }
 0x3db   : > { %v1161_v4 = vmul.f32 0.5, %v8433_v28  ;;  %v3344_v13 = vsub.f32 1.0, %v3343_v55  ;;  %v3454_v27 = vmul.f32 %v3453_v42, %v8799_v56  ;;  %v8868_v54 = vmin.f32 %v3479_v38, 16.0 }
 0x3dc   : > { %v8871_v26 = vmul.f32 %v3847_v37, %v8273_v35  ;;  %v5017_v49 = vclamps-f32 %v3316_v16, 1.0  ;;  %5566 = vrcp.f32 %v8861_v52  ;;  %v3445_v0 = vmul.f32 %v3444_v1, %v8799_v56 }
 0x3dd   : > { %v8876_v30 = vmul.f32 %v3848_v58, %v8327_v25  ;;  %v8878_v39 = vmul.f32 %v3849_v47, %v1161_v4  ;;  %v3420_v28 = vmul.f32 %v3419_v2, %v8727_v36  ;;  %v8881_v20 = vmul.f32 0.70710677, %v1009_v14 }
 0x3de   : > { %v3329_v11 = vmul.f32 %v3328_v63, %v8673_v5  ;;  %v3368_v24 = vadd.f32 0.18741608, %v3367_v59  ;;  %v3408_v46 = vadd.f32 0.18741608, %v3407_v21  ;;  %v2220_v35 = vmul.f32 %v2219_v32, %v10118_v33 }
 0x3df   : > { %v8886_v7 = vmul.f32 0.5, %v8629_v3  ;;  %v3345_v15 = vmul.f32 %v8845_v17, %v3344_v13  ;;  %v3455_v6 = vadd.f32 0.014752088, %v3454_v27  ;;  %v3492_v25 = vmul.f32 3.8918573e-05, %v8868_v54 }
 0x3e0   : > { %v8890_v48 = vadd.f32 1.0, %v5017_v49  ;;  %v8893_v43 = vmul.f32 0.5, %v8660_v50  ;;  %v8896_v9 = vmul.f32 0.5, %v8691_v60  ;;  %v3446_v5 = vadd.f32 0.05243302, %v3445_v0 }
 0x3e1   : > { %v8898_v8 = vadd.f32 1.0, %v3420_v28  ;;  %v8901_v33 = vmul.f32 0.5, %v8825_v34  ;;  %v3481_v3 = vmul.f32 2.1237322e-06, %v8868_v54  ;;  %v3519_v31 = vmul.f32 %v8881_v20, %v8881_v20 }
 0x3e2   : > { %10132 = vst [vmem:[#allocation61_spill] sm:$0xff] %v8890_v48  ;;  %v8906_v55 = vpop.eup %5566  ;;  %v3330_v42 = vadd.f32 1.1283791, %v3329_v11  ;;  %v3369_v50 = vmul.f32 %v3368_v24, %v8713_v29  ;;  %v3409_v38 = vmul.f32 %v3408_v46, %v8727_v36  ;;  %v8910_v60 = vadd.f32 1.0, %v2220_v35  ;;  %v10135_v46 = vld [vmem:[#allocation86_spill] sm:$0xff] }
 0x3e3   : > { %v3346_v37 = vadd.f32 %v8845_v17, %v3345_v15  ;;  %vm3348_vm0 = vweird.f32 %v8845_v17  ;;  %v3456_v34 = vmul.f32 %v3455_v6, %v8799_v56  ;;  %v3493_v16 = vadd.f32 0.001143296, %v3492_v25  ;;  %v10136_v25 = vld [vmem:[#allocation52_spill] sm:$0xff] }
 0x3e4   : > { %vm3347_vm1 = vweird.f32 %v8805_v18  ;;  %v3351_v1 = vand.u32 2147483647, %v8805_v18  ;;  %v3353_v58 = vand.u32 2147483648, %v8805_v18  ;;  %v3447_v47 = vmul.f32 %v3446_v5, %v8799_v56 }
 0x3e5   : > { %v3383_v29 = vmul.f32 %v8906_v55, %v8861_v52  ;;  %5568 = vrcp.f32 %v8898_v8  ;;  %v3482_v36 = vadd.f32 0.00028619796, %v3481_v3  ;;  %v8922_v2 = vmin.f32 %v3519_v31, 16.0  ;;  %vm8925_vm2 = vmor %vm3347_vm1, %vm3348_vm0 }
 0x3e6   : > { %v3331_v63 = vmul.f32 %v3330_v42, %v8645_v61  ;;  %v3370_v21 = vadd.f32 1.1283791, %v3369_v50  ;;  %v3393_v32 = vand.u32 2147483648, %v8861_v52  ;;  %5570 = vrcp.f32 %v8910_v60 }
 0x3e7   : > { %v3350_v18 = vsel %vm8925_vm2, %v8845_v17, %v3346_v37  ;;  %v3410_v4 = vadd.f32 1.1283791, %v3409_v38  ;;  %v3457_v13 = vadd.f32 0.112945676, %v3456_v34  ;;  %v3494_v27 = vmul.f32 %v3493_v16, %v8868_v54 }
 0x3e8   : > { %vm3352_vm3 = vcmp.eq.f32.partialorder %v3351_v1, 8.507059e+37  ;;  %v3354_v49 = vor.u32 1.1754944e-38, %v3353_v58  ;;  %v3448_v61 = vadd.f32 0.18741608, %v3447_v47  ;;  %v8935_v0 = vmul.f32 0.5, %v1009_v14 }
 0x3e9   : > { %v3384_v28 = vsub.f32 1.0, %v3383_v29  ;;  %v3483_v11 = vmul.f32 %v3482_v36, %v8868_v54  ;;  %v3532_v24 = vmul.f32 3.8918573e-05, %v8922_v2  ;;  %v2372_v35 = vmul.f32 3.8918573e-05, %v10135_v46 }
 0x3ea   : > { %v3355_v15 = vsel %vm3352_vm3, %v3354_v49, %v3350_v18  ;;  %v8941_v6 = vmul.f32 %v3370_v21, %v8688_v62  ;;  %v3391_v17 = vand.u32 2147483647, %v8861_v52  ;;  %v2252_v5 = vmul.f32 3.8918573e-05, %v10136_v25  ;;  %v10137_v21 = vld [vmem:[#allocation88_spill] sm:$0xff] }
 0x3eb   : > { %v8945_v3 = vpop.eup %5568  ;;  %vm3387_vm4 = vweird.f32 %v8861_v52  ;;  %v3394_v14 = vor.u32 1.1754944e-38, %v3393_v32  ;;  %v8949_v31 = vmul.f32 %v3410_v4, %v8704_v51  ;;  %v3458_v42 = vmul.f32 %v3457_v13, %v8799_v56 }
 0x3ec   : > { %v3495_v50 = vadd.f32 0.014752088, %v3494_v27  ;;  %v8952_v38 = vpop.eup %5570  ;;  %v3431_v62 = vand.u32 2147483647, %v8898_v8  ;;  %v3433_v37 = vand.u32 2147483648, %v8898_v8  ;;  %v3449_v34 = vmul.f32 %v3448_v61, %v8799_v56 }
 0x3ed   : > { %v2373_v16 = vadd.f32 0.001143296, %v2372_v35  ;;  %v3356_v1 = vmul.f32 %v3355_v15, %v3331_v63  ;;  %v3385_v58 = vmul.f32 %v8906_v55, %v3384_v28  ;;  %v3484_v47 = vadd.f32 0.0036580483, %v3483_v11  ;;  %v10140_v28 = vld [vmem:[#allocation83_spill] sm:$0xff] }
 0x3ee   : > { %v3533_v29 = vadd.f32 0.001143296, %v3532_v24  ;;  %v3423_v51 = vmul.f32 %v8945_v3, %v8898_v8  ;;  %v2253_v59 = vadd.f32 0.001143296, %v2252_v5  ;;  %v2412_v32 = vmul.f32 3.8918573e-05, %v10137_v21 }
 0x3ef   : > { %v2374_v36 = vmul.f32 %v2373_v16, %v10135_v46  ;;  %vm3388_vm5 = vweird.f32 %v8906_v55  ;;  %vm8963_vm6 = vcmp.eq.f32.partialorder %v3391_v17, 8.507059e+37  ;;  %v3459_v4 = vadd.f32 0.4994258, %v3458_v42 }
 0x3f0   : > { %v3496_v63 = vmul.f32 %v3495_v50, %v8868_v54  ;;  %v2223_v13 = vmul.f32 %v8952_v38, %v8910_v60  ;;  %v2254_v49 = vmul.f32 %v2253_v59, %v10136_v25  ;;  %v2413_v61 = vadd.f32 0.001143296, %v2412_v32  ;;  %vm8984_vm8 = vmor %vm3387_vm4, %vm3388_vm5 }
 0x3f1   : > { %v2375_v27 = vadd.f32 0.014752088, %v2374_v36  ;;  %v2292_v11 = vmul.f32 3.8918573e-05, %v10140_v28  ;;  %v3386_v24 = vadd.f32 %v8906_v55, %v3385_v58  ;;  %v8973_v35 = vadd.f32 1.1283791, %v3449_v34 }
 0x3f2   : > { %v3485_v15 = vmul.f32 %v3484_v47, %v8868_v54  ;;  %v3534_v17 = vmul.f32 %v3533_v29, %v8922_v2  ;;  %v5018_v5 = vclamps-f32 %v3356_v1, 1.0  ;;  %v3424_v42 = vsub.f32 1.0, %v3423_v51 }
 0x3f3   : > { %v2376_v50 = vmul.f32 %v2375_v27, %v10135_v46  ;;  %v2255_v16 = vadd.f32 0.014752088, %v2254_v49  ;;  %vm3428_vm7 = vweird.f32 %v8945_v3  ;;  %v2224_v36 = vsub.f32 1.0, %v2223_v13 }
 0x3f4   : > { %v2414_v59 = vmul.f32 %v2413_v61, %v10137_v21  ;;  %v2293_v32 = vadd.f32 0.001143296, %v2292_v11  ;;  %vm3427_vm9 = vweird.f32 %v8898_v8  ;;  %v3460_v1 = vmul.f32 %v3459_v4, %v8799_v56 }
 0x3f5   : > { %v3497_v58 = vadd.f32 0.112945676, %v3496_v63  ;;  %v2377_v47 = vadd.f32 0.112945676, %v2376_v50  ;;  %v2256_v29 = vmul.f32 %v2255_v16, %v10136_v25  ;;  %v3390_v51 = vsel %vm8984_vm8, %v8906_v55, %v3386_v24  ;;  %vm9026_vm13 = vmor %vm3427_vm9, %vm3428_vm7 }
 0x3f6   : > { %v3535_v13 = vadd.f32 0.014752088, %v3534_v17  ;;  %vm2227_vm10 = vweird.f32 %v8910_v60  ;;  %v2415_v52 = vadd.f32 0.014752088, %v2414_v59  ;;  %v2294_v27 = vmul.f32 %v2293_v32, %v10140_v28 }
 0x3f7   : > { %v3851_v49 = vadd.f32 1.0, %v5018_v5  ;;  %v3425_v61 = vmul.f32 %v8945_v3, %v3424_v42  ;;  %v3486_v11 = vadd.f32 0.05243302, %v3485_v15  ;;  %v3521_v56 = vmul.f32 2.1237322e-06, %v8922_v2 }
 0x3f8   : > { %v2225_v4 = vmul.f32 %v8952_v38, %v2224_v36  ;;  %v2378_v63 = vmul.f32 %v2377_v47, %v10135_v46  ;;  %v2257_v50 = vadd.f32 0.112945676, %v2256_v29  ;;  %v2416_v16 = vmul.f32 %v2415_v52, %v10137_v21 }
 0x3f9   : > { %v3395_v55 = vsel %vm8963_vm6, %v3394_v14, %v3390_v51  ;;  %v9003_v24 = vadd.f32 1.0, %v3460_v1  ;;  %v3498_v17 = vmul.f32 %v3497_v58, %v8868_v54  ;;  %v2295_v5 = vadd.f32 0.014752088, %v2294_v27 }
 0x3fa   : > { %v3536_v42 = vmul.f32 %v3535_v13, %v8922_v2  ;;  %v2379_v15 = vadd.f32 0.4994258, %v2378_v63  ;;  %v2258_v59 = vmul.f32 %v2257_v50, %v10136_v25  ;;  %v2417_v32 = vadd.f32 0.112945676, %v2416_v16 }
 0x3fb   : > { %v3426_v36 = vadd.f32 %v8945_v3, %v3425_v61  ;;  %vm9009_vm11 = vcmp.eq.f32.partialorder %v3431_v62, 8.507059e+37  ;;  %v3522_v47 = vadd.f32 0.00028619796, %v3521_v56  ;;  %vm2228_vm12 = vweird.f32 %v8952_v38 }
 0x3fc   : > { %v2296_v14 = vmul.f32 %v2295_v5, %v10140_v28  ;;  %v2226_v18 = vadd.f32 %v8952_v38, %v2225_v4  ;;  %v2380_v1 = vmul.f32 %v2379_v15, %v10135_v46  ;;  %v2259_v58 = vadd.f32 0.4994258, %v2258_v59  ;;  %vm9042_vm14 = vmor %vm2227_vm10, %vm2228_vm12 }
 0x3fd   : > { %v2418_v29 = vmul.f32 %v2417_v32, %v10137_v21  ;;  %v9019_v51 = vmul.f32 %v3395_v55, %v8941_v6  ;;  %v3499_v13 = vadd.f32 0.4994258, %v3498_v17  ;;  %v2233_v62 = vand.u32 2147483648, %v8910_v60  ;;  %v10149_v17 = vld [vmem:[#allocation90_spill] sm:$0xff] }
 0x3fe   : > { %v2297_v52 = vadd.f32 0.112945676, %v2296_v14  ;;  %5572 = vrcp.f32 %v9003_v24  ;;  %v3537_v46 = vadd.f32 0.112945676, %v3536_v42  ;;  %v2231_v61 = vand.u32 2147483647, %v8910_v60 }
 0x3ff   : > { %v9032_v56 = vadd.f32 1.0, %v2380_v1  ;;  %v3430_v6 = vsel %vm9026_vm13, %v8945_v3, %v3426_v36  ;;  %v3523_v4 = vmul.f32 %v3522_v47, %v8922_v2  ;;  %v2260_v50 = vmul.f32 %v2259_v58, %v10136_v25 }
 0x400   : > { %v2419_v16 = vadd.f32 0.4994258, %v2418_v29  ;;  %v2230_v55 = vsel %vm9042_vm14, %v8952_v38, %v2226_v18  ;;  %v2298_v3 = vmul.f32 %v2297_v52, %v10140_v28  ;;  %v2452_v5 = vmul.f32 3.8918573e-05, %v10149_v17  ;;  %v1057_v18 = vpop.f32.mrf.mxu2  ;;  %v10150_v52 = vld [vmem:[#allocation96_spill] sm:$0xff] }
 0x401   : > { %5574 = vrcp.f32 %v9032_v56  ;;  %v3500_v42 = vmul.f32 %v3499_v13, %v8868_v54  ;;  %v2234_v60 = vor.u32 1.1754944e-38, %v2233_v62  ;;  %v9054_v15 = vadd.f32 1.0, %v2260_v50 }
 0x402   : > { %v2420_v59 = vmul.f32 %v2419_v16, %v10137_v21  ;;  %v3434_v25 = vor.u32 1.1754944e-38, %v3433_v37  ;;  %v9061_v32 = vmul.f32 %v8973_v35, %v8753_v23  ;;  %v3538_v38 = vmul.f32 %v3537_v46, %v8922_v2 }
 0x403   : > { %vm2232_vm15 = vcmp.eq.f32.partialorder %v2231_v61, 8.507059e+37  ;;  %v3487_v36 = vmul.f32 %v3486_v11, %v8868_v54  ;;  %v3524_v47 = vadd.f32 0.0036580483, %v3523_v4  ;;  %5576 = vrcp.f32 %v9054_v15 }
 0x404   : > { %v2235_v14 = vsel %vm2232_vm15, %v2234_v60, %v2230_v55  ;;  %v9066_v1 = vpop.eup %5572  ;;  %v3435_v8 = vsel %vm9009_vm11, %v3434_v25, %v3430_v6  ;;  %v9070_v37 = vadd.f32 1.0, %v2420_v59  ;;  %v2299_v21 = vadd.f32 0.4994258, %v2298_v3 }
 0x405   : > { %v2453_v23 = vadd.f32 0.001143296, %v2452_v5  ;;  %v9073_v35 = vmul.f32 %v3851_v49, %v8886_v7  ;;  %v9077_v29 = vadd.f32 1.0, %v3500_v42  ;;  %v3539_v62 = vadd.f32 0.4994258, %v3538_v38  ;;  %v10151_v38 = vld [vmem:[#allocation85_spill] sm:$0xff] }
 0x406   : > { %v2236_v27 = vmul.f32 %v2235_v14, %v10150_v52  ;;  %5578 = vrcp.f32 %v9070_v37  ;;  %v9082_v34 = vadd.f32 %v1057_v18, %v10082_v45  ;;  %v9085_v46 = vmul.f32 %v3435_v8, %v8949_v31 }
 0x407   : > { %v5575_v13 = vpop.eup %5574  ;;  %v9088_v49 = vadd.f32 0.18741608, %v3487_v36  ;;  %v9093_v6 = vmul.f32 %v9066_v1, %v9003_v24  ;;  %v9096_v4 = vmul.f32 %v3524_v47, %v8922_v2  ;;  %v2300_v63 = vmul.f32 %v2299_v21, %v10140_v28 }
 0x408   : > { %v2383_v61 = vmul.f32 %v5575_v13, %v9032_v56  ;;  %v2454_v50 = vmul.f32 %v2453_v23, %v10149_v17  ;;  %5580 = vrcp.f32 %v9077_v29  ;;  %v2391_v55 = vand.u32 2147483647, %v9032_v56 }
 0x409   : > { %v5577_v16 = vpop.eup %5576  ;;  %v2393_v3 = vand.u32 2147483648, %v9032_v56  ;;  %v3540_v5 = vmul.f32 %v3539_v62, %v8922_v2  ;;  %v4990_v42 = vclamps-f32 %v2236_v27, 1.0  ;;  %v9106_v59 = vmul.f32 0.70710677, %v9082_v34 }
 0x40a   : > { %v2384_v31 = vsub.f32 1.0, %v2383_v61  ;;  %v2263_v60 = vmul.f32 %v5577_v16, %v9054_v15  ;;  %vm2388_vm0 = vweird.f32 %v5575_v13  ;;  %v2273_v28 = vand.u32 2147483648, %v9054_v15 }
 0x40b   : > { %v2332_v36 = vmul.f32 3.8918573e-05, %v10151_v38  ;;  %vm2387_vm1 = vweird.f32 %v9032_v56  ;;  %v9111_v18 = vadd.f32 1.0, %v2300_v63  ;;  %v2455_v8 = vadd.f32 0.014752088, %v2454_v50 }
 0x40c   : > { %v2385_v25 = vmul.f32 %v5575_v13, %v2384_v31  ;;  %v5579_v47 = vpop.eup %5578  ;;  %v2264_v14 = vsub.f32 1.0, %v2263_v60  ;;  %vm2392_vm2 = vcmp.eq.f32.partialorder %v2391_v55, 8.507059e+37  ;;  %v2394_v23 = vor.u32 1.1754944e-38, %v2393_v3  ;;  %vm2389_vm3 = vmor %vm2387_vm1, %vm2388_vm0 }
 0x40d   : > { %v2423_v62 = vmul.f32 %v5579_v47, %v9070_v37  ;;  %vm2268_vm4 = vweird.f32 %v5577_v16  ;;  %v2271_v27 = vand.u32 2147483647, %v9054_v15  ;;  %v3559_v61 = vmul.f32 %v9106_v59, %v9106_v59 }
 0x40e   : > { %v2386_v21 = vadd.f32 %v5575_v13, %v2385_v25  ;;  %v2265_v52 = vmul.f32 %v5577_v16, %v2264_v14  ;;  %v9117_v31 = vpop.eup %5580  ;;  %vm2267_vm5 = vweird.f32 %v9054_v15  ;;  %v2274_v63 = vor.u32 1.1754944e-38, %v2273_v28  ;;  %v10152_v25 = vld [vmem:[#allocation102_spill] sm:$0xff] }
 0x40f   : > { %v2424_v50 = vsub.f32 1.0, %v2423_v62  ;;  %v2433_v3 = vand.u32 2147483648, %v9070_v37  ;;  %5582 = vrcp.f32 %v9111_v18  ;;  %vm2269_vm6 = vmor %vm2267_vm5, %vm2268_vm4  ;;  %vm2428_vm7 = vweird.f32 %v5579_v47 }
 0x410   : > { %v2390_v56 = vsel %vm2389_vm3, %v5575_v13, %v2386_v21  ;;  %v2266_v55 = vadd.f32 %v5577_v16, %v2265_v52  ;;  %v2431_v7 = vand.u32 2147483647, %v9070_v37  ;;  %v3823_v58 = vadd.f32 1.0, %v4990_v42 }
 0x411   : > { %v2395_v60 = vsel %vm2392_vm2, %v2394_v23, %v2390_v56  ;;  %v2425_v11 = vmul.f32 %v5579_v47, %v2424_v50  ;;  %vm2272_vm8 = vcmp.eq.f32.partialorder %v2271_v27, 8.507059e+37  ;;  %v9124_v13 = vmin.f32 %v3559_v61, 16.0  ;;  %v10153_v23 = vld [vmem:[#allocation99_spill] sm:$0xff]  ;;  %v1106_v56 = vpop.f32.mrf.mxu3 }
 0x412   : > { %v2396_v14 = vmul.f32 %v2395_v60, %v10152_v25  ;;  %v2270_v48 = vsel %vm2269_vm6, %v5577_v16, %v2266_v55  ;;  %vm2427_vm9 = vweird.f32 %v9070_v37  ;;  %v2434_v52 = vor.u32 1.1754944e-38, %v2433_v3  ;;  %v10155_v3 = vld [vmem:[#allocation40_spill] sm:$0xff] }
 0x413   : > { %v2275_v28 = vsel %vm2272_vm8, %v2274_v63, %v2270_v48  ;;  %v2426_v21 = vadd.f32 %v5579_v47, %v2425_v11  ;;  %vm2429_vm10 = vmor %vm2427_vm9, %vm2428_vm7  ;;  %v2456_v50 = vmul.f32 %v2455_v8, %v10149_v17  ;;  %v2333_v60 = vadd.f32 0.001143296, %v2332_v36  ;;  %v10154_v63 = vld [vmem:[#allocation47_spill] sm:$0xff] }
 0x414   : > { %v4994_v15 = vclamps-f32 %v2396_v14, 1.0  ;;  %v2276_v62 = vmul.f32 %v2275_v28, %v10153_v23  ;;  %v3464_v25 = vsub.f32 1.0, %v9093_v6  ;;  %vm2432_vm11 = vcmp.eq.f32.partialorder %v2431_v7, 8.507059e+37  ;;  %v10156_v28 = vld [vmem:[#allocation103_spill] sm:$0xff] }
 0x415   : > { %v2430_v16 = vsel %vm2429_vm10, %v5579_v47, %v2426_v21  ;;  %v9130_v27 = vpop.eup %5582  ;;  %v9132_v61 = vadd.f32 1.0, %v3540_v5  ;;  %v3572_v37 = vmul.f32 3.8918573e-05, %v9124_v13  ;;  %v3887_v55 = vmul.f32 %v3823_v58, %v10154_v63  ;;  %v10159_v63 = vld [vmem:[#allocation80_spill] sm:$0xff] }
 0x416   : > { %v3827_v42 = vadd.f32 1.0, %v4994_v15  ;;  %v4991_v48 = vclamps-f32 %v2276_v62, 1.0  ;;  %v2435_v11 = vsel %vm2432_vm11, %v2434_v52, %v2430_v16  ;;  %v9139_v36 = vadd.f32 %v1106_v56, %v9993_v19 }
 0x417   : > { %v2436_v8 = vmul.f32 %v2435_v11, %v10156_v28  ;;  %v5020_v6 = vclamps-f32 %v9085_v46, 1.0  ;;  %v3489_v7 = vmul.f32 %v9088_v49, %v8868_v54  ;;  %v2457_v5 = vadd.f32 0.112945676, %v2456_v50 }
 0x418   : > { %v3891_v14 = vmul.f32 %v3827_v42, %v10155_v3  ;;  %v2334_v47 = vmul.f32 %v2333_v60, %v10151_v38  ;;  %vm3467_vm12 = vweird.f32 %v9003_v24  ;;  %v3824_v58 = vadd.f32 1.0, %v4991_v48 }
 0x419   : > { %v4995_v21 = vclamps-f32 %v2436_v8, 1.0  ;;  %v2303_v23 = vmul.f32 %v9130_v27, %v9111_v18  ;;  %v10157_v62 = vclamps-f32 %v9019_v51, 1.0  ;;  %v3503_v46 = vmul.f32 %v9117_v31, %v9077_v29 }
 0x41a   : > { %v3939_v15 = vpack.c.bf16 %v3891_v14, %v3887_v55  ;;  %v3526_v56 = vadd.f32 0.05243302, %v9096_v4  ;;  %v3573_v54 = vadd.f32 0.001143296, %v3572_v37  ;;  %v3465_v49 = vmul.f32 %v9066_v1, %v3464_v25  ;;  %v10160_v4 = vld [vmem:[#allocation93_spill] sm:$0xff] }
 0x41b   : > { %v3852_v52 = vadd.f32 1.0, %v10157_v62  ;;  %5584 = vrcp.f32 %v9132_v61  ;;  %v3828_v50 = vadd.f32 1.0, %v4995_v21  ;;  %v9156_v60 = vmul.f32 0.70710677, %v9139_v36 }
 0x41c   : > { %4242 = vmatmul.bf16.gmra.mxu0 %v3939_v15  ;;  %v3853_v42 = vadd.f32 1.0, %v5020_v6  ;;  %v10158_v16 = vand.u32 2147483648, %v9003_v24  ;;  %v3490_v48 = vadd.f32 1.1283791, %v3489_v7  ;;  %v2458_v11 = vmul.f32 %v2457_v5, %v10149_v17 }
 0x41d   : > { %v3888_v55 = vmul.f32 %v3824_v58, %v10159_v63  ;;  %v3892_v37 = vmul.f32 %v3828_v50, %v10160_v4  ;;  %v2304_v3 = vsub.f32 1.0, %v2303_v23  ;;  %v2335_v25 = vadd.f32 0.014752088, %v2334_v47 }
 0x41e   : > { %v3474_v51 = vor.u32 1.1754944e-38, %v10158_v16  ;;  %vm3468_vm13 = vweird.f32 %v9066_v1  ;;  %v3504_v14 = vsub.f32 1.0, %v3503_v46  ;;  %v3574_v28 = vmul.f32 %v3573_v54, %v9124_v13  ;;  %v10164_v54 = vld [vmem:[#allocation91_spill] sm:$0xff] }
 0x41f   : > { %v2459_v8 = vadd.f32 0.4994258, %v2458_v11  ;;  %v3466_v6 = vadd.f32 %v9066_v1, %v3465_v49  ;;  %v3527_v15 = vmul.f32 %v3526_v56, %v8922_v2  ;;  %v3940_v21 = vpack.c.bf16 %v3892_v37, %v3888_v55  ;;  %vm9195_vm15 = vmor %vm3467_vm12, %vm3468_vm13 }
 0x420   : > { %v3599_v7 = vmul.f32 %v9156_v60, %v9156_v60  ;;  %v9170_v5 = vmul.f32 %v3852_v52, %v8893_v43  ;;  %v9173_v58 = vmul.f32 %v3853_v42, %v8896_v9  ;;  %v10161_v47 = vand.u32 2147483647, %v9003_v24 }
 0x421   : > { %v9182_v62 = vmul.f32 %v3490_v48, %v8843_v40  ;;  %v2460_v46 = vmul.f32 %v2459_v8, %v10149_v17  ;;  %v9185_v56 = vpop.eup %5584  ;;  %4291 = vmatmul.bf16.gmra.mxu1 %v3940_v21  ;;  %v3561_v43 = vmul.f32 2.1237322e-06, %v9124_v13  ;;  %v2305_v52 = vmul.f32 %v9130_v27, %v2304_v3 }
 0x422   : > { %vm9177_vm14 = vcmp.eq.f32.partialorder %v10161_v47, 8.507059e+37  ;;  %v2336_v9 = vmul.f32 %v2335_v25, %v10151_v38  ;;  %v2492_v49 = vmul.f32 3.8918573e-05, %v10164_v54  ;;  %v3505_v17 = vmul.f32 %v9117_v31, %v3504_v14 }
 0x423   : > { %v3511_v50 = vand.u32 2147483647, %v9077_v29  ;;  %v3513_v42 = vand.u32 2147483648, %v9077_v29  ;;  %v3575_v16 = vadd.f32 0.014752088, %v3574_v28  ;;  %v3470_v48 = vsel %vm9195_vm15, %v9066_v1, %v3466_v6 }
 0x424   : > { %v3528_v11 = vadd.f32 0.18741608, %v3527_v15  ;;  %v9205_v63 = vmin.f32 %v3599_v7, 16.0  ;;  %v9207_v55 = vadd.f32 1.0, %v2460_v46  ;;  %vm3508_vm0 = vweird.f32 %v9117_v31 }
 0x425   : > { %v3543_v24 = vmul.f32 %v9185_v56, %v9132_v61  ;;  %v2337_v4 = vadd.f32 0.112945676, %v2336_v9  ;;  %v2493_v37 = vadd.f32 0.001143296, %v2492_v49  ;;  %v3562_v3 = vadd.f32 0.00028619796, %v3561_v43 }
 0x426   : > { %v2306_v25 = vadd.f32 %v9130_v27, %v2305_v52  ;;  %vm2308_vm1 = vweird.f32 %v9130_v27  ;;  %5586 = vrcp.f32 %v9207_v55  ;;  %v3506_v1 = vadd.f32 %v9117_v31, %v3505_v17 }
 0x427   : > { %v3576_v14 = vmul.f32 %v3575_v16, %v9124_v13  ;;  %v2313_v28 = vand.u32 2147483648, %v9111_v18  ;;  %v2338_v8 = vmul.f32 %v2337_v4, %v10151_v38  ;;  %v3612_v6 = vmul.f32 3.8918573e-05, %v9205_v63 }
 0x428   : > { %vm2307_vm2 = vweird.f32 %v9111_v18  ;;  %v2311_v15 = vand.u32 2147483647, %v9111_v18  ;;  %v2494_v21 = vmul.f32 %v2493_v37, %v10164_v54  ;;  %vm3507_vm3 = vweird.f32 %v9077_v29 }
 0x429   : > { %vm9224_vm4 = vcmp.eq.f32.partialorder %v3511_v50, 8.507059e+37  ;;  %v3529_v47 = vmul.f32 %v3528_v11, %v8922_v2  ;;  %vm9229_vm5 = vmor %vm2307_vm2, %vm2308_vm1  ;;  %v2339_v43 = vadd.f32 0.4994258, %v2338_v8  ;;  %v3475_v52 = vsel %vm9177_vm14, %v3474_v51, %v3470_v48 }
 0x42a   : > { %v3544_v9 = vsub.f32 1.0, %v3543_v24  ;;  %v3563_v18 = vmul.f32 %v3562_v3, %v9124_v13  ;;  %v2310_v29 = vsel %vm9229_vm5, %v9130_v27, %v2306_v25  ;;  %vm9241_vm6 = vmor %vm3507_vm3, %vm3508_vm0  ;;  %v3577_v2 = vadd.f32 0.112945676, %v3576_v14 }
 0x42b   : > { %v2314_v40 = vor.u32 1.1754944e-38, %v2313_v28  ;;  %v2340_v17 = vmul.f32 %v2339_v43, %v10151_v38  ;;  %v2495_v50 = vadd.f32 0.014752088, %v2494_v21  ;;  %v3510_v51 = vsel %vm9241_vm6, %v9117_v31, %v3506_v1  ;;  %v10173_v28 = vld [vmem:[#allocation100_spill] sm:$0xff] }
 0x42c   : > { %v5587_v23 = vpop.eup %5586  ;;  %v3514_v16 = vor.u32 1.1754944e-38, %v3513_v42  ;;  %v3613_v48 = vadd.f32 0.001143296, %v3612_v6  ;;  %vm2312_vm7 = vcmp.eq.f32.partialorder %v2311_v15, 8.507059e+37  ;;  %v9250_v27 = vmul.f32 %v3475_v52, %v9061_v32 }
 0x42d   : > { %v3530_v11 = vadd.f32 1.1283791, %v3529_v47  ;;  %v2315_v24 = vsel %vm2312_vm7, %v2314_v40, %v2310_v29  ;;  %v2463_v4 = vmul.f32 %v5587_v23, %v9207_v55  ;;  %v3551_v37 = vand.u32 2147483647, %v9132_v61 }
 0x42e   : > { %v3564_v3 = vadd.f32 0.0036580483, %v3563_v18  ;;  %v9254_v38 = vadd.f32 1.0, %v2340_v17  ;;  %v2496_v25 = vmul.f32 %v2495_v50, %v10164_v54  ;;  %v3515_v31 = vsel %vm9224_vm4, %v3514_v16, %v3510_v51 }
 0x42f   : > { %v3545_v42 = vmul.f32 %v9185_v56, %v3544_v9  ;;  %v3578_v1 = vmul.f32 %v3577_v2, %v9124_v13  ;;  %v2464_v32 = vsub.f32 1.0, %v2463_v4  ;;  %v3614_v14 = vmul.f32 %v3613_v48, %v9205_v63  ;;  %v10176_v4 = vld [vmem:[#allocation104_spill] sm:$0xff] }
 0x430   : > { %v2316_v8 = vmul.f32 %v2315_v24, %v10173_v28  ;;  %v2473_v6 = vand.u32 2147483648, %v9207_v55  ;;  %5588 = vrcp.f32 %v9254_v38  ;;  %vm2468_vm8 = vweird.f32 %v5587_v23 }
 0x431   : > { %v2465_v15 = vmul.f32 %v5587_v23, %v2464_v32  ;;  %v2471_v21 = vand.u32 2147483647, %v9207_v55  ;;  %v2497_v47 = vadd.f32 0.112945676, %v2496_v25  ;;  %v9267_v7 = vmul.f32 %v3530_v11, %v8881_v20  ;;  %v961_v25 = vpop.f32.mrf.mxu0 }
 0x432   : > { %vm3547_vm9 = vweird.f32 %v9132_v61  ;;  %v3553_v46 = vand.u32 2147483648, %v9132_v61  ;;  %v3565_v43 = vmul.f32 %v3564_v3, %v9124_v13  ;;  %v9273_v52 = vmul.f32 %v3515_v31, %v9182_v62 }
 0x433   : > { %v3579_v9 = vadd.f32 0.4994258, %v3578_v1  ;;  %v2466_v18 = vadd.f32 %v5587_v23, %v2465_v15  ;;  %vm2467_vm10 = vweird.f32 %v9207_v55  ;;  %v3615_v29 = vadd.f32 0.014752088, %v3614_v14 }
 0x434   : > { %v4992_v49 = vclamps-f32 %v2316_v8, 1.0  ;;  %vm2469_vm11 = vmor %vm2467_vm10, %vm2468_vm8  ;;  %v2474_v2 = vor.u32 1.1754944e-38, %v2473_v6  ;;  %v2498_v20 = vmul.f32 %v2497_v47, %v10164_v54  ;;  %v3546_v40 = vadd.f32 %v9185_v56, %v3545_v42 }
 0x435   : > { %vm3548_vm12 = vweird.f32 %v9185_v56  ;;  %vm9279_vm13 = vcmp.eq.f32.partialorder %v3551_v37, 8.507059e+37  ;;  %v2470_v62 = vsel %vm2469_vm11, %v5587_v23, %v2466_v18  ;;  %vm2472_vm14 = vcmp.eq.f32.partialorder %v2471_v21, 8.507059e+37  ;;  %v10179_v18 = vld [vmem:[#allocation82_spill] sm:$0xff] }
 0x436   : > { %v9283_v50 = vpop.eup %5588  ;;  %v3566_v51 = vadd.f32 0.05243302, %v3565_v43  ;;  %v3601_v55 = vmul.f32 2.1237322e-06, %v9205_v63  ;;  %v2475_v16 = vsel %vm2472_vm14, %v2474_v2, %v2470_v62  ;;  %v2499_v48 = vadd.f32 0.4994258, %v2498_v20  ;;  %vm9292_vm15 = vmor %vm3547_vm9, %vm3548_vm12 }
 0x437   : > { %v3554_v11 = vor.u32 1.1754944e-38, %v3553_v46  ;;  %v3580_v24 = vmul.f32 %v3579_v9, %v9124_v13  ;;  %v2476_v3 = vmul.f32 %v2475_v16, %v10176_v4  ;;  %v2343_v37 = vmul.f32 %v9283_v50, %v9254_v38 }
 0x438   : > { %v3616_v31 = vmul.f32 %v3615_v29, %v9205_v63  ;;  %v3825_v42 = vadd.f32 1.0, %v4992_v49  ;;  %v2500_v1 = vmul.f32 %v2499_v48, %v10164_v54  ;;  %v9299_v32 = vadd.f32 %v961_v25, %v6349_v10  ;;  %v1010_v54 = vpop.f32.mrf.mxu1  ;;  %v10180_v49 = vld [vmem:[#allocation97_spill] sm:$0xff] }
 0x439   : > { %v3550_v28 = vsel %vm9292_vm15, %v9185_v56, %v3546_v40  ;;  %v4996_v8 = vclamps-f32 %v2476_v3, 1.0  ;;  %v2344_v61 = vsub.f32 1.0, %v2343_v37  ;;  %v3567_v6 = vmul.f32 %v3566_v51, %v9124_v13  ;;  %v1059_v37 = vpop.f32.mrf.mxu2 }
 0x43a   : > { %v3602_v15 = vadd.f32 0.00028619796, %v3601_v55  ;;  %v9306_v21 = vadd.f32 1.0, %v2500_v1  ;;  %v9309_v47 = vmul.f32 0.70710677, %v9299_v32  ;;  %v9311_v46 = vadd.f32 1.0, %v3580_v24 }
 0x43b   : > { %v3829_v10 = vadd.f32 1.0, %v4996_v8  ;;  %v2345_v43 = vmul.f32 %v9283_v50, %v2344_v61  ;;  %v9315_v9 = vadd.f32 %v1010_v54, %v6351_v12  ;;  %v3617_v56 = vadd.f32 0.112945676, %v3616_v31  ;;  %v1108_v8 = vpop.f32.mrf.mxu3  ;;  %v10183_v61 = vld [vmem:[#allocation84_spill] sm:$0xff] }
 0x43c   : > { %v3889_v29 = vmul.f32 %v3825_v42, %v10179_v18  ;;  %vm2348_vm0 = vweird.f32 %v9283_v50  ;;  %5590 = vrcp.f32 %v9306_v21  ;;  %v2351_v40 = vand.u32 2147483647, %v9254_v38 }
 0x43d   : > { %v3893_v2 = vmul.f32 %v3829_v10, %v10180_v49  ;;  %v2346_v20 = vadd.f32 %v9283_v50, %v2345_v43  ;;  %v2353_v62 = vand.u32 2147483648, %v9254_v38  ;;  %v9326_v51 = vsel %vm9279_vm13, %v3554_v11, %v3550_v28 }
 0x43e   : > { %vm2347_vm1 = vweird.f32 %v9254_v38  ;;  %v3639_v12 = vmul.f32 %v9309_v47, %v9309_v47  ;;  %v9332_v55 = vmul.f32 0.70710677, %v9315_v9  ;;  %v9334_v16 = vadd.f32 0.18741608, %v3567_v6  ;;  %v10184_v6 = vld [vmem:[#allocation45_spill] sm:$0xff] }
 0x43f   : > { %5592 = vrcp.f32 %v9311_v46  ;;  %v9338_v48 = vmul.f32 %v3602_v15, %v9205_v63  ;;  %v3941_v24 = vpack.c.bf16 %v3893_v2, %v3889_v29  ;;  %vm9340_vm2 = vmor %vm2347_vm1, %vm2348_vm0  ;;  %v9345_v38 = vmul.f32 %v3617_v56, %v9205_v63  ;;  %v10185_v29 = vld [vmem:[#allocation32_spill] sm:$0xff] }
 0x440   : > { %v2350_v11 = vsel %vm9340_vm2, %v9283_v50, %v2346_v20  ;;  %v9350_v4 = vmin.f32 %v3639_v12, 16.0  ;;  %v3679_v3 = vmul.f32 %v9332_v55, %v9332_v55  ;;  %vm2352_vm3 = vcmp.eq.f32.partialorder %v2351_v40, 8.507059e+37 }
 0x441   : > { %4340 = vmatmul.bf16.gmra.mxu2 %v3941_v24  ;;  %v2354_v25 = vor.u32 1.1754944e-38, %v2353_v62  ;;  %v2511_v23 = vand.u32 2147483647, %v9306_v21  ;;  %v9356_v31 = vadd.f32 %v1059_v37, %v10082_v45  ;;  %v3943_v15 = vpack.c.bf16 %v10184_v6, %v10183_v61 }
 0x442   : > { %v5591_v42 = vpop.eup %5590  ;;  %v3641_v1 = vmul.f32 2.1237322e-06, %v9350_v4  ;;  %v3652_v28 = vmul.f32 3.8918573e-05, %v9350_v4  ;;  %v9360_v50 = vmin.f32 %v3679_v3, 16.0  ;;  %vm2507_vm4 = vweird.f32 %v9306_v21 }
 0x443   : > { %v2355_v54 = vsel %vm2352_vm3, %v2354_v25, %v2350_v11  ;;  %v2503_v10 = vmul.f32 %v5591_v42, %v9306_v21  ;;  %v2513_v43 = vand.u32 2147483648, %v9306_v21  ;;  %4247 = vmatmul.bf16.gmra.mxu0 %v3943_v15  ;;  %v3944_v49 = vpack.c.bf16 %v8221_v41, %v10185_v29  ;;  %v10188_v41 = vld [vmem:[#allocation101_spill] sm:$0xff] }
 0x444   : > { %v3642_v45 = vadd.f32 0.00028619796, %v3641_v1  ;;  %v3653_v56 = vadd.f32 0.001143296, %v3652_v28  ;;  %v3681_v18 = vmul.f32 2.1237322e-06, %v9360_v50  ;;  %v9378_v12 = vadd.f32 %v1108_v8, %v9993_v19 }
 0x445   : > { %v9370_v2 = vpop.eup %5592  ;;  %v2504_v20 = vsub.f32 1.0, %v2503_v10  ;;  %vm9372_vm5 = vcmp.eq.f32.partialorder %v2511_v23, 8.507059e+37  ;;  %v3692_v62 = vmul.f32 3.8918573e-05, %v9360_v50  ;;  %v9383_v3 = vmul.f32 0.70710677, %v9356_v31  ;;  %4296 = vmatmul.bf16.gmra.mxu1 %v3944_v49 }
 0x446   : > { %v3643_v24 = vmul.f32 %v3642_v45, %v9350_v4  ;;  %v3654_v17 = vmul.f32 %v3653_v56, %v9350_v4  ;;  %v3682_v11 = vadd.f32 0.00028619796, %v3681_v18  ;;  %v2356_v37 = vmul.f32 %v2355_v54, %v10188_v41  ;;  %v10190_v41 = vld [vmem:[#allocation105_spill] sm:$0xff] }
 0x447   : > { %v2505_v25 = vmul.f32 %v5591_v42, %v2504_v20  ;;  %vm2508_vm6 = vweird.f32 %v5591_v42  ;;  %v3693_v23 = vadd.f32 0.001143296, %v3692_v62  ;;  %v3719_v19 = vmul.f32 %v9383_v3, %v9383_v3  ;;  %v10189_v62 = vld [vmem:[#allocation31_spill] sm:$0xff] }
 0x448   : > { %v3644_v1 = vadd.f32 0.0036580483, %v3643_v24  ;;  %v3655_v28 = vadd.f32 0.014752088, %v3654_v17  ;;  %v3683_v61 = vmul.f32 %v3682_v11, %v9360_v50  ;;  %v2514_v6 = vor.u32 1.1754944e-38, %v2513_v43  ;;  %vm2509_vm7 = vmor %vm2507_vm4, %vm2508_vm6 }
 0x449   : > { %v2506_v8 = vadd.f32 %v5591_v42, %v2505_v25  ;;  %v3694_v15 = vmul.f32 %v3693_v23, %v9360_v50  ;;  %v9391_v10 = vmul.f32 0.70710677, %v9378_v12  ;;  %v9397_v18 = vmin.f32 %v3719_v19, 16.0 }
 0x44a   : > { %v3645_v54 = vmul.f32 %v3644_v1, %v9350_v4  ;;  %v3656_v45 = vmul.f32 %v3655_v28, %v9350_v4  ;;  %v3684_v56 = vadd.f32 0.0036580483, %v3683_v61  ;;  %v4993_v29 = vclamps-f32 %v2356_v37, 1.0 }
 0x44b   : > { %v2510_v49 = vsel %vm2509_vm7, %v5591_v42, %v2506_v8  ;;  %v3695_v20 = vadd.f32 0.014752088, %v3694_v15  ;;  %v3945_v43 = vpack.c.bf16 %v8224_v44, %v10189_v62  ;;  %v3721_v1 = vmul.f32 2.1237322e-06, %v9397_v18 }
 0x44c   : > { %v2515_v24 = vsel %vm9372_vm5, %v2514_v6, %v2510_v49  ;;  %v3646_v17 = vadd.f32 0.05243302, %v3645_v54  ;;  %v3657_v11 = vadd.f32 0.112945676, %v3656_v45  ;;  %v3685_v21 = vmul.f32 %v3684_v56, %v9360_v50 }
 0x44d   : > { %v2516_v25 = vmul.f32 %v2515_v24, %v10190_v41  ;;  %v3696_v23 = vmul.f32 %v3695_v20, %v9360_v50  ;;  %v3732_v37 = vmul.f32 3.8918573e-05, %v9397_v18  ;;  %v3569_v42 = vmul.f32 %v9334_v16, %v9124_v13 }
 0x44e   : > { %v3604_v44 = vadd.f32 0.0036580483, %v9338_v48  ;;  %v3658_v40 = vmul.f32 %v3657_v11, %v9350_v4  ;;  %v3759_v28 = vmul.f32 %v9391_v10, %v9391_v10  ;;  %v3826_v19 = vadd.f32 1.0, %v4993_v29  ;;  %v10191_v11 = vld [vmem:[#allocation89_spill] sm:$0xff] }
 0x44f   : > { %v4997_v61 = vclamps-f32 %v2516_v25, 1.0  ;;  %v3697_v8 = vadd.f32 0.112945676, %v3696_v23  ;;  %v3722_v6 = vadd.f32 0.00028619796, %v3721_v1  ;;  %v3583_v15 = vmul.f32 %v9370_v2, %v9311_v46 }
 0x450   : > { %v3619_v54 = vadd.f32 0.4994258, %v9345_v38  ;;  %v3659_v45 = vadd.f32 0.4994258, %v3658_v40  ;;  %v3733_v56 = vadd.f32 0.001143296, %v3732_v37  ;;  %v3647_v13 = vmul.f32 %v3646_v17, %v9350_v4 }
 0x451   : > { %v3830_v49 = vadd.f32 1.0, %v4997_v61  ;;  %v3686_v16 = vadd.f32 0.05243302, %v3685_v21  ;;  %v3698_v48 = vmul.f32 %v3697_v8, %v9360_v50  ;;  %4345 = vmatmul.bf16.gmra.mxu2 %v3945_v43  ;;  %v3605_v20 = vmul.f32 %v3604_v44, %v9205_v63  ;;  %v10192_v38 = vld [vmem:[#allocation98_spill] sm:$0xff] }
 0x452   : > { %v3660_v29 = vmul.f32 %v3659_v45, %v9350_v4  ;;  %v3734_v62 = vmul.f32 %v3733_v56, %v9397_v18  ;;  %v9422_v24 = vmin.f32 %v3759_v28, 16.0  ;;  %v3890_v41 = vmul.f32 %v3826_v19, %v10191_v11 }
 0x453   : > { %v3894_v25 = vmul.f32 %v3830_v49, %v10192_v38  ;;  %v3699_v23 = vadd.f32 0.4994258, %v3698_v48  ;;  %v3723_v1 = vmul.f32 %v3722_v6, %v9397_v18  ;;  %v3584_v17 = vsub.f32 1.0, %v3583_v15 }
 0x454   : > { %v3620_v21 = vmul.f32 %v3619_v54, %v9205_v63  ;;  %v9428_v37 = vadd.f32 1.0, %v3660_v29  ;;  %v3735_v43 = vadd.f32 0.014752088, %v3734_v62  ;;  %v3648_v40 = vadd.f32 0.18741608, %v3647_v13 }
 0x455   : > { %v3942_v44 = vpack.c.bf16 %v3894_v25, %v3890_v41  ;;  %v3687_v61 = vmul.f32 %v3686_v16, %v9360_v50  ;;  %v3700_v28 = vmul.f32 %v3699_v23, %v9360_v50  ;;  %v9432_v8 = vadd.f32 1.1283791, %v3569_v42  ;;  %v10193_v25 = vld [vmem:[#allocation39_spill] sm:$0xff]  ;;  %v10194_v23 = vld [vmem:[#allocation44_spill] sm:$0xff] }
 0x456   : > { %v3593_v19 = vand.u32 2147483648, %v9311_v46  ;;  %5594 = vrcp.f32 %v9428_v37  ;;  %v3761_v6 = vmul.f32 2.1237322e-06, %v9422_v24  ;;  %v9439_v15 = vmul.f32 %v9326_v51, %v9267_v7 }
 0x457   : > { %v9441_v54 = vadd.f32 0.05243302, %v3605_v20  ;;  %4389 = vmatmul.bf16.gmra.mxu3 %v3942_v44  ;;  %v9443_v45 = vadd.f32 1.0, %v3700_v28  ;;  %v3724_v56 = vadd.f32 0.0036580483, %v3723_v1  ;;  %v3585_v49 = vmul.f32 %v9370_v2, %v3584_v17 }
 0x458   : > { %v9446_v42 = vadd.f32 1.0, %v3620_v21  ;;  %v3736_v13 = vmul.f32 %v3735_v43, %v9397_v18  ;;  %v3772_v16 = vmul.f32 3.8918573e-05, %v9422_v24  ;;  %v3591_v48 = vand.u32 2147483647, %v9311_v46 }
 0x459   : > { %v3649_v29 = vmul.f32 %v3648_v40, %v9350_v4  ;;  %v3688_v7 = vadd.f32 0.18741608, %v3687_v61  ;;  %5596 = vrcp.f32 %v9443_v45  ;;  %vm3587_vm8 = vweird.f32 %v9311_v46 }
 0x45a   : > { %v9454_v51 = vor.u32 1.1754944e-38, %v3593_v19  ;;  %v3737_v20 = vadd.f32 0.112945676, %v3736_v13  ;;  %v3762_v62 = vadd.f32 0.00028619796, %v3761_v6  ;;  %v3725_v11 = vmul.f32 %v3724_v56, %v9397_v18  ;;  %v10195_v19 = vld [vmem:[#allocation49_spill] sm:$0xff] }
 0x45b   : > { %v3773_v41 = vadd.f32 0.001143296, %v3772_v16  ;;  %v3947_v38 = vpack.c.bf16 %v8414_v53, %v8244_v22  ;;  %v3948_v1 = vpack.c.bf16 %v10194_v23, %v10193_v25  ;;  %v9462_v4 = vadd.f32 %v9370_v2, %v3585_v49  ;;  %v10196_v6 = vld [vmem:[#allocation36_spill] sm:$0xff]  ;;  %v10198_v25 = vld [vmem:[#allocation46_spill] sm:$0xff] }
 0x45c   : > { %v5595_v17 = vpop.eup %5594  ;;  %vm3588_vm9 = vweird.f32 %v9370_v2  ;;  %5598 = vrcp.f32 %v9446_v42  ;;  %v3738_v21 = vmul.f32 %v3737_v20, %v9397_v18  ;;  %v3650_v43 = vadd.f32 1.1283791, %v3649_v29  ;;  %v10197_v20 = vld [vmem:[#allocation87_spill] sm:$0xff] }
 0x45d   : > { %v3663_v44 = vmul.f32 %v5595_v17, %v9428_v37  ;;  %v3689_v40 = vmul.f32 %v3688_v7, %v9360_v50  ;;  %v3774_v22 = vmul.f32 %v3773_v41, %v9422_v24  ;;  %4252 = vmatmul.bf16.gmra.mxu0 %v3947_v38  ;;  %4301 = vmatmul.bf16.gmra.mxu1 %v3948_v1  ;;  %v3673_v53 = vand.u32 2147483648, %v9428_v37  ;;  %vm9489_vm12 = vmor %vm3587_vm8, %vm3588_vm9 }
 0x45e   : > { %v3739_v61 = vadd.f32 0.4994258, %v3738_v21  ;;  %v3763_v28 = vmul.f32 %v3762_v62, %v9422_v24  ;;  %v3949_v56 = vpack.c.bf16 %v10196_v6, %v10195_v19  ;;  %v3726_v16 = vadd.f32 0.05243302, %v3725_v11 }
 0x45f   : > { %v5597_v49 = vpop.eup %5596  ;;  %v3664_v13 = vsub.f32 1.0, %v3663_v44  ;;  %v3775_v29 = vadd.f32 0.014752088, %v3774_v22  ;;  %v3946_v23 = vpack.c.bf16 %v10198_v25, %v10197_v20  ;;  %vm3667_vm10 = vweird.f32 %v9428_v37 }
 0x460   : > { %v3671_v50 = vand.u32 2147483647, %v9428_v37  ;;  %v3703_v7 = vmul.f32 %v5597_v49, %v9443_v45  ;;  %v3740_v41 = vmul.f32 %v3739_v61, %v9397_v18  ;;  %vm3668_vm11 = vweird.f32 %v5595_v17 }
 0x461   : > { %v3665_v38 = vmul.f32 %v5595_v17, %v3664_v13  ;;  %v3690_v62 = vadd.f32 1.1283791, %v3689_v40  ;;  %v3776_v1 = vmul.f32 %v3775_v29, %v9422_v24  ;;  %4350 = vmatmul.bf16.gmra.mxu2 %v3949_v56  ;;  %v3674_v11 = vor.u32 1.1754944e-38, %v3673_v53  ;;  %vm3669_vm13 = vmor %vm3667_vm10, %vm3668_vm11 }
 0x462   : > { %v9481_v21 = vpop.eup %5598  ;;  %v3704_v44 = vsub.f32 1.0, %v3703_v7  ;;  %v9483_v22 = vadd.f32 1.0, %v3740_v41  ;;  %v3764_v19 = vadd.f32 0.0036580483, %v3763_v28  ;;  %v3713_v40 = vand.u32 2147483648, %v9443_v45 }
 0x463   : > { %v3666_v61 = vadd.f32 %v5595_v17, %v3665_v38  ;;  %v3727_v56 = vmul.f32 %v3726_v16, %v9397_v18  ;;  %v3777_v13 = vadd.f32 0.112945676, %v3776_v1  ;;  %vm3708_vm14 = vweird.f32 %v5597_v49 }
 0x464   : > { %v3705_v53 = vmul.f32 %v5597_v49, %v3704_v44  ;;  %v3711_v28 = vand.u32 2147483647, %v9443_v45  ;;  %5600 = vrcp.f32 %v9483_v22  ;;  %v3590_v29 = vsel %vm9489_vm12, %v9370_v2, %v9462_v4 }
 0x465   : > { %v3670_v20 = vsel %vm3669_vm13, %v5595_v17, %v3666_v61  ;;  %vm3672_vm15 = vcmp.eq.f32.partialorder %v3671_v50, 8.507059e+37  ;;  %v3778_v25 = vmul.f32 %v3777_v13, %v9422_v24  ;;  %v3651_v16 = vmul.f32 %v3650_v43, %v9309_v47 }
 0x466   : > { %v3675_v7 = vsel %vm3672_vm15, %v3674_v11, %v3670_v20  ;;  %v3706_v37 = vadd.f32 %v5597_v49, %v3705_v53  ;;  %vm3707_vm0 = vweird.f32 %v9443_v45  ;;  %v3691_v41 = vmul.f32 %v3690_v62, %v9332_v55 }
 0x467   : > { %vm3709_vm1 = vmor %vm3707_vm0, %vm3708_vm14  ;;  %v3714_v38 = vor.u32 1.1754944e-38, %v3713_v40  ;;  %v3728_v1 = vadd.f32 0.18741608, %v3727_v56  ;;  %v3779_v44 = vadd.f32 0.4994258, %v3778_v25  ;;  %4394 = vmatmul.bf16.gmra.mxu3 %v3946_v23  ;;  %v3676_v14 = vmul.f32 %v3675_v7, %v3651_v16 }
 0x468   : > { %v3710_v6 = vsel %vm3709_vm1, %v5597_v49, %v3706_v37  ;;  %vm3712_vm2 = vcmp.eq.f32.partialorder %v3711_v28, 8.507059e+37  ;;  %v3765_v2 = vmul.f32 %v3764_v19, %v9422_v24  ;;  %v3951_v47 = vpack.c.bf16 %v9073_v35, %v8871_v26 }
 0x469   : > { %v3715_v17 = vsel %vm3712_vm2, %v3714_v38, %v3710_v6  ;;  %v3780_v4 = vmul.f32 %v3779_v44, %v9422_v24  ;;  %v3952_v45 = vpack.c.bf16 %v9170_v5, %v8876_v30  ;;  %v5023_v43 = vclamps-f32 %v9439_v15, 1.0 }
 0x46a   : > { %v5601_v55 = vpop.eup %5600  ;;  %v3571_v23 = vmul.f32 %v9432_v8, %v9106_v59  ;;  %vm3592_vm3 = vcmp.eq.f32.partialorder %v3591_v48, 8.507059e+37  ;;  %v3716_v49 = vmul.f32 %v3715_v17, %v3691_v41  ;;  %v3729_v62 = vmul.f32 %v3728_v1, %v9397_v18  ;;  %v10202_v41 = vld [vmem:[#allocation58_spill] sm:$0xff] }
 0x46b   : > { %v3595_v50 = vsel %vm3592_vm3, %v9454_v51, %v3590_v29  ;;  %v3743_v11 = vmul.f32 %v5601_v55, %v9483_v22  ;;  %v9521_v26 = vadd.f32 1.0, %v3780_v4  ;;  %v3607_v30 = vmul.f32 %v9441_v54, %v9205_v63 }
 0x46c   : > { %v3623_v35 = vmul.f32 %v9481_v21, %v9446_v42  ;;  %v5026_v5 = vclamps-f32 %v3676_v14, 1.0  ;;  %v3766_v59 = vadd.f32 0.05243302, %v3765_v2  ;;  %v5027_v8 = vclamps-f32 %v3716_v49, 1.0 }
 0x46d   : > { %v3744_v46 = vsub.f32 1.0, %v3743_v11  ;;  %5602 = vrcp.f32 %v9521_v26  ;;  %4257 = vmatmul.bf16.gmra.mxu0 %v3951_v47  ;;  %4306 = vmatmul.bf16.gmra.mxu1 %v3952_v45  ;;  %v3953_v18 = vpack.c.bf16 %v9173_v58, %v8878_v39  ;;  %v5021_v15 = vclamps-f32 %v9250_v27, 1.0  ;;  %v4375_v11 = vpop.f32.mrf.mxu3 }
 0x46e   : > { %v10201_v48 = vclamps-f32 %v9273_v52, 1.0  ;;  %v3596_v54 = vmul.f32 %v3595_v50, %v3571_v23  ;;  %v3753_v19 = vand.u32 2147483648, %v9483_v22  ;;  %v3730_v61 = vadd.f32 1.1283791, %v3729_v62  ;;  %v4228_v23 = vpop.f32.mrf.mxu0 }
 0x46f   : > { %v3745_v14 = vmul.f32 %v5601_v55, %v3744_v46  ;;  %vm3748_vm4 = vweird.f32 %v5601_v55  ;;  %v3751_v40 = vand.u32 2147483647, %v9483_v22  ;;  %v3856_v56 = vadd.f32 1.0, %v5023_v43 }
 0x470   : > { %v3855_v51 = vadd.f32 1.0, %v10201_v48  ;;  %v3608_v13 = vadd.f32 0.18741608, %v3607_v30  ;;  %v3859_v53 = vadd.f32 1.0, %v5026_v5  ;;  %v3767_v28 = vmul.f32 %v3766_v59, %v9422_v24  ;;  %v10203_v48 = vld [vmem:[#allocation48_spill] sm:$0xff] }
 0x471   : > { %v3624_v29 = vsub.f32 1.0, %v3623_v35  ;;  %v3860_v39 = vadd.f32 1.0, %v5027_v8  ;;  %v3746_v58 = vadd.f32 %v5601_v55, %v3745_v14  ;;  %vm3747_vm5 = vweird.f32 %v9483_v22  ;;  %4355 = vmatmul.bf16.gmra.mxu2 %v3953_v18 }
 0x472   : > { %v5024_v27 = vclamps-f32 %v3596_v54, 1.0  ;;  %v1171_v52 = vmul.f32 0.5, %v9299_v32  ;;  %v1172_v20 = vmul.f32 0.5, %v9315_v9  ;;  %vm3749_vm6 = vmor %vm3747_vm5, %vm3748_vm4  ;;  %v3754_v25 = vor.u32 1.1754944e-38, %v3753_v19 }
 0x473   : > { %v9539_v16 = vpop.eup %5602  ;;  %v3731_v7 = vmul.f32 %v3730_v61, %v9383_v3  ;;  %v3750_v37 = vsel %vm3749_vm6, %v5601_v55, %v3746_v58  ;;  %vm3752_vm7 = vcmp.eq.f32.partialorder %v3751_v40, 8.507059e+37  ;;  %v3950_v38 = vpack.c.bf16 %v8855_v57, %v10202_v41 }
 0x474   : > { %v3923_v1 = vmul.f32 %v3859_v53, %v1171_v52  ;;  %v3755_v44 = vsel %vm3752_vm7, %v3754_v25, %v3750_v37  ;;  %v3768_v22 = vadd.f32 0.18741608, %v3767_v28  ;;  %v3783_v32 = vmul.f32 %v9539_v16, %v9521_v26 }
 0x475   : > { %v3854_v6 = vadd.f32 1.0, %v5021_v15  ;;  %v3919_v9 = vmul.f32 %v3855_v51, %v8901_v33  ;;  %v3924_v2 = vmul.f32 %v3860_v39, %v1172_v20  ;;  %v3756_v17 = vmul.f32 %v3755_v44, %v3731_v7  ;;  %v9557_v33 = vld [vmem:[%s526_s24] ss:$0 sm:$0xff]  ;;  %v4377_v41 = vpop.f32.mrf.mxu3 }
 0x476   : > { %v1169_v4 = vmul.f32 0.5, %v9082_v34  ;;  %v3857_v3 = vadd.f32 1.0, %v5024_v27  ;;  %v3625_v47 = vmul.f32 %v9481_v21, %v3624_v29  ;;  %v3784_v45 = vsub.f32 1.0, %v3783_v32  ;;  %v4277_v34 = vpop.f32.mrf.mxu1  ;;  %v4230_v27 = vpop.f32.mrf.mxu0 }
 0x477   : > { %v3920_v57 = vmul.f32 %v3856_v56, %v8935_v0  ;;  %v3609_v55 = vmul.f32 %v3608_v13, %v9205_v63  ;;  %vm3628_vm8 = vweird.f32 %v9481_v21  ;;  %v5028_v43 = vclamps-f32 %v3756_v17, 1.0  ;;  %4399 = vmatmul.bf16.gmra.mxu3 %v3950_v38  ;;  %v4326_v63 = vpop.f32.mrf.mxu2  ;;  %v10206_v13 = vld [vmem:[#allocation70_spill] sm:$0xff]  ;;  %v10209_v38 = vld [vmem:[#allocation61_spill] sm:$0xff] }
 0x478   : > { %v1173_v49 = vmul.f32 0.5, %v9356_v31  ;;  %v3769_v50 = vmul.f32 %v3768_v22, %v9422_v24  ;;  %v3785_v0 = vmul.f32 %v9539_v16, %v3784_v45  ;;  %v3955_v62 = vpack.c.bf16 %v3923_v1, %v3919_v9  ;;  %v5604_v22 = vld [vmem:[#allocation2 + $0x30] sm:$0xff] }
 0x479   : > { %v3861_v30 = vadd.f32 1.0, %v5028_v43  ;;  %vm3788_vm9 = vweird.f32 %v9539_v16  ;;  %v3956_v35 = vpack.c.bf16 %v3924_v2, %v3920_v57  ;;  %v4229_v5 = vadd.f32 %v9557_v33, %v4228_v23  ;;  %v5605_v43 = vld [vmem:[#allocation2] sm:$0xff] }
 0x47a   : > { %v3921_v59 = vmul.f32 %v3857_v3, %v1169_v4  ;;  %v3626_v8 = vadd.f32 %v9481_v21, %v3625_v47  ;;  %v3786_v46 = vadd.f32 %v9539_v16, %v3785_v0  ;;  %v3793_v31 = vand.u32 2147483648, %v9521_v26 }
 0x47b   : > { %v3925_v18 = vmul.f32 %v3861_v30, %v1173_v49  ;;  %vm3787_vm10 = vweird.f32 %v9521_v26  ;;  %v3791_v24 = vand.u32 2147483647, %v9521_v26  ;;  %v4278_v15 = vadd.f32 %v4277_v34, %v4229_v5 }
 0x47c   : > { %v1166_v51 = vmul.f32 0.5, %v10203_v48  ;;  %vm3627_vm11 = vweird.f32 %v9446_v42  ;;  %v3631_v54 = vand.u32 2147483647, %v9446_v42  ;;  %v3633_v19 = vand.u32 2147483648, %v9446_v42  ;;  %vm9575_vm12 = vmor %vm3787_vm10, %vm3788_vm9 }
 0x47d   : > { %v3770_v14 = vadd.f32 1.1283791, %v3769_v50  ;;  %v3790_v26 = vsel %vm9575_vm12, %v9539_v16, %v3786_v46  ;;  %4262 = vmatmul.bf16.gmra.mxu0 %v3955_v62  ;;  %4311 = vmatmul.bf16.gmra.mxu1 %v3956_v35  ;;  %v3957_v40 = vpack.c.bf16 %v3925_v18, %v3921_v59  ;;  %v4327_v56 = vadd.f32 %v4326_v63, %v4278_v15  ;;  %vm9585_vm13 = vmor %vm3627_vm11, %vm3628_vm8  ;;  %v4380_v49 = vpop.f32.mrf.mxu3 }
 0x47e   : > { %v1162_v53 = vmul.f32 0.5, %v10206_v13  ;;  %v3918_v28 = vmul.f32 %v3854_v6, %v1166_v51  ;;  %v3794_v29 = vor.u32 1.1754944e-38, %v3793_v31  ;;  %v3610_v39 = vadd.f32 1.1283791, %v3609_v55  ;;  %v4279_v52 = vpop.f32.mrf.mxu1  ;;  %v4233_v57 = vpop.f32.mrf.mxu0  ;;  %v5606_v31 = vld [vmem:[#allocation2 + $0x58] sm:$0xff] }
 0x47f   : > { %v3630_v58 = vsel %vm9585_vm13, %v9481_v21, %v3626_v8  ;;  %vm3792_vm14 = vcmp.eq.f32.partialorder %v3791_v24, 8.507059e+37  ;;  %v4376_v20 = vadd.f32 %v4375_v11, %v4327_v56  ;;  %v3634_v25 = vor.u32 1.1754944e-38, %v3633_v19  ;;  %v4328_v37 = vpop.f32.mrf.mxu2 }
 0x480   : > { %v3795_v16 = vsel %vm3792_vm14, %v3794_v29, %v3790_v26  ;;  %v4231_v7 = vadd.f32 %v9557_v33, %v4230_v27  ;;  %v3914_v1 = vmul.f32 %v10209_v38, %v1162_v53  ;;  %vm3632_vm15 = vcmp.eq.f32.partialorder %v3631_v54, 8.507059e+37  ;;  %v5607_v26 = vld [vmem:[#allocation2 + $0x18] sm:$0xff] }
 0x481   : > { %v3771_v44 = vmul.f32 %v3770_v14, %v9391_v10  ;;  %4360 = vmatmul.bf16.gmra.mxu2 %v3957_v40  ;;  %v9595_v32 = vadd.f32 %v5604_v22, %v4376_v20  ;;  %v3635_v21 = vsel %vm3632_vm15, %v3634_v25, %v3630_v58  ;;  %v3611_v9 = vmul.f32 %v3610_v39, %v9156_v60  ;;  %v5608_v58 = vld [vmem:[#allocation2 + $0x50] sm:$0xff] }
 0x482   : > { %v4280_v6 = vadd.f32 %v4279_v52, %v4231_v7  ;;  %v3954_v17 = vpack.c.bf16 %v3918_v28, %v3914_v1  ;;  %v4234_v10 = vadd.f32 %v9557_v33, %v4233_v57  ;;  %v1174_v11 = vmul.f32 0.5, %v9378_v12 }
 0x483   : > { %v3796_v2 = vmul.f32 %v3795_v16, %v3771_v44  ;;  %4431 = vst [vmem:[#allocation2 + $0x30] sm:$0xff] %v9595_v32  ;;  %v3636_v3 = vmul.f32 %v3635_v21, %v3611_v9  ;;  %v1170_v35 = vmul.f32 0.5, %v9139_v36 }
 0x484   : > { %v4329_v4 = vadd.f32 %v4328_v37, %v4280_v6 }
 0x485   : > { %v5029_v45 = vclamps-f32 %v3796_v2, 1.0  ;;  %v5025_v50 = vclamps-f32 %v3636_v3, 1.0  ;;  %v4382_v48 = vpop.f32.mrf.mxu3 }
 0x486   : > { %v4378_v47 = vadd.f32 %v4377_v41, %v4329_v4  ;;  %v4282_v55 = vpop.f32.mrf.mxu1  ;;  %v4235_v59 = vpop.f32.mrf.mxu0  ;;  %v5609_v41 = vld [vmem:[#allocation2 + $0x68] sm:$0xff] }
 0x487   : > { %4404 = vmatmul.bf16.gmra.mxu3 %v3954_v17  ;;  %v4331_v34 = vpop.f32.mrf.mxu2  ;;  %v4283_v60 = vadd.f32 %v4282_v55, %v4234_v10  ;;  %v3862_v0 = vadd.f32 1.0, %v5029_v45  ;;  %v3858_v63 = vadd.f32 1.0, %v5025_v50  ;;  %v4236_v46 = vadd.f32 %v9557_v33, %v4235_v59  ;;  %v5611_v59 = vld [vmem:[#allocation2 + $0x48] sm:$0xff] }
 0x488   : > { %v9600_v23 = vadd.f32 %v5605_v43, %v4378_v47 }
 0x489   : > { %v4332_v62 = vadd.f32 %v4331_v34, %v4283_v60  ;;  %v3926_v5 = vmul.f32 %v3862_v0, %v1174_v11  ;;  %v3922_v15 = vmul.f32 %v3858_v63, %v1170_v35 }
 0x48a   : > { %4432 = vst [vmem:[#allocation2] sm:$0xff] %v9600_v23 }
 0x48b   : > { %v4381_v30 = vadd.f32 %v4380_v49, %v4332_v62  ;;  %v3958_v54 = vpack.c.bf16 %v3926_v5, %v3922_v15  ;;  %v5610_v49 = vld [vmem:[#allocation2 + $0x8] sm:$0xff] }
 0x48d   : > { %v9606_v18 = vadd.f32 %v5606_v31, %v4381_v30  ;;  %v4385_v53 = vpop.f32.mrf.mxu3 }
 0x48e   : > { %v4284_v8 = vpop.f32.mrf.mxu1  ;;  %v4238_v61 = vpop.f32.mrf.mxu0 }
 0x48f   : > { %v4333_v24 = vpop.f32.mrf.mxu2  ;;  %v4285_v51 = vadd.f32 %v4284_v8, %v4236_v46  ;;  %4433 = vst [vmem:[#allocation2 + $0x58] sm:$0xff] %v9606_v18  ;;  %v4239_v14 = vadd.f32 %v9557_v33, %v4238_v61 }
 0x491   : > { %v4334_v19 = vadd.f32 %v4333_v24, %v4285_v51 }
 0x493   : > { %v4383_v12 = vadd.f32 %v4382_v48, %v4334_v19  ;;  %v5612_v19 = vld [vmem:[#allocation2 + $0x40] sm:$0xff] }
 0x495   : > { %v9610_v40 = vadd.f32 %v5607_v26, %v4383_v12  ;;  %v4387_v7 = vpop.f32.mrf.mxu3 }
 0x496   : > { %v4287_v36 = vpop.f32.mrf.mxu1  ;;  %v4240_v29 = vpop.f32.mrf.mxu0 }
 0x497   : > { %4409 = vmatmul.bf16.gmra.mxu3 %v3958_v54  ;;  %v4336_v56 = vpop.f32.mrf.mxu2  ;;  %v4288_v13 = vadd.f32 %v4287_v36, %v4239_v14  ;;  %4434 = vst [vmem:[#allocation2 + $0x18] sm:$0xff] %v9610_v40  ;;  %v4241_v39 = vadd.f32 %v9557_v33, %v4240_v29 }
 0x499   : > { %v4337_v28 = vadd.f32 %v4336_v56, %v4288_v13 }
 0x49b   : > { %v4386_v42 = vadd.f32 %v4385_v53, %v4337_v28 }
 0x49d   : > { %v9614_v27 = vadd.f32 %v5608_v58, %v4386_v42  ;;  %v5613_v42 = vld [vmem:[#allocation2 + $0x20] sm:$0xff] }
 0x49e   : > { %v4289_v52 = vpop.f32.mrf.mxu1  ;;  %v4243_v1 = vpop.f32.mrf.mxu0 }
 0x49f   : > { %v4338_v20 = vpop.f32.mrf.mxu2  ;;  %v4290_v25 = vadd.f32 %v4289_v52, %v4241_v39  ;;  %4435 = vst [vmem:[#allocation2 + $0x50] sm:$0xff] %v9614_v27  ;;  %v4244_v17 = vadd.f32 %v9557_v33, %v4243_v1 }
 0x4a1   : > { %v4339_v16 = vadd.f32 %v4338_v20, %v4290_v25 }
 0x4a3   : > { %v4388_v37 = vadd.f32 %v4387_v7, %v4339_v16  ;;  %v5614_v7 = vld [vmem:[#allocation2 + $0x10] sm:$0xff] }
 0x4a5   : > { %v9617_v38 = vadd.f32 %v5609_v41, %v4388_v37 }
 0x4a6   : > { %v4292_v44 = vpop.f32.mrf.mxu1  ;;  %v4245_v21 = vpop.f32.mrf.mxu0 }
 0x4a7   : > { %4436 = vst [vmem:[#allocation2 + $0x68] sm:$0xff] %v9617_v38  ;;  %v4293_v4 = vadd.f32 %v4292_v44, %v4244_v17  ;;  %v4246_v57 = vadd.f32 %v9557_v33, %v4245_v21  ;;  %v5615_v17 = vld [vmem:[#allocation2 + $0x38] sm:$0xff] }
 0x4ae   : > { %v4294_v6 = vpop.f32.mrf.mxu1 }
 0x4af   : > { %v4295_v34 = vadd.f32 %v4294_v6, %v4246_v57 }
 0x4c0   : > { %v4248_v2 = vpop.f32.mrf.mxu0 }
 0x4c1   : > { %v4249_v63 = vadd.f32 %v9557_v33, %v4248_v2 }
 0x4c2   : > { %v4297_v3 = vpop.f32.mrf.mxu1 }
 0x4c3   : > { %v4298_v5 = vadd.f32 %v4297_v3, %v4249_v63 }
 0x4c4   : > { %v4341_v22 = vpop.f32.mrf.mxu2 }
 0x4c5   : > { %v4342_v45 = vadd.f32 %v4341_v22, %v4293_v4 }
 0x4c8   : > { %v4250_v10 = vpop.f32.mrf.mxu0 }
 0x4c9   : > { %v4251_v31 = vadd.f32 %v9557_v33, %v4250_v10 }
 0x4ca   : > { %v4299_v0 = vpop.f32.mrf.mxu1 }
 0x4cb   : > { %v4300_v54 = vadd.f32 %v4299_v0, %v4251_v31 }
 0x4cc   : > { %v4343_v9 = vpop.f32.mrf.mxu2 }
 0x4cd   : > { %v4344_v60 = vadd.f32 %v4343_v9, %v4295_v34 }
 0x4d4   : > { %v4346_v47 = vpop.f32.mrf.mxu2 }
 0x4d5   : > { %v4347_v46 = vadd.f32 %v4346_v47, %v4298_v5 }
 0x4da   : > { %v4390_v55 = vpop.f32.mrf.mxu3  ;;  %v4253_v35 = vpop.f32.mrf.mxu0 }
 0x4db   : > { %v4391_v43 = vadd.f32 %v4390_v55, %v4342_v45  ;;  %v4302_v24 = vpop.f32.mrf.mxu1  ;;  %v4254_v14 = vadd.f32 %v9557_v33, %v4253_v35 }
 0x4dc   : > { %v4348_v62 = vpop.f32.mrf.mxu2 }
 0x4dd   : > { %v9622_v50 = vadd.f32 %v5610_v49, %v4391_v43  ;;  %v4349_v36 = vadd.f32 %v4348_v62, %v4300_v54  ;;  %v4303_v28 = vadd.f32 %v4302_v24, %v4254_v14  ;;  %v5616_v49 = vld [vmem:[#allocation2 + $0x60] sm:$0xff] }
 0x4df   : > { %4437 = vst [vmem:[#allocation2 + $0x8] sm:$0xff] %v9622_v50 }
 0x4e2   : > { %v4392_v11 = vpop.f32.mrf.mxu3  ;;  %v4255_v61 = vpop.f32.mrf.mxu0 }
 0x4e3   : > { %v4393_v30 = vadd.f32 %v4392_v11, %v4344_v60  ;;  %v4304_v13 = vpop.f32.mrf.mxu1  ;;  %v4256_v52 = vadd.f32 %v9557_v33, %v4255_v61 }
 0x4e4   : > { %v4351_v48 = vpop.f32.mrf.mxu2 }
 0x4e5   : > { %v9626_v8 = vadd.f32 %v5611_v59, %v4393_v30  ;;  %v4352_v39 = vadd.f32 %v4351_v48, %v4303_v28  ;;  %v4305_v16 = vadd.f32 %v4304_v13, %v4256_v52  ;;  %v5617_v59 = vld [vmem:[#allocation2 + $0x70] sm:$0xff] }
 0x4e7   : > { %4438 = vst [vmem:[#allocation2 + $0x48] sm:$0xff] %v9626_v8 }
 0x4ea   : > { %v4395_v15 = vpop.f32.mrf.mxu3  ;;  %v4258_v58 = vpop.f32.mrf.mxu0 }
 0x4eb   : > { %v4396_v51 = vadd.f32 %v4395_v15, %v4347_v46  ;;  %v4307_v41 = vpop.f32.mrf.mxu1  ;;  %v4259_v22 = vadd.f32 %v9557_v33, %v4258_v58 }
 0x4ec   : > { %v4353_v53 = vpop.f32.mrf.mxu2 }
 0x4ed   : > { %v9630_v12 = vadd.f32 %v5612_v19, %v4396_v51  ;;  %v4354_v44 = vadd.f32 %v4353_v53, %v4305_v16  ;;  %v4308_v2 = vadd.f32 %v4307_v41, %v4259_v22  ;;  %v5619_v53 = vld [vmem:[#allocation2 + $0x28] sm:$0xff] }
 0x4ef   : > { %4439 = vst [vmem:[#allocation2 + $0x40] sm:$0xff] %v9630_v12 }
 0x4f2   : > { %v4397_v26 = vpop.f32.mrf.mxu3  ;;  %v4260_v6 = vpop.f32.mrf.mxu0 }
 0x4f3   : > { %v4398_v56 = vadd.f32 %v4397_v26, %v4349_v36  ;;  %v4309_v3 = vpop.f32.mrf.mxu1  ;;  %v4261_v57 = vadd.f32 %v9557_v33, %v4260_v6  ;;  %v5618_v36 = vld [vmem:[#allocation2 + $0x78] sm:$0xff] }
 0x4f4   : > { %v4356_v1 = vpop.f32.mrf.mxu2 }
 0x4f5   : > { %v9634_v29 = vadd.f32 %v5613_v42, %v4398_v56  ;;  %v4357_v47 = vadd.f32 %v4356_v1, %v4308_v2  ;;  %v4310_v34 = vadd.f32 %v4309_v3, %v4261_v57 }
 0x4f7   : > { %4440 = vst [vmem:[#allocation2 + $0x20] sm:$0xff] %v9634_v29 }
 0x4fa   : > { %v4400_v20 = vpop.f32.mrf.mxu3  ;;  %v4263_v43 = vpop.f32.mrf.mxu0 }
 0x4fb   : > { %v4401_v25 = vadd.f32 %v4400_v20, %v4352_v39  ;;  %v4264_v62 = vadd.f32 %v9557_v33, %v4263_v43  ;;  %v4312_v63 = vpop.f32.mrf.mxu1 }
 0x4fc   : > { %v4358_v45 = vpop.f32.mrf.mxu2 }
 0x4fd   : > { %v9638_v37 = vadd.f32 %v5614_v7, %v4401_v25  ;;  %v4359_v0 = vadd.f32 %v4358_v45, %v4310_v34  ;;  %v4313_v5 = vadd.f32 %v4312_v63, %v4264_v62 }
 0x4ff   : > { %4441 = vst [vmem:[#allocation2 + $0x10] sm:$0xff] %v9638_v37 }
 0x502   : > { %v4402_v21 = vpop.f32.mrf.mxu3  ;;  %v4265_v31 = vpop.f32.mrf.mxu0 }
 0x503   : > { %v4403_v9 = vadd.f32 %v4402_v21, %v4354_v44  ;;  %v4266_v15 = vadd.f32 %v9557_v33, %v4265_v31  ;;  %v4314_v54 = vpop.f32.mrf.mxu1 }
 0x504   : > { %v4361_v30 = vpop.f32.mrf.mxu2 }
 0x505   : > { %v9642_v4 = vadd.f32 %v5615_v17, %v4403_v9  ;;  %v4362_v24 = vadd.f32 %v4361_v30, %v4313_v5  ;;  %v4315_v61 = vadd.f32 %v4314_v54, %v4266_v15 }
 0x507   : > { %4442 = vst [vmem:[#allocation2 + $0x38] sm:$0xff] %v9642_v4 }
 0x50a   : > { %v4405_v55 = vpop.f32.mrf.mxu3 }
 0x50b   : > { %v4406_v10 = vadd.f32 %v4405_v55, %v4357_v47 }
 0x50c   : > { %v4363_v19 = vpop.f32.mrf.mxu2 }
 0x50d   : > { %v9646_v60 = vadd.f32 %v5616_v49, %v4406_v10  ;;  %v4364_v26 = vadd.f32 %v4363_v19, %v4315_v61 }
 0x50f   : > { %4443 = vst [vmem:[#allocation2 + $0x60] sm:$0xff] %v9646_v60 }
 0x512   : > { %v4407_v11 = vpop.f32.mrf.mxu3 }
 0x513   : > { %v4408_v35 = vadd.f32 %v4407_v11, %v4359_v0 }
 0x515   : > { %v9650_v46 = vadd.f32 %v5617_v59, %v4408_v35 }
 0x517   : > { %4444 = vst [vmem:[#allocation2 + $0x70] sm:$0xff] %v9650_v46 }
 0x51a   : > { %v4410_v48 = vpop.f32.mrf.mxu3 }
 0x51b   : > { %v4411_v51 = vadd.f32 %v4410_v48, %v4362_v24 }
 0x51d   : > { %v9654_v14 = vadd.f32 %v5618_v36, %v4411_v51 }
 0x51f   : > { %4445 = vst [vmem:[#allocation2 + $0x78] sm:$0xff] %v9654_v14 }
 0x522   : > { %v4412_v56 = vpop.f32.mrf.mxu3 }
 0x523   : > { %v4413_v13 = vadd.f32 %v4412_v56, %v4364_v26  ;;  %4450 = sbr.rel (%p5158_p2) target bundleno = 1513 (0x5e9), region = 88 }
 0x525   : > { %v4430_v28 = vadd.f32 %v5619_v53, %v4413_v13 }
 0x527   : > { %4446 = vst [vmem:[#allocation2 + $0x28] sm:$0xff] %v4430_v28 }
 0x528   : > { %v5278_v33 = vld [vmem:[#allocation11 + $0x38] sm:$0xff]  ;;  %v5277_v42 = vld [vmem:[#allocation11 + $0x30] sm:$0xff]  ;;  %v5276_v39 = vld [vmem:[#allocation11 + $0x28] sm:$0xff]  ;;  %v4451_v7 = vpack.c.bf16 %v9600_v23, %v9595_v32  ;;  %v4453_v41 = vpack.c.bf16 %v9617_v38, %v9614_v27  ;;  %v4455_v1 = vpack.c.bf16 %v9634_v29, %v9630_v12  ;;  %v4457_v44 = vpack.c.bf16 %v9650_v46, %v9646_v60 }
 0x529   : > { %4527 = vmatpush.bf16.msra.mxu0 %v5278_v33  ;;  %5304 = vmatpush.bf16.msra.mxu1 %v5278_v33  ;;  %v5275_v58 = vld [vmem:[#allocation11 + $0x20] sm:$0xff]  ;;  %v5274_v52 = vld [vmem:[#allocation11 + $0x18] sm:$0xff]  ;;  %v5273_v20 = vld [vmem:[#allocation11 + $0x10] sm:$0xff]  ;;  %v4452_v32 = vpack.c.bf16 %v9610_v40, %v9606_v18  ;;  %v4454_v23 = vpack.c.bf16 %v9626_v8, %v9622_v50  ;;  %v4456_v27 = vpack.c.bf16 %v9642_v4, %v9638_v37 }
 0x52a   : > { %5305 = vmatpush.bf16.msra.mxu2 %v5278_v33  ;;  %5306 = vmatpush.bf16.msra.mxu3 %v5278_v33  ;;  %v5272_v25 = vld [vmem:[#allocation11 + $0x8] sm:$0xff]  ;;  %v5271_v16 = vld [vmem:[#allocation11] sm:$0xff]  ;;  %v4458_v38 = vpack.c.bf16 %v4430_v28, %v9654_v14  ;;  %v5620_v12 = vld [vmem:[%s10210_s11] ss:$0 sm:$0xff] }
 0x52d   : > { %4528 = vmatpush.bf16.msra.mxu0 %v5277_v42  ;;  %5307 = vmatpush.bf16.msra.mxu1 %v5277_v42 }
 0x52e   : > { %5308 = vmatpush.bf16.msra.mxu2 %v5277_v42  ;;  %5309 = vmatpush.bf16.msra.mxu3 %v5277_v42 }
 0x531   : > { %4529 = vmatpush.bf16.msra.mxu0 %v5276_v39  ;;  %5310 = vmatpush.bf16.msra.mxu1 %v5276_v39 }
 0x532   : > { %5311 = vmatpush.bf16.msra.mxu2 %v5276_v39  ;;  %5312 = vmatpush.bf16.msra.mxu3 %v5276_v39 }
 0x535   : > { %4530 = vmatpush.bf16.msra.mxu0 %v5275_v58  ;;  %5313 = vmatpush.bf16.msra.mxu1 %v5275_v58 }
 0x536   : > { %5314 = vmatpush.bf16.msra.mxu2 %v5275_v58  ;;  %5315 = vmatpush.bf16.msra.mxu3 %v5275_v58 }
 0x539   : > { %4531 = vmatpush.bf16.msra.mxu0 %v5274_v52  ;;  %5316 = vmatpush.bf16.msra.mxu1 %v5274_v52 }
 0x53a   : > { %5317 = vmatpush.bf16.msra.mxu2 %v5274_v52  ;;  %5318 = vmatpush.bf16.msra.mxu3 %v5274_v52 }
 0x53d   : > { %4532 = vmatpush.bf16.msra.mxu0 %v5273_v20  ;;  %5319 = vmatpush.bf16.msra.mxu1 %v5273_v20 }
 0x53e   : > { %5320 = vmatpush.bf16.msra.mxu2 %v5273_v20  ;;  %5321 = vmatpush.bf16.msra.mxu3 %v5273_v20 }
 0x541   : > { %4533 = vmatpush.bf16.msra.mxu0 %v5272_v25  ;;  %5322 = vmatpush.bf16.msra.mxu1 %v5272_v25 }
 0x542   : > { %5323 = vmatpush.bf16.msra.mxu2 %v5272_v25  ;;  %5324 = vmatpush.bf16.msra.mxu3 %v5272_v25 }
 0x545   : > { %4534 = vmatpush.bf16.msra.mxu0 %v5271_v16  ;;  %5325 = vmatpush.bf16.msra.mxu1 %v5271_v16 }
 0x546   : > { %5326 = vmatpush.bf16.msra.mxu2 %v5271_v16  ;;  %5327 = vmatpush.bf16.msra.mxu3 %v5271_v16 }
 0x548   : > { %4535 = vmatmul.bf16.vlgmr.msra.gmra.mxu0 %v4451_v7  ;;  %4545 = vmatmul.bf16.vlgmr.msra.gmra.mxu1 %v4453_v41 }
 0x549   : > { %4555 = vmatmul.bf16.vlgmr.msra.gmra.mxu2 %v4455_v1  ;;  %4565 = vmatmul.bf16.vlgmr.msra.gmra.mxu3 %v4457_v44 }
 0x558   : > { %4540 = vmatmul.bf16.gmra.mxu0 %v4452_v32  ;;  %4550 = vmatmul.bf16.gmra.mxu1 %v4454_v23 }
 0x559   : > { %4560 = vmatmul.bf16.gmra.mxu2 %v4456_v27  ;;  %4570 = vmatmul.bf16.gmra.mxu3 %v4458_v38 }
 0x5c5   : > { %v4536_v29 = vpop.f32.mrf.mxu0  ;;  %v4546_v18 = vpop.f32.mrf.mxu1 }
 0x5c6   : > { %v4537_v40 = vadd.f32 %v5620_v12, %v4536_v29  ;;  %v4547_v50 = vadd.f32 %v5620_v12, %v4546_v18 }
 0x5c8   : > { %4576 = vst [vmem:[%s6245_s1] sm:$0xff] %v4537_v40 }
 0x5c9   : > { %4580 = vst [vmem:[%s6245_s1 + $0x20] sm:$0xff] %v4547_v50 }
 0x5cc   : > { %v4556_v8 = vpop.f32.mrf.mxu2  ;;  %v4566_v37 = vpop.f32.mrf.mxu3 }
 0x5cd   : > { %v4557_v22 = vadd.f32 %v5620_v12, %v4556_v8  ;;  %v4567_v21 = vadd.f32 %v5620_v12, %v4566_v37  ;;  %v4538_v6 = vpop.f32.mrf.mxu0  ;;  %v4548_v9 = vpop.f32.mrf.mxu1 }
 0x5ce   : > { %v4539_v2 = vadd.f32 %v5620_v12, %v4538_v6  ;;  %v4549_v17 = vadd.f32 %v5620_v12, %v4548_v9 }
 0x5cf   : > { %4584 = vst [vmem:[%s6245_s1 + $0x40] sm:$0xff] %v4557_v22 }
 0x5d0   : > { %4588 = vst [vmem:[%s6245_s1 + $0x60] sm:$0xff] %v4567_v21 }
 0x5d1   : > { %4577 = vst [vmem:[%s6245_s1 + $0x8] sm:$0xff] %v4539_v2 }
 0x5d2   : > { %4581 = vst [vmem:[%s6245_s1 + $0x28] sm:$0xff] %v4549_v17 }
 0x5d4   : > { %v4558_v4 = vpop.f32.mrf.mxu2  ;;  %v4568_v3 = vpop.f32.mrf.mxu3 }
 0x5d5   : > { %v4559_v47 = vadd.f32 %v5620_v12, %v4558_v4  ;;  %v4569_v45 = vadd.f32 %v5620_v12, %v4568_v3  ;;  %v4541_v57 = vpop.f32.mrf.mxu0  ;;  %v4551_v55 = vpop.f32.mrf.mxu1 }
 0x5d6   : > { %v4542_v10 = vadd.f32 %v5620_v12, %v4541_v57  ;;  %v4552_v43 = vadd.f32 %v5620_v12, %v4551_v55 }
 0x5d7   : > { %4585 = vst [vmem:[%s6245_s1 + $0x48] sm:$0xff] %v4559_v47 }
 0x5d8   : > { %4589 = vst [vmem:[%s6245_s1 + $0x68] sm:$0xff] %v4569_v45 }
 0x5d9   : > { %4578 = vst [vmem:[%s6245_s1 + $0x10] sm:$0xff] %v4542_v10 }
 0x5da   : > { %4582 = vst [vmem:[%s6245_s1 + $0x30] sm:$0xff] %v4552_v43 }
 0x5dc   : > { %v4561_v34 = vpop.f32.mrf.mxu2  ;;  %v4571_v49 = vpop.f32.mrf.mxu3 }
 0x5dd   : > { %v4562_v60 = vadd.f32 %v5620_v12, %v4561_v34  ;;  %v4572_v0 = vadd.f32 %v5620_v12, %v4571_v49  ;;  %v4543_v62 = vpop.f32.mrf.mxu0  ;;  %v4553_v63 = vpop.f32.mrf.mxu1 }
 0x5de   : > { %v4544_v11 = vadd.f32 %v5620_v12, %v4543_v62  ;;  %v4554_v30 = vadd.f32 %v5620_v12, %v4553_v63 }
 0x5df   : > { %4586 = vst [vmem:[%s6245_s1 + $0x50] sm:$0xff] %v4562_v60 }
 0x5e0   : > { %4590 = vst [vmem:[%s6245_s1 + $0x70] sm:$0xff] %v4572_v0 }
 0x5e1   : > { %4579 = vst [vmem:[%s6245_s1 + $0x18] sm:$0xff] %v4544_v11 }
 0x5e2   : > { %4583 = vst [vmem:[%s6245_s1 + $0x38] sm:$0xff] %v4554_v30 }
 0x5e4   : > { %v4563_v35 = vpop.f32.mrf.mxu2  ;;  %v4573_v5 = vpop.f32.mrf.mxu3 }
 0x5e5   : > { %v4564_v59 = vadd.f32 %v5620_v12, %v4563_v35  ;;  %v4574_v46 = vadd.f32 %v5620_v12, %v4573_v5 }
 0x5e7   : > { %4587 = vst [vmem:[%s6245_s1 + $0x58] sm:$0xff] %v4564_v59 }
 0x5e8   : > { %4591 = vst [vmem:[%s6245_s1 + $0x78] sm:$0xff] %v4574_v46 }
 0x5e9 PF: > { %s10211_s30 = sld [smem:[#allocation21_spill]]  ;;  %s4605_s23 = sshll.u32 %s6245_s1, 4  ;;  %s4606_s23 = int_to_ptr.vmem [resolvable:$true] %s4605_s23 }
 0x5ea   : > { %s10213_s4 = sld [smem:[#allocation112_spill]]  ;;  %s4593_s25 = scalar_lea.sflag [#allocation5], %s427_s12 }
 0x5ef   : > { %s5279_s19 = sshll.u32 %s10211_s30, 7 }
 0x5f0   : > { %s4604_s14 = scalar_lea.hbm %s10213_s4, %s5279_s19  ;;  %s5821_s24 = scalar_lea.hbm %s10213_s4, 256 }
 0x5f1   : > { %s4607_s8 = sshll.u32 %s4604_s14, 4  ;;  %s4608_s8 = int_to_ptr.hbm [resolvable:$true] %s4607_s8 }
 0x5f2   : > { %s5815_s27 = sshra.s32 %s4608_s8, 4  ;;  %s5816_s27 = int_to_ptr.hbm [resolvable:$true] %s5815_s27 }
 0x5f3   : > { %s5817_s20 = scalar_lea.hbm %s5816_s27, 128  ;;  %p5822_p7 = scmp.lt.s32.totalorder %s5816_s27, %s10213_s4 }
 0x5f4   : > { %p5818_p4 = scmp.ne.s32.totalorder %s5816_s27, %s5817_s20  ;;  %p5823_p8 = scmp.lt.s32.totalorder %s5821_s24, %s5817_s20 }
 0x5f6   : > { %p5819_p5 = pnand %p5818_p4, %p6162_p9  ;;  %p5824_p11 = por %p5823_p8, %p5822_p7 }
 0x5f8   : > { %p5820_p6 = pneg %p5819_p5 }
 0x5fa   : > { %p5825_p12 = pnand %p5824_p11, %p5820_p6 }
 0x5fc   : > { %5828 = shalt.err (!%p5825_p12)
}
 0x5fd   : > { %s5945_s12 = smov 128   ;;  %s5946_s1 = smov 8  }
 0x5fe   : > { %5344 = dma.vmem_to_hbm [thread:$0]  (%p6162_p9), %s4606_s23, 2048, %s4608_s8, %s4593_s25, %s5945_s12, %s5945_s12, %s5946_s1  }
 0x5ff PF: > { %s10214_s26 = sld [smem:[#allocation23_spill]] }
 0x600   : > { %s10215_s16 = sld [smem:[#allocation19_spill]] }
 0x605   : > { %p5375_p3 = scmp.ge.s32.totalorder %s10214_s26, 2 }
 0x606   : > { %s4622_s15 = sand.u32 1, %s10215_s16  }
 0x607   : > { %p5367_p1 = pnand %p5375_p3, %p6087_p10  ;;  %s4623_s28 = scalar_lea.sflag [#allocation5], %s4622_s15 }
 0x609   : > { %p5368_p13 = pneg %p5367_p1 }
 0x60b   : > { %5890 = dma.done.wait (%p5368_p13), %s4623_s28, 2048  }
 0x60c   : > { %5892 = vsyncadd (%p5368_p13), %s4623_s28, 4294965248  ;;  %s26_s19 = sadd.s32 1, %s10214_s26   ;;  %s10217_s11 = sld [smem:[#allocation18_spill]] }
 0x60d   : > { %p23_p0 = scmp.ge.s32.totalorder %s26_s19, 6   ;;  %s10218_s22 = sld [smem:[#allocation28_spill]] }
 0x60e   : > { %s10219_s0 = sld [smem:[#allocation20_spill]]  ;;  %s10224_s30 = smov %s5899_s10 }
 0x60f   : > { %s10220_s14 = sld [smem:[#allocation27_spill]]  ;;  %s10227_s12 = smov %s5911_s13 }
 0x610   : > { %s10221_s16 = sld [smem:[#allocation22_spill]]  ;;  %s10229_s15 = smov %s5927_s17 }
 0x611   : > { %s10222_s9 = sld [smem:[#allocation24_spill]] }
 0x612   : > { %s10223_s18 = sld [smem:[#allocation25_spill]]  ;;  %s10225_s10 = smov %s10217_s11 }
 0x613   : > { %s10226_s11 = smov %s10218_s22  ;;  %25 = sbr.rel (!%p23_p0) target bundleno = 18 (0x12), region = 153 }
 0x614   : > { %s10228_s13 = smov %s10219_s0 }
 0x617   : > { %s10230_s17 = smov %s10222_s9 }
 0x618   :  { %4629 = vsyncpa [#allocation4], 1 }
 0x619   :  { %4631 = vsyncpa [#allocation4 + $0x1], 1 }
 0x61a   :  { %4632 = vsyncpa [#allocation7], 1 }
 0x61b   :  { %4633 = vsyncpa [#allocation5], 1 }
 0x61c   :  { %4635 = vsyncpa [#allocation5 + $0x1], 1 }

</bundles_post_ra>
